<compile_context>
chip_gen: v7x
topology: tpu7x:2x2x1
jax: 0.10.0
libtpu: 0.0.40
codegen_flags: <defaults>
</compile_context>

<pallas_src>
import functools
import math

import jax
import jax.numpy as jnp
from jax.experimental import pallas as pl
from jax.experimental.pallas import tpu as pltpu

NUM_CLASSES = 3
NUM_ANCHORS = 2
LANE = 128  # lane width; cout is padded to this for dense stores


def _round_up(x, m):
    return ((x + m - 1) // m) * m


# ----------------------------------------------------------------------------
# Pallas kernel: fused (im2col-patches @ W) + bias (+ input ReLU / output ReLU)
# ----------------------------------------------------------------------------
def _conv_mm_kernel(p_ref, w_ref, b_ref, o_ref, *, relu, input_relu):
    p = p_ref[...]
    if input_relu:
        # ReLU of the *previous* layer fused into this conv's input (the
        # patches are plain copies of activation elements, and relu(0) == 0
        # for the zero padding, so this is exactly relu-then-conv).
        p = jnp.maximum(p, 0.0)
    acc = jnp.dot(p, w_ref[...], preferred_element_type=jnp.float32)
    acc = acc + b_ref[...]
    if relu:
        acc = jnp.maximum(acc, 0.0)
    o_ref[...] = acc.astype(o_ref.dtype)


# ----------------------------------------------------------------------------
# Conv2d via im2col (wrapper glue) + single-step Pallas fused matmul
# ----------------------------------------------------------------------------
def _im2col(x_nhwc, kh, kw, stride, padding):
    x = x_nhwc
    if padding:
        x = jnp.pad(x, ((0, 0), (padding, padding), (padding, padding), (0, 0)))
    n, h, w, c = x.shape
    h_out = (h - kh) // stride + 1
    w_out = (w - kw) // stride + 1
    cols = []
    for i in range(kh):
        for j in range(kw):
            cols.append(
                x[:, i:i + stride * h_out:stride, j:j + stride * w_out:stride, :])
    p = jnp.concatenate(cols, axis=-1)  # (N, Hout, Wout, kh*kw*C)
    return p.reshape(n * h_out * w_out, kh * kw * c), (n, h_out, w_out)


def conv2d_pallas(x_nhwc, conv, *, relu=False, input_relu=False):
    """conv: packed dict with w2 (K, 128-padded cout), b2, kh, kw, stride, pad, cout."""
    patches, (n, h_out, w_out) = _im2col(
        x_nhwc, conv["kh"], conv["kw"], conv["stride"], conv["pad"])
    m, k = patches.shape
    mp = _round_up(m, 8)
    if mp != m:
        patches = jnp.pad(patches, ((0, mp - m), (0, 0)))

    w2, b2 = conv["w2"], conv["b2"]
    coutp = w2.shape[1]  # lane-dense (128)

    out = pl.pallas_call(
        functools.partial(_conv_mm_kernel, relu=relu, input_relu=input_relu),
        out_shape=jax.ShapeDtypeStruct((mp, coutp), x_nhwc.dtype),
        grid_spec=pltpu.PrefetchScalarGridSpec(
            num_scalar_prefetch=0,
            grid=(1,),  # whole problem in one step; everything fits in VMEM
            in_specs=[
                pl.BlockSpec((mp, k), lambda i: (0, 0)),
                pl.BlockSpec((k, coutp), lambda i: (0, 0)),
                pl.BlockSpec((1, coutp), lambda i: (0, 0)),
            ],
            out_specs=pl.BlockSpec((mp, coutp), lambda i: (0, 0)),
        ),
        compiler_params=pltpu.CompilerParams(
            dimension_semantics=("arbitrary",)),
    )(patches, w2, b2)

    out = out[:m, :conv["cout"]]
    return out.reshape(n, h_out, w_out, conv["cout"])


# ----------------------------------------------------------------------------
# Parameter construction (deterministic, synthetic — no checkpoint load)
# ----------------------------------------------------------------------------
def _xavier_conv(key, kh, kw, cin, cout):
    fan_in = cin * kh * kw
    fan_out = cout * kh * kw
    bound = math.sqrt(6.0 / (fan_in + fan_out))
    wk, bk = jax.random.split(key)
    w = jax.random.uniform(wk, (kh, kw, cin, cout), jnp.float32, -bound, bound)
    b = jax.random.uniform(bk, (cout,), jnp.float32, -0.01, 0.01)
    return w, b


def _pack_conv(w_hwio, bias, stride, pad):
    """Pre-reshape HWIO weight to (K, coutp) with cout zero-padded to 128."""
    kh, kw, cin, cout = w_hwio.shape
    coutp = _round_up(cout, LANE)
    w2 = w_hwio.reshape(kh * kw * cin, cout)
    w2 = jnp.pad(w2, ((0, 0), (0, coutp - cout)))
    b2 = jnp.pad(bias.reshape(1, cout), ((0, 0), (0, coutp - cout)))
    return {"w2": w2, "b2": b2, "kh": kh, "kw": kw,
            "stride": stride, "pad": pad, "cout": cout}


def _pack_fused_header(lw, lb, cw, cb):
    """Fuse the loc and conf header convs of one source into a single conv."""
    w = jnp.concatenate([lw, cw], axis=3)
    b = jnp.concatenate([lb, cb], axis=0)
    return _pack_conv(w, b, 1, 1)


def build_ssd_params(key):
    keys = iter(jax.random.split(key, 64))

    # base: 13 x [Conv3x3(pad=1), ReLU].  Torch layer index 22 is the 12th
    # conv, whose pre-ReLU output is sources[0].
    base = []
    cin = 4
    for _ in range(13):
        cout = 8
        w, b = _xavier_conv(next(keys), 3, 3, cin, cout)
        base.append(_pack_conv(w, b, 1, 1))
        cin = cout

    # extras: alternating 1x1 and 3x3 stride-2 convs (F.relu applied in fwd).
    extras = []
    w, b = _xavier_conv(next(keys), 1, 1, 8, 8)
    extras.append(_pack_conv(w, b, 1, 0))
    w, b = _xavier_conv(next(keys), 3, 3, 8, 16)
    extras.append(_pack_conv(w, b, 2, 1))
    w, b = _xavier_conv(next(keys), 1, 1, 16, 8)
    extras.append(_pack_conv(w, b, 1, 0))
    w, b = _xavier_conv(next(keys), 3, 3, 8, 16)
    extras.append(_pack_conv(w, b, 2, 1))

    # fused loc+conf headers, one per source (source channels: 8, 8, 16, 16)
    src_channels = [8, 8, 16, 16]
    headers = []
    for c in src_channels:
        lw, lb = _xavier_conv(next(keys), 3, 3, c, NUM_ANCHORS * 4)
        cw, cb = _xavier_conv(next(keys), 3, 3, c, NUM_ANCHORS * NUM_CLASSES)
        headers.append(_pack_fused_header(lw, lb, cw, cb))

    return {"base": base, "extras": extras, "headers": headers}


# ----------------------------------------------------------------------------
# SSD forward
# ----------------------------------------------------------------------------
def ssd_forward(x_nchw, params):
    x = jnp.transpose(x_nchw, (0, 2, 3, 1))  # NCHW -> NHWC

    base = params["base"]
    # convs 0..10 (torch layers 0..21): conv with fused output ReLU.
    for conv in base[:11]:
        x = conv2d_pallas(x, conv, relu=True)
    # conv 11 (torch layer 22): NO output ReLU — its pre-ReLU output is
    # sources[0], exactly like the torch forward.
    x = conv2d_pallas(x, base[11], relu=False)
    sources = [x]
    # conv 12 (torch layer 24): the pending ReLU (layer 23) is fused as an
    # input ReLU here, plus its own output ReLU (layer 25).
    x = conv2d_pallas(x, base[12], relu=True, input_relu=True)
    sources.append(x)

    for i, conv in enumerate(params["extras"]):
        x = conv2d_pallas(x, conv, relu=True)
        if i % 2 == 1:
            sources.append(x)

    loc, conf = [], []
    n_loc = NUM_ANCHORS * 4
    n_conf = NUM_ANCHORS * NUM_CLASSES
    for src, hdr in zip(sources, params["headers"]):
        n = src.shape[0]
        lc = conv2d_pallas(src, hdr, relu=False)      # (N, H, W, 8 + 6)
        l = lc[..., :n_loc]
        c = lc[..., n_loc:n_loc + n_conf]
        # back to NCHW so the flatten matches torch's .view(N, 4, -1) order
        l = jnp.transpose(l, (0, 3, 1, 2)).reshape(n, 4, -1)
        c = jnp.transpose(c, (0, 3, 1, 2)).reshape(n, NUM_CLASSES, -1)
        loc.append(l)
        conf.append(c)

    loc = jnp.concatenate(loc, axis=2)
    conf = jnp.concatenate(conf, axis=2)
    # TODO(synk): the reference torch forward computes (loc, conf) but has no
    # return statement (returns None) and prints source shapes; we return the
    # tensors so the result can be validated.
    return loc, conf


# ----------------------------------------------------------------------------
if __name__ == "__main__":
    key = jax.random.PRNGKey(0)
    pkey, xkey = jax.random.split(key)

    params = build_ssd_params(pkey)
    x = jax.random.normal(xkey, (2, 4, 16, 16), jnp.float32)  # NCHW input

    fwd = jax.jit(functools.partial(ssd_forward, params=params))
    loc, conf = fwd(x)
    jax.block_until_ready((loc, conf))

    # sanity: anchors * (16*16 + 16*16 + 8*8 + 4*4) = 2 * 592 = 1184
    assert loc.shape == (2, 4, 1184), loc.shape
    assert conf.shape == (2, NUM_CLASSES, 1184), conf.shape

    print("KERNEL_OK")
</pallas_src>

<mosaic_0001>
module attributes {stable_mosaic.version = 11 : i64} {
  func.func @_conv_mm_kernel(%arg0: i32, %arg1: memref<512x36xf32, #tpu.memory_space<vmem>>, %arg2: memref<36x128xf32, #tpu.memory_space<vmem>>, %arg3: memref<1x128xf32, #tpu.memory_space<vmem>>, %arg4: memref<512x128xf32, #tpu.memory_space<vmem>>) attributes {dimension_semantics = [#tpu.dimension_semantics<arbitrary>], iteration_bounds = array<i64: 1>, scalar_prefetch = 0 : i64, scratch_operands = 0 : i64, tpu.core_type = #tpu.core_type<tc>, window_params = [{pipeline_mode = #tpu.pipeline_mode<synchronous>, transform_indices = @transform_0, window_bounds = array<i64: 512, 36>}, {pipeline_mode = #tpu.pipeline_mode<synchronous>, transform_indices = @transform_1, window_bounds = array<i64: 36, 128>}, {pipeline_mode = #tpu.pipeline_mode<synchronous>, transform_indices = @transform_2, window_bounds = array<i64: 1, 128>}, {pipeline_mode = #tpu.pipeline_mode<synchronous>, transform_indices = @transform_3, window_bounds = array<i64: 512, 128>}]} {
    %c0 = arith.constant 0 : index
    %c0_0 = arith.constant 0 : index
    %0 = vector.load %arg1[%c0, %c0_0] : memref<512x36xf32, #tpu.memory_space<vmem>>, vector<512x36xf32>
    %c0_1 = arith.constant 0 : index
    %c0_2 = arith.constant 0 : index
    %1 = vector.load %arg2[%c0_1, %c0_2] : memref<36x128xf32, #tpu.memory_space<vmem>>, vector<36x128xf32>
    %cst = arith.constant dense<0.000000e+00> : vector<512x128xf32>
    %2 = tpu.matmul %0, %1, %cst {dimension_numbers = #tpu.dot_dimension_numbers<[1], [0], [0], [1], [0, 0, 1, 1], [], []>} : vector<512x36xf32>, vector<36x128xf32>, vector<512x128xf32> -> vector<512x128xf32>
    %c0_3 = arith.constant 0 : index
    %c0_4 = arith.constant 0 : index
    %3 = vector.load %arg3[%c0_3, %c0_4] : memref<1x128xf32, #tpu.memory_space<vmem>>, vector<1x128xf32>
    %4 = vector.broadcast %3 : vector<1x128xf32> to vector<512x128xf32>
    %5 = arith.addf %2, %4 : vector<512x128xf32>
    %cst_5 = arith.constant 0.000000e+00 : f32
    %6 = vector.broadcast %cst_5 : f32 to vector<512x128xf32>
    %7 = arith.maximumf %5, %6 : vector<512x128xf32>
    %c0_6 = arith.constant 0 : index
    %c0_7 = arith.constant 0 : index
    %8 = vector.load %arg4[%c0_6, %c0_7] : memref<512x128xf32, #tpu.memory_space<vmem>>, vector<512x128xf32>
    tpu.vector_store %arg4[%c0_6, %c0_7], %7 {strides = array<i32>} : memref<512x128xf32, #tpu.memory_space<vmem>>, vector<512x128xf32>,
    return
  }
  func.func @transform_0(%arg0: i32) -> (i32, i32) {
    %c0_i32 = arith.constant 0 : i32
    %c0_i32_0 = arith.constant 0 : i32
    %c0_i32_1 = arith.constant 0 : i32
    return %c0_i32, %c0_i32_0 : i32, i32
  }
  func.func @transform_1(%arg0: i32) -> (i32, i32) {
    %c0_i32 = arith.constant 0 : i32
    %c0_i32_0 = arith.constant 0 : i32
    %c0_i32_1 = arith.constant 0 : i32
    return %c0_i32, %c0_i32_0 : i32, i32
  }
  func.func @transform_2(%arg0: i32) -> (i32, i32) {
    %c0_i32 = arith.constant 0 : i32
    %c0_i32_0 = arith.constant 0 : i32
    %c0_i32_1 = arith.constant 0 : i32
    return %c0_i32, %c0_i32_0 : i32, i32
  }
  func.func @transform_3(%arg0: i32) -> (i32, i32) {
    %c0_i32 = arith.constant 0 : i32
    %c0_i32_0 = arith.constant 0 : i32
    %c0_i32_1 = arith.constant 0 : i32
    return %c0_i32, %c0_i32_0 : i32, i32
  }
}

module attributes {stable_mosaic.version = 11 : i64} {
  func.func @_conv_mm_kernel(%arg0: i32, %arg1: memref<512x72xf32, #tpu.memory_space<vmem>>, %arg2: memref<72x128xf32, #tpu.memory_space<vmem>>, %arg3: memref<1x128xf32, #tpu.memory_space<vmem>>, %arg4: memref<512x128xf32, #tpu.memory_space<vmem>>) attributes {dimension_semantics = [#tpu.dimension_semantics<arbitrary>], iteration_bounds = array<i64: 1>, scalar_prefetch = 0 : i64, scratch_operands = 0 : i64, tpu.core_type = #tpu.core_type<tc>, window_params = [{pipeline_mode = #tpu.pipeline_mode<synchronous>, transform_indices = @transform_0, window_bounds = array<i64: 512, 72>}, {pipeline_mode = #tpu.pipeline_mode<synchronous>, transform_indices = @transform_1, window_bounds = array<i64: 72, 128>}, {pipeline_mode = #tpu.pipeline_mode<synchronous>, transform_indices = @transform_2, window_bounds = array<i64: 1, 128>}, {pipeline_mode = #tpu.pipeline_mode<synchronous>, transform_indices = @transform_3, window_bounds = array<i64: 512, 128>}]} {
    %c0 = arith.constant 0 : index
    %c0_0 = arith.constant 0 : index
    %0 = vector.load %arg1[%c0, %c0_0] : memref<512x72xf32, #tpu.memory_space<vmem>>, vector<512x72xf32>
    %c0_1 = arith.constant 0 : index
    %c0_2 = arith.constant 0 : index
    %1 = vector.load %arg2[%c0_1, %c0_2] : memref<72x128xf32, #tpu.memory_space<vmem>>, vector<72x128xf32>
    %cst = arith.constant dense<0.000000e+00> : vector<512x128xf32>
    %2 = tpu.matmul %0, %1, %cst {dimension_numbers = #tpu.dot_dimension_numbers<[1], [0], [0], [1], [0, 0, 1, 1], [], []>} : vector<512x72xf32>, vector<72x128xf32>, vector<512x128xf32> -> vector<512x128xf32>
    %c0_3 = arith.constant 0 : index
    %c0_4 = arith.constant 0 : index
    %3 = vector.load %arg3[%c0_3, %c0_4] : memref<1x128xf32, #tpu.memory_space<vmem>>, vector<1x128xf32>
    %4 = vector.broadcast %3 : vector<1x128xf32> to vector<512x128xf32>
    %5 = arith.addf %2, %4 : vector<512x128xf32>
    %cst_5 = arith.constant 0.000000e+00 : f32
    %6 = vector.broadcast %cst_5 : f32 to vector<512x128xf32>
    %7 = arith.maximumf %5, %6 : vector<512x128xf32>
    %c0_6 = arith.constant 0 : index
    %c0_7 = arith.constant 0 : index
    %8 = vector.load %arg4[%c0_6, %c0_7] : memref<512x128xf32, #tpu.memory_space<vmem>>, vector<512x128xf32>
    tpu.vector_store %arg4[%c0_6, %c0_7], %7 {strides = array<i32>} : memref<512x128xf32, #tpu.memory_space<vmem>>, vector<512x128xf32>,
    return
  }
  func.func @transform_0(%arg0: i32) -> (i32, i32) {
    %c0_i32 = arith.constant 0 : i32
    %c0_i32_0 = arith.constant 0 : i32
    %c0_i32_1 = arith.constant 0 : i32
    return %c0_i32, %c0_i32_0 : i32, i32
  }
  func.func @transform_1(%arg0: i32) -> (i32, i32) {
    %c0_i32 = arith.constant 0 : i32
    %c0_i32_0 = arith.constant 0 : i32
    %c0_i32_1 = arith.constant 0 : i32
    return %c0_i32, %c0_i32_0 : i32, i32
  }
  func.func @transform_2(%arg0: i32) -> (i32, i32) {
    %c0_i32 = arith.constant 0 : i32
    %c0_i32_0 = arith.constant 0 : i32
    %c0_i32_1 = arith.constant 0 : i32
    return %c0_i32, %c0_i32_0 : i32, i32
  }
  func.func @transform_3(%arg0: i32) -> (i32, i32) {
    %c0_i32 = arith.constant 0 : i32
    %c0_i32_0 = arith.constant 0 : i32
    %c0_i32_1 = arith.constant 0 : i32
    return %c0_i32, %c0_i32_0 : i32, i32
  }
}

module attributes {stable_mosaic.version = 11 : i64} {
  func.func @_conv_mm_kernel(%arg0: i32, %arg1: memref<512x72xf32, #tpu.memory_space<vmem>>, %arg2: memref<72x128xf32, #tpu.memory_space<vmem>>, %arg3: memref<1x128xf32, #tpu.memory_space<vmem>>, %arg4: memref<512x128xf32, #tpu.memory_space<vmem>>) attributes {dimension_semantics = [#tpu.dimension_semantics<arbitrary>], iteration_bounds = array<i64: 1>, scalar_prefetch = 0 : i64, scratch_operands = 0 : i64, tpu.core_type = #tpu.core_type<tc>, window_params = [{pipeline_mode = #tpu.pipeline_mode<synchronous>, transform_indices = @transform_0, window_bounds = array<i64: 512, 72>}, {pipeline_mode = #tpu.pipeline_mode<synchronous>, transform_indices = @transform_1, window_bounds = array<i64: 72, 128>}, {pipeline_mode = #tpu.pipeline_mode<synchronous>, transform_indices = @transform_2, window_bounds = array<i64: 1, 128>}, {pipeline_mode = #tpu.pipeline_mode<synchronous>, transform_indices = @transform_3, window_bounds = array<i64: 512, 128>}]} {
    %c0 = arith.constant 0 : index
    %c0_0 = arith.constant 0 : index
    %0 = vector.load %arg1[%c0, %c0_0] : memref<512x72xf32, #tpu.memory_space<vmem>>, vector<512x72xf32>
    %c0_1 = arith.constant 0 : index
    %c0_2 = arith.constant 0 : index
    %1 = vector.load %arg2[%c0_1, %c0_2] : memref<72x128xf32, #tpu.memory_space<vmem>>, vector<72x128xf32>
    %cst = arith.constant dense<0.000000e+00> : vector<512x128xf32>
    %2 = tpu.matmul %0, %1, %cst {dimension_numbers = #tpu.dot_dimension_numbers<[1], [0], [0], [1], [0, 0, 1, 1], [], []>} : vector<512x72xf32>, vector<72x128xf32>, vector<512x128xf32> -> vector<512x128xf32>
    %c0_3 = arith.constant 0 : index
    %c0_4 = arith.constant 0 : index
    %3 = vector.load %arg3[%c0_3, %c0_4] : memref<1x128xf32, #tpu.memory_space<vmem>>, vector<1x128xf32>
    %4 = vector.broadcast %3 : vector<1x128xf32> to vector<512x128xf32>
    %5 = arith.addf %2, %4 : vector<512x128xf32>
    %c0_5 = arith.constant 0 : index
    %c0_6 = arith.constant 0 : index
    %6 = vector.load %arg4[%c0_5, %c0_6] : memref<512x128xf32, #tpu.memory_space<vmem>>, vector<512x128xf32>
    tpu.vector_store %arg4[%c0_5, %c0_6], %5 {strides = array<i32>} : memref<512x128xf32, #tpu.memory_space<vmem>>, vector<512x128xf32>,
    return
  }
  func.func @transform_0(%arg0: i32) -> (i32, i32) {
    %c0_i32 = arith.constant 0 : i32
    %c0_i32_0 = arith.constant 0 : i32
    %c0_i32_1 = arith.constant 0 : i32
    return %c0_i32, %c0_i32_0 : i32, i32
  }
  func.func @transform_1(%arg0: i32) -> (i32, i32) {
    %c0_i32 = arith.constant 0 : i32
    %c0_i32_0 = arith.constant 0 : i32
    %c0_i32_1 = arith.constant 0 : i32
    return %c0_i32, %c0_i32_0 : i32, i32
  }
  func.func @transform_2(%arg0: i32) -> (i32, i32) {
    %c0_i32 = arith.constant 0 : i32
    %c0_i32_0 = arith.constant 0 : i32
    %c0_i32_1 = arith.constant 0 : i32
    return %c0_i32, %c0_i32_0 : i32, i32
  }
  func.func @transform_3(%arg0: i32) -> (i32, i32) {
    %c0_i32 = arith.constant 0 : i32
    %c0_i32_0 = arith.constant 0 : i32
    %c0_i32_1 = arith.constant 0 : i32
    return %c0_i32, %c0_i32_0 : i32, i32
  }
}

module attributes {stable_mosaic.version = 11 : i64} {
  func.func @_conv_mm_kernel(%arg0: i32, %arg1: memref<512x72xf32, #tpu.memory_space<vmem>>, %arg2: memref<72x128xf32, #tpu.memory_space<vmem>>, %arg3: memref<1x128xf32, #tpu.memory_space<vmem>>, %arg4: memref<512x128xf32, #tpu.memory_space<vmem>>) attributes {dimension_semantics = [#tpu.dimension_semantics<arbitrary>], iteration_bounds = array<i64: 1>, scalar_prefetch = 0 : i64, scratch_operands = 0 : i64, tpu.core_type = #tpu.core_type<tc>, window_params = [{pipeline_mode = #tpu.pipeline_mode<synchronous>, transform_indices = @transform_0, window_bounds = array<i64: 512, 72>}, {pipeline_mode = #tpu.pipeline_mode<synchronous>, transform_indices = @transform_1, window_bounds = array<i64: 72, 128>}, {pipeline_mode = #tpu.pipeline_mode<synchronous>, transform_indices = @transform_2, window_bounds = array<i64: 1, 128>}, {pipeline_mode = #tpu.pipeline_mode<synchronous>, transform_indices = @transform_3, window_bounds = array<i64: 512, 128>}]} {
    %c0 = arith.constant 0 : index
    %c0_0 = arith.constant 0 : index
    %0 = vector.load %arg1[%c0, %c0_0] : memref<512x72xf32, #tpu.memory_space<vmem>>, vector<512x72xf32>
    %cst = arith.constant 0.000000e+00 : f32
    %1 = vector.broadcast %cst : f32 to vector<512x72xf32>
    %2 = arith.maximumf %0, %1 : vector<512x72xf32>
    %c0_1 = arith.constant 0 : index
    %c0_2 = arith.constant 0 : index
    %3 = vector.load %arg2[%c0_1, %c0_2] : memref<72x128xf32, #tpu.memory_space<vmem>>, vector<72x128xf32>
    %cst_3 = arith.constant dense<0.000000e+00> : vector<512x128xf32>
    %4 = tpu.matmul %2, %3, %cst_3 {dimension_numbers = #tpu.dot_dimension_numbers<[1], [0], [0], [1], [0, 0, 1, 1], [], []>} : vector<512x72xf32>, vector<72x128xf32>, vector<512x128xf32> -> vector<512x128xf32>
    %c0_4 = arith.constant 0 : index
    %c0_5 = arith.constant 0 : index
    %5 = vector.load %arg3[%c0_4, %c0_5] : memref<1x128xf32, #tpu.memory_space<vmem>>, vector<1x128xf32>
    %6 = vector.broadcast %5 : vector<1x128xf32> to vector<512x128xf32>
    %7 = arith.addf %4, %6 : vector<512x128xf32>
    %cst_6 = arith.constant 0.000000e+00 : f32
    %8 = vector.broadcast %cst_6 : f32 to vector<512x128xf32>
    %9 = arith.maximumf %7, %8 : vector<512x128xf32>
    %c0_7 = arith.constant 0 : index
    %c0_8 = arith.constant 0 : index
    %10 = vector.load %arg4[%c0_7, %c0_8] : memref<512x128xf32, #tpu.memory_space<vmem>>, vector<512x128xf32>
    tpu.vector_store %arg4[%c0_7, %c0_8], %9 {strides = array<i32>} : memref<512x128xf32, #tpu.memory_space<vmem>>, vector<512x128xf32>,
    return
  }
  func.func @transform_0(%arg0: i32) -> (i32, i32) {
    %c0_i32 = arith.constant 0 : i32
    %c0_i32_0 = arith.constant 0 : i32
    %c0_i32_1 = arith.constant 0 : i32
    return %c0_i32, %c0_i32_0 : i32, i32
  }
  func.func @transform_1(%arg0: i32) -> (i32, i32) {
    %c0_i32 = arith.constant 0 : i32
    %c0_i32_0 = arith.constant 0 : i32
    %c0_i32_1 = arith.constant 0 : i32
    return %c0_i32, %c0_i32_0 : i32, i32
  }
  func.func @transform_2(%arg0: i32) -> (i32, i32) {
    %c0_i32 = arith.constant 0 : i32
    %c0_i32_0 = arith.constant 0 : i32
    %c0_i32_1 = arith.constant 0 : i32
    return %c0_i32, %c0_i32_0 : i32, i32
  }
  func.func @transform_3(%arg0: i32) -> (i32, i32) {
    %c0_i32 = arith.constant 0 : i32
    %c0_i32_0 = arith.constant 0 : i32
    %c0_i32_1 = arith.constant 0 : i32
    return %c0_i32, %c0_i32_0 : i32, i32
  }
}

module attributes {stable_mosaic.version = 11 : i64} {
  func.func @_conv_mm_kernel(%arg0: i32, %arg1: memref<512x8xf32, #tpu.memory_space<vmem>>, %arg2: memref<8x128xf32, #tpu.memory_space<vmem>>, %arg3: memref<1x128xf32, #tpu.memory_space<vmem>>, %arg4: memref<512x128xf32, #tpu.memory_space<vmem>>) attributes {dimension_semantics = [#tpu.dimension_semantics<arbitrary>], iteration_bounds = array<i64: 1>, scalar_prefetch = 0 : i64, scratch_operands = 0 : i64, tpu.core_type = #tpu.core_type<tc>, window_params = [{pipeline_mode = #tpu.pipeline_mode<synchronous>, transform_indices = @transform_0, window_bounds = array<i64: 512, 8>}, {pipeline_mode = #tpu.pipeline_mode<synchronous>, transform_indices = @transform_1, window_bounds = array<i64: 8, 128>}, {pipeline_mode = #tpu.pipeline_mode<synchronous>, transform_indices = @transform_2, window_bounds = array<i64: 1, 128>}, {pipeline_mode = #tpu.pipeline_mode<synchronous>, transform_indices = @transform_3, window_bounds = array<i64: 512, 128>}]} {
    %c0 = arith.constant 0 : index
    %c0_0 = arith.constant 0 : index
    %0 = vector.load %arg1[%c0, %c0_0] : memref<512x8xf32, #tpu.memory_space<vmem>>, vector<512x8xf32>
    %c0_1 = arith.constant 0 : index
    %c0_2 = arith.constant 0 : index
    %1 = vector.load %arg2[%c0_1, %c0_2] : memref<8x128xf32, #tpu.memory_space<vmem>>, vector<8x128xf32>
    %cst = arith.constant dense<0.000000e+00> : vector<512x128xf32>
    %2 = tpu.matmul %0, %1, %cst {dimension_numbers = #tpu.dot_dimension_numbers<[1], [0], [0], [1], [0, 0, 1, 1], [], []>} : vector<512x8xf32>, vector<8x128xf32>, vector<512x128xf32> -> vector<512x128xf32>
    %c0_3 = arith.constant 0 : index
    %c0_4 = arith.constant 0 : index
    %3 = vector.load %arg3[%c0_3, %c0_4] : memref<1x128xf32, #tpu.memory_space<vmem>>, vector<1x128xf32>
    %4 = vector.broadcast %3 : vector<1x128xf32> to vector<512x128xf32>
    %5 = arith.addf %2, %4 : vector<512x128xf32>
    %cst_5 = arith.constant 0.000000e+00 : f32
    %6 = vector.broadcast %cst_5 : f32 to vector<512x128xf32>
    %7 = arith.maximumf %5, %6 : vector<512x128xf32>
    %c0_6 = arith.constant 0 : index
    %c0_7 = arith.constant 0 : index
    %8 = vector.load %arg4[%c0_6, %c0_7] : memref<512x128xf32, #tpu.memory_space<vmem>>, vector<512x128xf32>
    tpu.vector_store %arg4[%c0_6, %c0_7], %7 {strides = array<i32>} : memref<512x128xf32, #tpu.memory_space<vmem>>, vector<512x128xf32>,
    return
  }
  func.func @transform_0(%arg0: i32) -> (i32, i32) {
    %c0_i32 = arith.constant 0 : i32
    %c0_i32_0 = arith.constant 0 : i32
    %c0_i32_1 = arith.constant 0 : i32
    return %c0_i32, %c0_i32_0 : i32, i32
  }
  func.func @transform_1(%arg0: i32) -> (i32, i32) {
    %c0_i32 = arith.constant 0 : i32
    %c0_i32_0 = arith.constant 0 : i32
    %c0_i32_1 = arith.constant 0 : i32
    return %c0_i32, %c0_i32_0 : i32, i32
  }
  func.func @transform_2(%arg0: i32) -> (i32, i32) {
    %c0_i32 = arith.constant 0 : i32
    %c0_i32_0 = arith.constant 0 : i32
    %c0_i32_1 = arith.constant 0 : i32
    return %c0_i32, %c0_i32_0 : i32, i32
  }
  func.func @transform_3(%arg0: i32) -> (i32, i32) {
    %c0_i32 = arith.constant 0 : i32
    %c0_i32_0 = arith.constant 0 : i32
    %c0_i32_1 = arith.constant 0 : i32
    return %c0_i32, %c0_i32_0 : i32, i32
  }
}

module attributes {stable_mosaic.version = 11 : i64} {
  func.func @_conv_mm_kernel(%arg0: i32, %arg1: memref<128x72xf32, #tpu.memory_space<vmem>>, %arg2: memref<72x128xf32, #tpu.memory_space<vmem>>, %arg3: memref<1x128xf32, #tpu.memory_space<vmem>>, %arg4: memref<128x128xf32, #tpu.memory_space<vmem>>) attributes {dimension_semantics = [#tpu.dimension_semantics<arbitrary>], iteration_bounds = array<i64: 1>, scalar_prefetch = 0 : i64, scratch_operands = 0 : i64, tpu.core_type = #tpu.core_type<tc>, window_params = [{pipeline_mode = #tpu.pipeline_mode<synchronous>, transform_indices = @transform_0, window_bounds = array<i64: 128, 72>}, {pipeline_mode = #tpu.pipeline_mode<synchronous>, transform_indices = @transform_1, window_bounds = array<i64: 72, 128>}, {pipeline_mode = #tpu.pipeline_mode<synchronous>, transform_indices = @transform_2, window_bounds = array<i64: 1, 128>}, {pipeline_mode = #tpu.pipeline_mode<synchronous>, transform_indices = @transform_3, window_bounds = array<i64: 128, 128>}]} {
    %c0 = arith.constant 0 : index
    %c0_0 = arith.constant 0 : index
    %0 = vector.load %arg1[%c0, %c0_0] : memref<128x72xf32, #tpu.memory_space<vmem>>, vector<128x72xf32>
    %c0_1 = arith.constant 0 : index
    %c0_2 = arith.constant 0 : index
    %1 = vector.load %arg2[%c0_1, %c0_2] : memref<72x128xf32, #tpu.memory_space<vmem>>, vector<72x128xf32>
    %cst = arith.constant dense<0.000000e+00> : vector<128x128xf32>
    %2 = tpu.matmul %0, %1, %cst {dimension_numbers = #tpu.dot_dimension_numbers<[1], [0], [0], [1], [0, 0, 1, 1], [], []>} : vector<128x72xf32>, vector<72x128xf32>, vector<128x128xf32> -> vector<128x128xf32>
    %c0_3 = arith.constant 0 : index
    %c0_4 = arith.constant 0 : index
    %3 = vector.load %arg3[%c0_3, %c0_4] : memref<1x128xf32, #tpu.memory_space<vmem>>, vector<1x128xf32>
    %4 = vector.broadcast %3 : vector<1x128xf32> to vector<128x128xf32>
    %5 = arith.addf %2, %4 : vector<128x128xf32>
    %cst_5 = arith.constant 0.000000e+00 : f32
    %6 = vector.broadcast %cst_5 : f32 to vector<128x128xf32>
    %7 = arith.maximumf %5, %6 : vector<128x128xf32>
    %c0_6 = arith.constant 0 : index
    %c0_7 = arith.constant 0 : index
    %8 = vector.load %arg4[%c0_6, %c0_7] : memref<128x128xf32, #tpu.memory_space<vmem>>, vector<128x128xf32>
    tpu.vector_store %arg4[%c0_6, %c0_7], %7 {strides = array<i32>} : memref<128x128xf32, #tpu.memory_space<vmem>>, vector<128x128xf32>,
    return
  }
  func.func @transform_0(%arg0: i32) -> (i32, i32) {
    %c0_i32 = arith.constant 0 : i32
    %c0_i32_0 = arith.constant 0 : i32
    %c0_i32_1 = arith.constant 0 : i32
    return %c0_i32, %c0_i32_0 : i32, i32
  }
  func.func @transform_1(%arg0: i32) -> (i32, i32) {
    %c0_i32 = arith.constant 0 : i32
    %c0_i32_0 = arith.constant 0 : i32
    %c0_i32_1 = arith.constant 0 : i32
    return %c0_i32, %c0_i32_0 : i32, i32
  }
  func.func @transform_2(%arg0: i32) -> (i32, i32) {
    %c0_i32 = arith.constant 0 : i32
    %c0_i32_0 = arith.constant 0 : i32
    %c0_i32_1 = arith.constant 0 : i32
    return %c0_i32, %c0_i32_0 : i32, i32
  }
  func.func @transform_3(%arg0: i32) -> (i32, i32) {
    %c0_i32 = arith.constant 0 : i32
    %c0_i32_0 = arith.constant 0 : i32
    %c0_i32_1 = arith.constant 0 : i32
    return %c0_i32, %c0_i32_0 : i32, i32
  }
}

module attributes {stable_mosaic.version = 11 : i64} {
  func.func @_conv_mm_kernel(%arg0: i32, %arg1: memref<128x16xf32, #tpu.memory_space<vmem>>, %arg2: memref<16x128xf32, #tpu.memory_space<vmem>>, %arg3: memref<1x128xf32, #tpu.memory_space<vmem>>, %arg4: memref<128x128xf32, #tpu.memory_space<vmem>>) attributes {dimension_semantics = [#tpu.dimension_semantics<arbitrary>], iteration_bounds = array<i64: 1>, scalar_prefetch = 0 : i64, scratch_operands = 0 : i64, tpu.core_type = #tpu.core_type<tc>, window_params = [{pipeline_mode = #tpu.pipeline_mode<synchronous>, transform_indices = @transform_0, window_bounds = array<i64: 128, 16>}, {pipeline_mode = #tpu.pipeline_mode<synchronous>, transform_indices = @transform_1, window_bounds = array<i64: 16, 128>}, {pipeline_mode = #tpu.pipeline_mode<synchronous>, transform_indices = @transform_2, window_bounds = array<i64: 1, 128>}, {pipeline_mode = #tpu.pipeline_mode<synchronous>, transform_indices = @transform_3, window_bounds = array<i64: 128, 128>}]} {
    %c0 = arith.constant 0 : index
    %c0_0 = arith.constant 0 : index
    %0 = vector.load %arg1[%c0, %c0_0] : memref<128x16xf32, #tpu.memory_space<vmem>>, vector<128x16xf32>
    %c0_1 = arith.constant 0 : index
    %c0_2 = arith.constant 0 : index
    %1 = vector.load %arg2[%c0_1, %c0_2] : memref<16x128xf32, #tpu.memory_space<vmem>>, vector<16x128xf32>
    %cst = arith.constant dense<0.000000e+00> : vector<128x128xf32>
    %2 = tpu.matmul %0, %1, %cst {dimension_numbers = #tpu.dot_dimension_numbers<[1], [0], [0], [1], [0, 0, 1, 1], [], []>} : vector<128x16xf32>, vector<16x128xf32>, vector<128x128xf32> -> vector<128x128xf32>
    %c0_3 = arith.constant 0 : index
    %c0_4 = arith.constant 0 : index
    %3 = vector.load %arg3[%c0_3, %c0_4] : memref<1x128xf32, #tpu.memory_space<vmem>>, vector<1x128xf32>
    %4 = vector.broadcast %3 : vector<1x128xf32> to vector<128x128xf32>
    %5 = arith.addf %2, %4 : vector<128x128xf32>
    %cst_5 = arith.constant 0.000000e+00 : f32
    %6 = vector.broadcast %cst_5 : f32 to vector<128x128xf32>
    %7 = arith.maximumf %5, %6 : vector<128x128xf32>
    %c0_6 = arith.constant 0 : index
    %c0_7 = arith.constant 0 : index
    %8 = vector.load %arg4[%c0_6, %c0_7] : memref<128x128xf32, #tpu.memory_space<vmem>>, vector<128x128xf32>
    tpu.vector_store %arg4[%c0_6, %c0_7], %7 {strides = array<i32>} : memref<128x128xf32, #tpu.memory_space<vmem>>, vector<128x128xf32>,
    return
  }
  func.func @transform_0(%arg0: i32) -> (i32, i32) {
    %c0_i32 = arith.constant 0 : i32
    %c0_i32_0 = arith.constant 0 : i32
    %c0_i32_1 = arith.constant 0 : i32
    return %c0_i32, %c0_i32_0 : i32, i32
  }
  func.func @transform_1(%arg0: i32) -> (i32, i32) {
    %c0_i32 = arith.constant 0 : i32
    %c0_i32_0 = arith.constant 0 : i32
    %c0_i32_1 = arith.constant 0 : i32
    return %c0_i32, %c0_i32_0 : i32, i32
  }
  func.func @transform_2(%arg0: i32) -> (i32, i32) {
    %c0_i32 = arith.constant 0 : i32
    %c0_i32_0 = arith.constant 0 : i32
    %c0_i32_1 = arith.constant 0 : i32
    return %c0_i32, %c0_i32_0 : i32, i32
  }
  func.func @transform_3(%arg0: i32) -> (i32, i32) {
    %c0_i32 = arith.constant 0 : i32
    %c0_i32_0 = arith.constant 0 : i32
    %c0_i32_1 = arith.constant 0 : i32
    return %c0_i32, %c0_i32_0 : i32, i32
  }
}

module attributes {stable_mosaic.version = 11 : i64} {
  func.func @_conv_mm_kernel(%arg0: i32, %arg1: memref<32x72xf32, #tpu.memory_space<vmem>>, %arg2: memref<72x128xf32, #tpu.memory_space<vmem>>, %arg3: memref<1x128xf32, #tpu.memory_space<vmem>>, %arg4: memref<32x128xf32, #tpu.memory_space<vmem>>) attributes {dimension_semantics = [#tpu.dimension_semantics<arbitrary>], iteration_bounds = array<i64: 1>, scalar_prefetch = 0 : i64, scratch_operands = 0 : i64, tpu.core_type = #tpu.core_type<tc>, window_params = [{pipeline_mode = #tpu.pipeline_mode<synchronous>, transform_indices = @transform_0, window_bounds = array<i64: 32, 72>}, {pipeline_mode = #tpu.pipeline_mode<synchronous>, transform_indices = @transform_1, window_bounds = array<i64: 72, 128>}, {pipeline_mode = #tpu.pipeline_mode<synchronous>, transform_indices = @transform_2, window_bounds = array<i64: 1, 128>}, {pipeline_mode = #tpu.pipeline_mode<synchronous>, transform_indices = @transform_3, window_bounds = array<i64: 32, 128>}]} {
    %c0 = arith.constant 0 : index
    %c0_0 = arith.constant 0 : index
    %0 = vector.load %arg1[%c0, %c0_0] : memref<32x72xf32, #tpu.memory_space<vmem>>, vector<32x72xf32>
    %c0_1 = arith.constant 0 : index
    %c0_2 = arith.constant 0 : index
    %1 = vector.load %arg2[%c0_1, %c0_2] : memref<72x128xf32, #tpu.memory_space<vmem>>, vector<72x128xf32>
    %cst = arith.constant dense<0.000000e+00> : vector<32x128xf32>
    %2 = tpu.matmul %0, %1, %cst {dimension_numbers = #tpu.dot_dimension_numbers<[1], [0], [0], [1], [0, 0, 1, 1], [], []>} : vector<32x72xf32>, vector<72x128xf32>, vector<32x128xf32> -> vector<32x128xf32>
    %c0_3 = arith.constant 0 : index
    %c0_4 = arith.constant 0 : index
    %3 = vector.load %arg3[%c0_3, %c0_4] : memref<1x128xf32, #tpu.memory_space<vmem>>, vector<1x128xf32>
    %4 = vector.broadcast %3 : vector<1x128xf32> to vector<32x128xf32>
    %5 = arith.addf %2, %4 : vector<32x128xf32>
    %cst_5 = arith.constant 0.000000e+00 : f32
    %6 = vector.broadcast %cst_5 : f32 to vector<32x128xf32>
    %7 = arith.maximumf %5, %6 : vector<32x128xf32>
    %c0_6 = arith.constant 0 : index
    %c0_7 = arith.constant 0 : index
    %8 = vector.load %arg4[%c0_6, %c0_7] : memref<32x128xf32, #tpu.memory_space<vmem>>, vector<32x128xf32>
    tpu.vector_store %arg4[%c0_6, %c0_7], %7 {strides = array<i32>} : memref<32x128xf32, #tpu.memory_space<vmem>>, vector<32x128xf32>,
    return
  }
  func.func @transform_0(%arg0: i32) -> (i32, i32) {
    %c0_i32 = arith.constant 0 : i32
    %c0_i32_0 = arith.constant 0 : i32
    %c0_i32_1 = arith.constant 0 : i32
    return %c0_i32, %c0_i32_0 : i32, i32
  }
  func.func @transform_1(%arg0: i32) -> (i32, i32) {
    %c0_i32 = arith.constant 0 : i32
    %c0_i32_0 = arith.constant 0 : i32
    %c0_i32_1 = arith.constant 0 : i32
    return %c0_i32, %c0_i32_0 : i32, i32
  }
  func.func @transform_2(%arg0: i32) -> (i32, i32) {
    %c0_i32 = arith.constant 0 : i32
    %c0_i32_0 = arith.constant 0 : i32
    %c0_i32_1 = arith.constant 0 : i32
    return %c0_i32, %c0_i32_0 : i32, i32
  }
  func.func @transform_3(%arg0: i32) -> (i32, i32) {
    %c0_i32 = arith.constant 0 : i32
    %c0_i32_0 = arith.constant 0 : i32
    %c0_i32_1 = arith.constant 0 : i32
    return %c0_i32, %c0_i32_0 : i32, i32
  }
}

module attributes {stable_mosaic.version = 11 : i64} {
  func.func @_conv_mm_kernel(%arg0: i32, %arg1: memref<32x144xf32, #tpu.memory_space<vmem>>, %arg2: memref<144x128xf32, #tpu.memory_space<vmem>>, %arg3: memref<1x128xf32, #tpu.memory_space<vmem>>, %arg4: memref<32x128xf32, #tpu.memory_space<vmem>>) attributes {dimension_semantics = [#tpu.dimension_semantics<arbitrary>], iteration_bounds = array<i64: 1>, scalar_prefetch = 0 : i64, scratch_operands = 0 : i64, tpu.core_type = #tpu.core_type<tc>, window_params = [{pipeline_mode = #tpu.pipeline_mode<synchronous>, transform_indices = @transform_0, window_bounds = array<i64: 32, 144>}, {pipeline_mode = #tpu.pipeline_mode<synchronous>, transform_indices = @transform_1, window_bounds = array<i64: 144, 128>}, {pipeline_mode = #tpu.pipeline_mode<synchronous>, transform_indices = @transform_2, window_bounds = array<i64: 1, 128>}, {pipeline_mode = #tpu.pipeline_mode<synchronous>, transform_indices = @transform_3, window_bounds = array<i64: 32, 128>}]} {
    %c0 = arith.constant 0 : index
    %c0_0 = arith.constant 0 : index
    %0 = vector.load %arg1[%c0, %c0_0] : memref<32x144xf32, #tpu.memory_space<vmem>>, vector<32x144xf32>
    %c0_1 = arith.constant 0 : index
    %c0_2 = arith.constant 0 : index
    %1 = vector.load %arg2[%c0_1, %c0_2] : memref<144x128xf32, #tpu.memory_space<vmem>>, vector<144x128xf32>
    %cst = arith.constant dense<0.000000e+00> : vector<32x128xf32>
    %2 = tpu.matmul %0, %1, %cst {dimension_numbers = #tpu.dot_dimension_numbers<[1], [0], [0], [1], [0, 0, 1, 1], [], []>} : vector<32x144xf32>, vector<144x128xf32>, vector<32x128xf32> -> vector<32x128xf32>
    %c0_3 = arith.constant 0 : index
    %c0_4 = arith.constant 0 : index
    %3 = vector.load %arg3[%c0_3, %c0_4] : memref<1x128xf32, #tpu.memory_space<vmem>>, vector<1x128xf32>
    %4 = vector.broadcast %3 : vector<1x128xf32> to vector<32x128xf32>
    %5 = arith.addf %2, %4 : vector<32x128xf32>
    %c0_5 = arith.constant 0 : index
    %c0_6 = arith.constant 0 : index
    %6 = vector.load %arg4[%c0_5, %c0_6] : memref<32x128xf32, #tpu.memory_space<vmem>>, vector<32x128xf32>
    tpu.vector_store %arg4[%c0_5, %c0_6], %5 {strides = array<i32>} : memref<32x128xf32, #tpu.memory_space<vmem>>, vector<32x128xf32>,
    return
  }
  func.func @transform_0(%arg0: i32) -> (i32, i32) {
    %c0_i32 = arith.constant 0 : i32
    %c0_i32_0 = arith.constant 0 : i32
    %c0_i32_1 = arith.constant 0 : i32
    return %c0_i32, %c0_i32_0 : i32, i32
  }
  func.func @transform_1(%arg0: i32) -> (i32, i32) {
    %c0_i32 = arith.constant 0 : i32
    %c0_i32_0 = arith.constant 0 : i32
    %c0_i32_1 = arith.constant 0 : i32
    return %c0_i32, %c0_i32_0 : i32, i32
  }
  func.func @transform_2(%arg0: i32) -> (i32, i32) {
    %c0_i32 = arith.constant 0 : i32
    %c0_i32_0 = arith.constant 0 : i32
    %c0_i32_1 = arith.constant 0 : i32
    return %c0_i32, %c0_i32_0 : i32, i32
  }
  func.func @transform_3(%arg0: i32) -> (i32, i32) {
    %c0_i32 = arith.constant 0 : i32
    %c0_i32_0 = arith.constant 0 : i32
    %c0_i32_1 = arith.constant 0 : i32
    return %c0_i32, %c0_i32_0 : i32, i32
  }
}

module attributes {stable_mosaic.version = 11 : i64} {
  func.func @_conv_mm_kernel(%arg0: i32, %arg1: memref<128x144xf32, #tpu.memory_space<vmem>>, %arg2: memref<144x128xf32, #tpu.memory_space<vmem>>, %arg3: memref<1x128xf32, #tpu.memory_space<vmem>>, %arg4: memref<128x128xf32, #tpu.memory_space<vmem>>) attributes {dimension_semantics = [#tpu.dimension_semantics<arbitrary>], iteration_bounds = array<i64: 1>, scalar_prefetch = 0 : i64, scratch_operands = 0 : i64, tpu.core_type = #tpu.core_type<tc>, window_params = [{pipeline_mode = #tpu.pipeline_mode<synchronous>, transform_indices = @transform_0, window_bounds = array<i64: 128, 144>}, {pipeline_mode = #tpu.pipeline_mode<synchronous>, transform_indices = @transform_1, window_bounds = array<i64: 144, 128>}, {pipeline_mode = #tpu.pipeline_mode<synchronous>, transform_indices = @transform_2, window_bounds = array<i64: 1, 128>}, {pipeline_mode = #tpu.pipeline_mode<synchronous>, transform_indices = @transform_3, window_bounds = array<i64: 128, 128>}]} {
    %c0 = arith.constant 0 : index
    %c0_0 = arith.constant 0 : index
    %0 = vector.load %arg1[%c0, %c0_0] : memref<128x144xf32, #tpu.memory_space<vmem>>, vector<128x144xf32>
    %c0_1 = arith.constant 0 : index
    %c0_2 = arith.constant 0 : index
    %1 = vector.load %arg2[%c0_1, %c0_2] : memref<144x128xf32, #tpu.memory_space<vmem>>, vector<144x128xf32>
    %cst = arith.constant dense<0.000000e+00> : vector<128x128xf32>
    %2 = tpu.matmul %0, %1, %cst {dimension_numbers = #tpu.dot_dimension_numbers<[1], [0], [0], [1], [0, 0, 1, 1], [], []>} : vector<128x144xf32>, vector<144x128xf32>, vector<128x128xf32> -> vector<128x128xf32>
    %c0_3 = arith.constant 0 : index
    %c0_4 = arith.constant 0 : index
    %3 = vector.load %arg3[%c0_3, %c0_4] : memref<1x128xf32, #tpu.memory_space<vmem>>, vector<1x128xf32>
    %4 = vector.broadcast %3 : vector<1x128xf32> to vector<128x128xf32>
    %5 = arith.addf %2, %4 : vector<128x128xf32>
    %c0_5 = arith.constant 0 : index
    %c0_6 = arith.constant 0 : index
    %6 = vector.load %arg4[%c0_5, %c0_6] : memref<128x128xf32, #tpu.memory_space<vmem>>, vector<128x128xf32>
    tpu.vector_store %arg4[%c0_5, %c0_6], %5 {strides = array<i32>} : memref<128x128xf32, #tpu.memory_space<vmem>>, vector<128x128xf32>,
    return
  }
  func.func @transform_0(%arg0: i32) -> (i32, i32) {
    %c0_i32 = arith.constant 0 : i32
    %c0_i32_0 = arith.constant 0 : i32
    %c0_i32_1 = arith.constant 0 : i32
    return %c0_i32, %c0_i32_0 : i32, i32
  }
  func.func @transform_1(%arg0: i32) -> (i32, i32) {
    %c0_i32 = arith.constant 0 : i32
    %c0_i32_0 = arith.constant 0 : i32
    %c0_i32_1 = arith.constant 0 : i32
    return %c0_i32, %c0_i32_0 : i32, i32
  }
  func.func @transform_2(%arg0: i32) -> (i32, i32) {
    %c0_i32 = arith.constant 0 : i32
    %c0_i32_0 = arith.constant 0 : i32
    %c0_i32_1 = arith.constant 0 : i32
    return %c0_i32, %c0_i32_0 : i32, i32
  }
  func.func @transform_3(%arg0: i32) -> (i32, i32) {
    %c0_i32 = arith.constant 0 : i32
    %c0_i32_0 = arith.constant 0 : i32
    %c0_i32_1 = arith.constant 0 : i32
    return %c0_i32, %c0_i32_0 : i32, i32
  }
}

</mosaic_0001>

<bundles_post_ra>
// kernel: ssd_forward.21
= control target key start
LH: loop header
LB: loop body
LE: loop exit
PB: predicated region body
PF: predicated region fallthrough
CT: control target
= control target key end

     0   :  { %vm90_vm0 = vcmask 293888   ;;  %vm283_vm1 = vcmask 1043456   ;;  %s1611_s1 = inlined_call_operand.vmem [shape: f32[36,128], index: 1, kind: input, shape index: {}]   ;;  %s1612_s0 = inlined_call_operand.vmem [shape: f32[512,36], index: 0, kind: input, shape index: {}]   ;;  %s1613_s2 = inlined_call_operand.vmem [shape: f32[1,128], index: 2, kind: input, shape index: {}]   ;;  %s1614_s3 = inlined_call_operand.vmem [shape: f32[512,128], index: 3, kind: output, shape index: {}]  }
   0x1   :  { %v78_v0 = vld [vmem:[%s1611_s1] sm:$0xff]  ;;  %v79_v1 = vld [vmem:[%s1611_s1 + $0x8] sm:$0xff]  ;;  %v80_v2 = vld [vmem:[%s1611_s1 + $0x10] sm:$0xff] }
   0x2   :  { %v1045_v3 = vpack.c.bf16 %v79_v1, %v78_v0  ;;  %v81_v4 = vld [vmem:[%s1611_s1 + $0x18] sm:$0xff]  ;;  %v14_v5 = vld [vmem:[%s1612_s0] sm:$0xff]  ;;  %v15_v9 = vld [vmem:[%s1612_s0 + $0x8] sm:$0xff] }
   0x3   :  { %v1049_v6 = vpack.c.bf16 %v81_v4, %v80_v2  ;;  %949 = vmatprep.mubr.msk.f32.mxu0 %vm90_vm0, %v14_v5  ;;  %v46_v7 = vld [vmem:[%s1612_s0 + $0x100] sm:$0xff]  ;;  %v47_v10 = vld [vmem:[%s1612_s0 + $0x108] sm:$0xff]  ;;  %v16_v11 = vld [vmem:[%s1612_s0 + $0x10] sm:$0xff] }
   0x4   :  { %1046 = vmatprep.subr.bf16.mxu0 %v1045_v3  ;;  %1053 = vmatprep.subr.bf16.mxu1 %v1045_v3  ;;  %v82_v8 = vld [vmem:[%s1611_s1 + $0x20] sm:$0xf]  ;;  %v48_v12 = vld [vmem:[%s1612_s0 + $0x110] sm:$0xff]  ;;  %v17_v13 = vld [vmem:[%s1612_s0 + $0x18] sm:$0xff] }
   0x5   :  { %1048 = vmatpush3.bf16.msra.mxu0 %v1045_v3  ;;  %1056 = vmatpush3.bf16.msra.mxu1 %v1045_v3  ;;  %v49_v14 = vld [vmem:[%s1612_s0 + $0x118] sm:$0xff]  ;;  %v18_v15 = vld [vmem:[%s1612_s0 + $0x20] sm:$0xff]  ;;  %v19_v17 = vld [vmem:[%s1612_s0 + $0x28] sm:$0xff] }
   0x6   :  { %1050 = vmatprep.subr.bf16.mxu0 %v1049_v6  ;;  %1054 = vmatprep.subr.bf16.mxu1 %v1049_v6  ;;  %v50_v16 = vld [vmem:[%s1612_s0 + $0x120] sm:$0xff]  ;;  %v51_v18 = vld [vmem:[%s1612_s0 + $0x128] sm:$0xff]  ;;  %v20_v19 = vld [vmem:[%s1612_s0 + $0x30] sm:$0xff] }
   0x7   :  { %997 = vmatprep.mubr.msk.f32.mxu1 %vm90_vm0, %v46_v7  ;;  %v52_v20 = vld [vmem:[%s1612_s0 + $0x130] sm:$0xff]  ;;  %v21_v21 = vld [vmem:[%s1612_s0 + $0x38] sm:$0xff]  ;;  %v22_v23 = vld [vmem:[%s1612_s0 + $0x40] sm:$0xff] }
   0x8   :  { %v53_v22 = vld [vmem:[%s1612_s0 + $0x138] sm:$0xff]  ;;  %v54_v24 = vld [vmem:[%s1612_s0 + $0x140] sm:$0xff]  ;;  %v23_v25 = vld [vmem:[%s1612_s0 + $0x48] sm:$0xff] }
   0x9   :  { %1052 = vmatpush3.bf16.msra.mxu0 %v1049_v6  ;;  %1057 = vmatpush3.bf16.msra.mxu1 %v1049_v6  ;;  %v55_v26 = vld [vmem:[%s1612_s0 + $0x148] sm:$0xff]  ;;  %v24_v27 = vld [vmem:[%s1612_s0 + $0x50] sm:$0xff]  ;;  %v25_v29 = vld [vmem:[%s1612_s0 + $0x58] sm:$0xff] }
   0xa   :  { %947 = vmatprep.subr.msk.mxu0 %vm283_vm1, %v82_v8  ;;  %1055 = vmatprep.subr.msk.mxu1 %vm283_vm1, %v82_v8  ;;  %v56_v28 = vld [vmem:[%s1612_s0 + $0x150] sm:$0xff]  ;;  %v57_v30 = vld [vmem:[%s1612_s0 + $0x158] sm:$0xff]  ;;  %v26_v31 = vld [vmem:[%s1612_s0 + $0x60] sm:$0xff] }
   0xb   :  { %v58_v32 = vld [vmem:[%s1612_s0 + $0x160] sm:$0xff]  ;;  %v27_v33 = vld [vmem:[%s1612_s0 + $0x68] sm:$0xff]  ;;  %v28_v35 = vld [vmem:[%s1612_s0 + $0x70] sm:$0xff] }
   0xc   :  { %v59_v34 = vld [vmem:[%s1612_s0 + $0x168] sm:$0xff]  ;;  %v60_v36 = vld [vmem:[%s1612_s0 + $0x170] sm:$0xff]  ;;  %v29_v37 = vld [vmem:[%s1612_s0 + $0x78] sm:$0xff] }
   0xd   :  { %948 = vmatpush3.msk.msra.mxu0 %vm283_vm1, %v82_v8  ;;  %1058 = vmatpush3.msk.msra.mxu1 %vm283_vm1, %v82_v8  ;;  %v61_v38 = vld [vmem:[%s1612_s0 + $0x178] sm:$0xff]  ;;  %v30_v39 = vld [vmem:[%s1612_s0 + $0x80] sm:$0xff]  ;;  %v31_v41 = vld [vmem:[%s1612_s0 + $0x88] sm:$0xff] }
   0xe   :  { %950 = vmatmul.mubr.msk.f32.vlgmr.msra.gmra.mrb[0].mxu0 %vm90_vm0, %v15_v9  ;;  %998 = vmatmul.mubr.msk.f32.vlgmr.msra.gmra.mrb[0].mxu1 %vm90_vm0, %v47_v10  ;;  %v62_v40 = vld [vmem:[%s1612_s0 + $0x180] sm:$0xff]  ;;  %v63_v42 = vld [vmem:[%s1612_s0 + $0x188] sm:$0xff]  ;;  %v32_v43 = vld [vmem:[%s1612_s0 + $0x90] sm:$0xff] }
   0xf   :  { %952 = vmatprep.mubr.msk.f32.mxu0 %vm90_vm0, %v16_v11  ;;  %1000 = vmatprep.mubr.msk.f32.mxu1 %vm90_vm0, %v48_v12  ;;  %v64_v44 = vld [vmem:[%s1612_s0 + $0x190] sm:$0xff]  ;;  %v33_v45 = vld [vmem:[%s1612_s0 + $0x98] sm:$0xff]  ;;  %v34_v47 = vld [vmem:[%s1612_s0 + $0xa0] sm:$0xff] }
  0x10   :  { %v65_v46 = vld [vmem:[%s1612_s0 + $0x198] sm:$0xff]  ;;  %v66_v48 = vld [vmem:[%s1612_s0 + $0x1a0] sm:$0xff]  ;;  %v35_v49 = vld [vmem:[%s1612_s0 + $0xa8] sm:$0xff] }
  0x11   :  { %v67_v50 = vld [vmem:[%s1612_s0 + $0x1a8] sm:$0xff]  ;;  %v36_v51 = vld [vmem:[%s1612_s0 + $0xb0] sm:$0xff]  ;;  %v37_v53 = vld [vmem:[%s1612_s0 + $0xb8] sm:$0xff] }
  0x12   :  { %953 = vmatmul.mubr.msk.f32.gmra.mrb[2].mxu0 %vm90_vm0, %v17_v13  ;;  %1001 = vmatmul.mubr.msk.f32.gmra.mrb[2].mxu1 %vm90_vm0, %v49_v14  ;;  %v68_v52 = vld [vmem:[%s1612_s0 + $0x1b0] sm:$0xff]  ;;  %v69_v54 = vld [vmem:[%s1612_s0 + $0x1b8] sm:$0xff]  ;;  %v38_v55 = vld [vmem:[%s1612_s0 + $0xc0] sm:$0xff] }
  0x13   :  { %955 = vmatprep.mubr.msk.f32.mxu0 %vm90_vm0, %v18_v15  ;;  %1003 = vmatprep.mubr.msk.f32.mxu1 %vm90_vm0, %v50_v16  ;;  %v70_v56 = vld [vmem:[%s1612_s0 + $0x1c0] sm:$0xff]  ;;  %v39_v57 = vld [vmem:[%s1612_s0 + $0xc8] sm:$0xff]  ;;  %v40_v59 = vld [vmem:[%s1612_s0 + $0xd0] sm:$0xff] }
  0x14   :  { %v71_v58 = vld [vmem:[%s1612_s0 + $0x1c8] sm:$0xff]  ;;  %v72_v60 = vld [vmem:[%s1612_s0 + $0x1d0] sm:$0xff]  ;;  %v41_v61 = vld [vmem:[%s1612_s0 + $0xd8] sm:$0xff] }
  0x15   :  { %v73_v62 = vld [vmem:[%s1612_s0 + $0x1d8] sm:$0xff]  ;;  %v42_v63 = vld [vmem:[%s1612_s0 + $0xe0] sm:$0xff]  ;;  %v43_v1 = vld [vmem:[%s1612_s0 + $0xe8] sm:$0xff] }
  0x16   :  { %956 = vmatmul.mubr.msk.f32.gmra.mrb[4].mxu0 %vm90_vm0, %v19_v17  ;;  %1004 = vmatmul.mubr.msk.f32.gmra.mrb[4].mxu1 %vm90_vm0, %v51_v18  ;;  %v74_v0 = vld [vmem:[%s1612_s0 + $0x1e0] sm:$0xff]  ;;  %v75_v2 = vld [vmem:[%s1612_s0 + $0x1e8] sm:$0xff]  ;;  %v44_v3 = vld [vmem:[%s1612_s0 + $0xf0] sm:$0xff] }
  0x17   :  { %958 = vmatprep.mubr.msk.f32.mxu0 %vm90_vm0, %v20_v19  ;;  %1006 = vmatprep.mubr.msk.f32.mxu1 %vm90_vm0, %v52_v20  ;;  %v76_v4 = vld [vmem:[%s1612_s0 + $0x1f0] sm:$0xff]  ;;  %v45_v5 = vld [vmem:[%s1612_s0 + $0xf8] sm:$0xff]  ;;  %v1353_v7 = vld [vmem:[%s1613_s2] ss:$0 sm:$0xff] }
  0x18   :  { %v77_v6 = vld [vmem:[%s1612_s0 + $0x1f8] sm:$0xff] }
  0x1a   :  { %959 = vmatmul.mubr.msk.f32.gmra.mrb[6].mxu0 %vm90_vm0, %v21_v21  ;;  %1007 = vmatmul.mubr.msk.f32.gmra.mrb[6].mxu1 %vm90_vm0, %v53_v22 }
  0x1b   :  { %961 = vmatprep.mubr.msk.f32.mxu0 %vm90_vm0, %v22_v23  ;;  %1009 = vmatprep.mubr.msk.f32.mxu1 %vm90_vm0, %v54_v24 }
  0x1e   :  { %962 = vmatmul.mubr.msk.f32.gmra.mrb[8].mxu0 %vm90_vm0, %v23_v25  ;;  %1010 = vmatmul.mubr.msk.f32.gmra.mrb[8].mxu1 %vm90_vm0, %v55_v26 }
  0x1f   :  { %964 = vmatprep.mubr.msk.f32.mxu0 %vm90_vm0, %v24_v27  ;;  %1012 = vmatprep.mubr.msk.f32.mxu1 %vm90_vm0, %v56_v28 }
  0x22   :  { %965 = vmatmul.mubr.msk.f32.gmra.mrb[10].mxu0 %vm90_vm0, %v25_v29  ;;  %1013 = vmatmul.mubr.msk.f32.gmra.mrb[10].mxu1 %vm90_vm0, %v57_v30 }
  0x23   :  { %967 = vmatprep.mubr.msk.f32.mxu0 %vm90_vm0, %v26_v31  ;;  %1015 = vmatprep.mubr.msk.f32.mxu1 %vm90_vm0, %v58_v32 }
  0x26   :  { %968 = vmatmul.mubr.msk.f32.gmra.mrb[12].mxu0 %vm90_vm0, %v27_v33  ;;  %1016 = vmatmul.mubr.msk.f32.gmra.mrb[12].mxu1 %vm90_vm0, %v59_v34 }
  0x27   :  { %970 = vmatprep.mubr.msk.f32.mxu0 %vm90_vm0, %v28_v35  ;;  %1018 = vmatprep.mubr.msk.f32.mxu1 %vm90_vm0, %v60_v36 }
  0x2a   :  { %971 = vmatmul.mubr.msk.f32.gmra.mrb[14].mxu0 %vm90_vm0, %v29_v37  ;;  %1019 = vmatmul.mubr.msk.f32.gmra.mrb[14].mxu1 %vm90_vm0, %v61_v38 }
  0x2b   :  { %973 = vmatprep.mubr.msk.f32.mxu0 %vm90_vm0, %v30_v39  ;;  %1021 = vmatprep.mubr.msk.f32.mxu1 %vm90_vm0, %v62_v40 }
  0x2e   :  { %974 = vmatmul.mubr.msk.f32.gmra.mrb[16].mxu0 %vm90_vm0, %v31_v41  ;;  %1022 = vmatmul.mubr.msk.f32.gmra.mrb[16].mxu1 %vm90_vm0, %v63_v42 }
  0x2f   :  { %976 = vmatprep.mubr.msk.f32.mxu0 %vm90_vm0, %v32_v43  ;;  %1024 = vmatprep.mubr.msk.f32.mxu1 %vm90_vm0, %v64_v44 }
  0x32   :  { %977 = vmatmul.mubr.msk.f32.gmra.mrb[18].mxu0 %vm90_vm0, %v33_v45  ;;  %1025 = vmatmul.mubr.msk.f32.gmra.mrb[18].mxu1 %vm90_vm0, %v65_v46 }
  0x33   :  { %979 = vmatprep.mubr.msk.f32.mxu0 %vm90_vm0, %v34_v47  ;;  %1027 = vmatprep.mubr.msk.f32.mxu1 %vm90_vm0, %v66_v48 }
  0x36   :  { %980 = vmatmul.mubr.msk.f32.gmra.mrb[20].mxu0 %vm90_vm0, %v35_v49  ;;  %1028 = vmatmul.mubr.msk.f32.gmra.mrb[20].mxu1 %vm90_vm0, %v67_v50 }
  0x37   :  { %982 = vmatprep.mubr.msk.f32.mxu0 %vm90_vm0, %v36_v51  ;;  %1030 = vmatprep.mubr.msk.f32.mxu1 %vm90_vm0, %v68_v52 }
  0x3a   :  { %983 = vmatmul.mubr.msk.f32.gmra.mrb[22].mxu0 %vm90_vm0, %v37_v53  ;;  %1031 = vmatmul.mubr.msk.f32.gmra.mrb[22].mxu1 %vm90_vm0, %v69_v54 }
  0x3b   :  { %985 = vmatprep.mubr.msk.f32.mxu0 %vm90_vm0, %v38_v55  ;;  %1033 = vmatprep.mubr.msk.f32.mxu1 %vm90_vm0, %v70_v56 }
  0x3e   :  { %986 = vmatmul.mubr.msk.f32.gmra.mrb[24].mxu0 %vm90_vm0, %v39_v57  ;;  %1034 = vmatmul.mubr.msk.f32.gmra.mrb[24].mxu1 %vm90_vm0, %v71_v58 }
  0x3f   :  { %988 = vmatprep.mubr.msk.f32.mxu0 %vm90_vm0, %v40_v59  ;;  %1036 = vmatprep.mubr.msk.f32.mxu1 %vm90_vm0, %v72_v60 }
  0x42   :  { %989 = vmatmul.mubr.msk.f32.gmra.mrb[26].mxu0 %vm90_vm0, %v41_v61  ;;  %1037 = vmatmul.mubr.msk.f32.gmra.mrb[26].mxu1 %vm90_vm0, %v73_v62 }
  0x43   :  { %991 = vmatprep.mubr.msk.f32.mxu0 %vm90_vm0, %v42_v63  ;;  %1039 = vmatprep.mubr.msk.f32.mxu1 %vm90_vm0, %v74_v0 }
  0x46   :  { %992 = vmatmul.mubr.msk.f32.gmra.mrb[28].mxu0 %vm90_vm0, %v43_v1  ;;  %1040 = vmatmul.mubr.msk.f32.gmra.mrb[28].mxu1 %vm90_vm0, %v75_v2 }
  0x47   :  { %994 = vmatprep.mubr.msk.f32.mxu0 %vm90_vm0, %v44_v3  ;;  %1042 = vmatprep.mubr.msk.f32.mxu1 %vm90_vm0, %v76_v4 }
  0x4a   :  { %995 = vmatmul.mubr.msk.f32.gmra.mrb[30].mxu0 %vm90_vm0, %v45_v5  ;;  %1043 = vmatmul.mubr.msk.f32.gmra.mrb[30].mxu1 %vm90_vm0, %v77_v6 }
  0xe1   :  { %v951_v8 = vpop.f32.mrb[0].mxu0  ;;  %v999_v9 = vpop.f32.mrb[0].mxu1 }
  0xe2   :  { %v359_v10 = vadd.f32 %v951_v8, %v1353_v7  ;;  %v519_v11 = vadd.f32 %v999_v9, %v1353_v7  ;;  %v353_v12 = vpop.f32.mrb[1].mxu0  ;;  %v513_v13 = vpop.f32.mrb[1].mxu1 }
  0xe3   :  { %v354_v14 = vadd.f32 %v1353_v7, %v353_v12  ;;  %v514_v15 = vadd.f32 %v1353_v7, %v513_v13 }
  0xe4   :  { %v673_v16 = vmax.f32 %v359_v10, 0.0  ;;  %v705_v17 = vmax.f32 %v519_v11, 0.0 }
  0xe5   :  { %v672_v18 = vmax.f32 %v354_v14, 0.0  ;;  %v704_v19 = vmax.f32 %v514_v15, 0.0  ;;  %v954_v20 = vpop.f32.mrb[2].mxu0  ;;  %v1002_v21 = vpop.f32.mrb[2].mxu1 }
  0xe6   :  { %737 = vst [vmem:[%s1614_s3 + $0x8] sm:$0xff] %v673_v16  ;;  %769 = vst [vmem:[%s1614_s3 + $0x108] sm:$0xff] %v705_v17  ;;  %v369_v22 = vadd.f32 %v954_v20, %v1353_v7  ;;  %v529_v23 = vadd.f32 %v1002_v21, %v1353_v7  ;;  %v363_v24 = vpop.f32.mrb[3].mxu0  ;;  %v523_v25 = vpop.f32.mrb[3].mxu1 }
  0xe7   :  { %736 = vst [vmem:[%s1614_s3] sm:$0xff] %v672_v18  ;;  %768 = vst [vmem:[%s1614_s3 + $0x100] sm:$0xff] %v704_v19  ;;  %v364_v26 = vadd.f32 %v1353_v7, %v363_v24  ;;  %v524_v27 = vadd.f32 %v1353_v7, %v523_v25 }
  0xe8   :  { %v675_v28 = vmax.f32 %v369_v22, 0.0  ;;  %v707_v29 = vmax.f32 %v529_v23, 0.0 }
  0xe9   :  { %v674_v30 = vmax.f32 %v364_v26, 0.0  ;;  %v706_v31 = vmax.f32 %v524_v27, 0.0  ;;  %v957_v32 = vpop.f32.mrb[4].mxu0  ;;  %v1005_v33 = vpop.f32.mrb[4].mxu1 }
  0xea   :  { %739 = vst [vmem:[%s1614_s3 + $0x18] sm:$0xff] %v675_v28  ;;  %771 = vst [vmem:[%s1614_s3 + $0x118] sm:$0xff] %v707_v29  ;;  %v379_v34 = vadd.f32 %v957_v32, %v1353_v7  ;;  %v539_v35 = vadd.f32 %v1005_v33, %v1353_v7  ;;  %v373_v36 = vpop.f32.mrb[5].mxu0  ;;  %v533_v37 = vpop.f32.mrb[5].mxu1 }
  0xeb   :  { %738 = vst [vmem:[%s1614_s3 + $0x10] sm:$0xff] %v674_v30  ;;  %770 = vst [vmem:[%s1614_s3 + $0x110] sm:$0xff] %v706_v31  ;;  %v374_v38 = vadd.f32 %v1353_v7, %v373_v36  ;;  %v534_v39 = vadd.f32 %v1353_v7, %v533_v37 }
  0xec   :  { %v677_v40 = vmax.f32 %v379_v34, 0.0  ;;  %v709_v41 = vmax.f32 %v539_v35, 0.0 }
  0xed   :  { %v676_v42 = vmax.f32 %v374_v38, 0.0  ;;  %v708_v43 = vmax.f32 %v534_v39, 0.0  ;;  %v960_v44 = vpop.f32.mrb[6].mxu0  ;;  %v1008_v45 = vpop.f32.mrb[6].mxu1 }
  0xee   :  { %741 = vst [vmem:[%s1614_s3 + $0x28] sm:$0xff] %v677_v40  ;;  %773 = vst [vmem:[%s1614_s3 + $0x128] sm:$0xff] %v709_v41  ;;  %v389_v46 = vadd.f32 %v960_v44, %v1353_v7  ;;  %v549_v47 = vadd.f32 %v1008_v45, %v1353_v7  ;;  %v383_v48 = vpop.f32.mrb[7].mxu0  ;;  %v543_v49 = vpop.f32.mrb[7].mxu1 }
  0xef   :  { %740 = vst [vmem:[%s1614_s3 + $0x20] sm:$0xff] %v676_v42  ;;  %772 = vst [vmem:[%s1614_s3 + $0x120] sm:$0xff] %v708_v43  ;;  %v384_v50 = vadd.f32 %v1353_v7, %v383_v48  ;;  %v544_v51 = vadd.f32 %v1353_v7, %v543_v49 }
  0xf0   :  { %v679_v52 = vmax.f32 %v389_v46, 0.0  ;;  %v711_v53 = vmax.f32 %v549_v47, 0.0 }
  0xf1   :  { %v678_v54 = vmax.f32 %v384_v50, 0.0  ;;  %v710_v55 = vmax.f32 %v544_v51, 0.0  ;;  %v963_v56 = vpop.f32.mrb[8].mxu0  ;;  %v1011_v57 = vpop.f32.mrb[8].mxu1 }
  0xf2   :  { %743 = vst [vmem:[%s1614_s3 + $0x38] sm:$0xff] %v679_v52  ;;  %775 = vst [vmem:[%s1614_s3 + $0x138] sm:$0xff] %v711_v53  ;;  %v399_v58 = vadd.f32 %v963_v56, %v1353_v7  ;;  %v559_v59 = vadd.f32 %v1011_v57, %v1353_v7  ;;  %v393_v60 = vpop.f32.mrb[9].mxu0  ;;  %v553_v61 = vpop.f32.mrb[9].mxu1 }
  0xf3   :  { %742 = vst [vmem:[%s1614_s3 + $0x30] sm:$0xff] %v678_v54  ;;  %774 = vst [vmem:[%s1614_s3 + $0x130] sm:$0xff] %v710_v55  ;;  %v394_v62 = vadd.f32 %v1353_v7, %v393_v60  ;;  %v554_v63 = vadd.f32 %v1353_v7, %v553_v61 }
  0xf4   :  { %v681_v0 = vmax.f32 %v399_v58, 0.0  ;;  %v713_v1 = vmax.f32 %v559_v59, 0.0 }
  0xf5   :  { %v680_v2 = vmax.f32 %v394_v62, 0.0  ;;  %v712_v3 = vmax.f32 %v554_v63, 0.0  ;;  %v966_v4 = vpop.f32.mrb[10].mxu0  ;;  %v1014_v5 = vpop.f32.mrb[10].mxu1 }
  0xf6   :  { %745 = vst [vmem:[%s1614_s3 + $0x48] sm:$0xff] %v681_v0  ;;  %777 = vst [vmem:[%s1614_s3 + $0x148] sm:$0xff] %v713_v1  ;;  %v409_v6 = vadd.f32 %v966_v4, %v1353_v7  ;;  %v569_v8 = vadd.f32 %v1014_v5, %v1353_v7  ;;  %v403_v9 = vpop.f32.mrb[11].mxu0  ;;  %v563_v10 = vpop.f32.mrb[11].mxu1 }
  0xf7   :  { %744 = vst [vmem:[%s1614_s3 + $0x40] sm:$0xff] %v680_v2  ;;  %776 = vst [vmem:[%s1614_s3 + $0x140] sm:$0xff] %v712_v3  ;;  %v404_v11 = vadd.f32 %v1353_v7, %v403_v9  ;;  %v564_v12 = vadd.f32 %v1353_v7, %v563_v10 }
  0xf8   :  { %v683_v13 = vmax.f32 %v409_v6, 0.0  ;;  %v715_v14 = vmax.f32 %v569_v8, 0.0 }
  0xf9   :  { %v682_v15 = vmax.f32 %v404_v11, 0.0  ;;  %v714_v16 = vmax.f32 %v564_v12, 0.0  ;;  %v969_v17 = vpop.f32.mrb[12].mxu0  ;;  %v1017_v18 = vpop.f32.mrb[12].mxu1 }
  0xfa   :  { %747 = vst [vmem:[%s1614_s3 + $0x58] sm:$0xff] %v683_v13  ;;  %779 = vst [vmem:[%s1614_s3 + $0x158] sm:$0xff] %v715_v14  ;;  %v419_v19 = vadd.f32 %v969_v17, %v1353_v7  ;;  %v579_v20 = vadd.f32 %v1017_v18, %v1353_v7  ;;  %v413_v21 = vpop.f32.mrb[13].mxu0  ;;  %v573_v22 = vpop.f32.mrb[13].mxu1 }
  0xfb   :  { %746 = vst [vmem:[%s1614_s3 + $0x50] sm:$0xff] %v682_v15  ;;  %778 = vst [vmem:[%s1614_s3 + $0x150] sm:$0xff] %v714_v16  ;;  %v414_v23 = vadd.f32 %v1353_v7, %v413_v21  ;;  %v574_v24 = vadd.f32 %v1353_v7, %v573_v22 }
  0xfc   :  { %v685_v25 = vmax.f32 %v419_v19, 0.0  ;;  %v717_v26 = vmax.f32 %v579_v20, 0.0 }
  0xfd   :  { %v684_v27 = vmax.f32 %v414_v23, 0.0  ;;  %v716_v28 = vmax.f32 %v574_v24, 0.0  ;;  %v972_v29 = vpop.f32.mrb[14].mxu0  ;;  %v1020_v30 = vpop.f32.mrb[14].mxu1 }
  0xfe   :  { %749 = vst [vmem:[%s1614_s3 + $0x68] sm:$0xff] %v685_v25  ;;  %781 = vst [vmem:[%s1614_s3 + $0x168] sm:$0xff] %v717_v26  ;;  %v429_v31 = vadd.f32 %v972_v29, %v1353_v7  ;;  %v589_v32 = vadd.f32 %v1020_v30, %v1353_v7  ;;  %v423_v33 = vpop.f32.mrb[15].mxu0  ;;  %v583_v34 = vpop.f32.mrb[15].mxu1 }
  0xff   :  { %748 = vst [vmem:[%s1614_s3 + $0x60] sm:$0xff] %v684_v27  ;;  %780 = vst [vmem:[%s1614_s3 + $0x160] sm:$0xff] %v716_v28  ;;  %v424_v35 = vadd.f32 %v1353_v7, %v423_v33  ;;  %v584_v36 = vadd.f32 %v1353_v7, %v583_v34 }
 0x100   :  { %v687_v37 = vmax.f32 %v429_v31, 0.0  ;;  %v719_v38 = vmax.f32 %v589_v32, 0.0 }
 0x101   :  { %v686_v39 = vmax.f32 %v424_v35, 0.0  ;;  %v718_v40 = vmax.f32 %v584_v36, 0.0  ;;  %v975_v41 = vpop.f32.mrb[16].mxu0  ;;  %v1023_v42 = vpop.f32.mrb[16].mxu1 }
 0x102   :  { %751 = vst [vmem:[%s1614_s3 + $0x78] sm:$0xff] %v687_v37  ;;  %783 = vst [vmem:[%s1614_s3 + $0x178] sm:$0xff] %v719_v38  ;;  %v439_v43 = vadd.f32 %v975_v41, %v1353_v7  ;;  %v599_v44 = vadd.f32 %v1023_v42, %v1353_v7  ;;  %v433_v45 = vpop.f32.mrb[17].mxu0  ;;  %v593_v46 = vpop.f32.mrb[17].mxu1 }
 0x103   :  { %750 = vst [vmem:[%s1614_s3 + $0x70] sm:$0xff] %v686_v39  ;;  %782 = vst [vmem:[%s1614_s3 + $0x170] sm:$0xff] %v718_v40  ;;  %v434_v47 = vadd.f32 %v1353_v7, %v433_v45  ;;  %v594_v48 = vadd.f32 %v1353_v7, %v593_v46 }
 0x104   :  { %v689_v49 = vmax.f32 %v439_v43, 0.0  ;;  %v721_v50 = vmax.f32 %v599_v44, 0.0 }
 0x105   :  { %v688_v51 = vmax.f32 %v434_v47, 0.0  ;;  %v720_v52 = vmax.f32 %v594_v48, 0.0  ;;  %v978_v53 = vpop.f32.mrb[18].mxu0  ;;  %v1026_v54 = vpop.f32.mrb[18].mxu1 }
 0x106   :  { %753 = vst [vmem:[%s1614_s3 + $0x88] sm:$0xff] %v689_v49  ;;  %785 = vst [vmem:[%s1614_s3 + $0x188] sm:$0xff] %v721_v50  ;;  %v449_v55 = vadd.f32 %v978_v53, %v1353_v7  ;;  %v609_v56 = vadd.f32 %v1026_v54, %v1353_v7  ;;  %v443_v57 = vpop.f32.mrb[19].mxu0  ;;  %v603_v58 = vpop.f32.mrb[19].mxu1 }
 0x107   :  { %752 = vst [vmem:[%s1614_s3 + $0x80] sm:$0xff] %v688_v51  ;;  %784 = vst [vmem:[%s1614_s3 + $0x180] sm:$0xff] %v720_v52  ;;  %v444_v59 = vadd.f32 %v1353_v7, %v443_v57  ;;  %v604_v60 = vadd.f32 %v1353_v7, %v603_v58 }
 0x108   :  { %v691_v61 = vmax.f32 %v449_v55, 0.0  ;;  %v723_v62 = vmax.f32 %v609_v56, 0.0 }
 0x109   :  { %v690_v63 = vmax.f32 %v444_v59, 0.0  ;;  %v722_v0 = vmax.f32 %v604_v60, 0.0  ;;  %v981_v1 = vpop.f32.mrb[20].mxu0  ;;  %v1029_v2 = vpop.f32.mrb[20].mxu1 }
 0x10a   :  { %755 = vst [vmem:[%s1614_s3 + $0x98] sm:$0xff] %v691_v61  ;;  %787 = vst [vmem:[%s1614_s3 + $0x198] sm:$0xff] %v723_v62  ;;  %v459_v3 = vadd.f32 %v981_v1, %v1353_v7  ;;  %v619_v4 = vadd.f32 %v1029_v2, %v1353_v7  ;;  %v453_v5 = vpop.f32.mrb[21].mxu0  ;;  %v613_v6 = vpop.f32.mrb[21].mxu1 }
 0x10b   :  { %754 = vst [vmem:[%s1614_s3 + $0x90] sm:$0xff] %v690_v63  ;;  %786 = vst [vmem:[%s1614_s3 + $0x190] sm:$0xff] %v722_v0  ;;  %v454_v8 = vadd.f32 %v1353_v7, %v453_v5  ;;  %v614_v9 = vadd.f32 %v1353_v7, %v613_v6 }
 0x10c   :  { %v693_v10 = vmax.f32 %v459_v3, 0.0  ;;  %v725_v11 = vmax.f32 %v619_v4, 0.0 }
 0x10d   :  { %v692_v12 = vmax.f32 %v454_v8, 0.0  ;;  %v724_v13 = vmax.f32 %v614_v9, 0.0  ;;  %v984_v14 = vpop.f32.mrb[22].mxu0  ;;  %v1032_v15 = vpop.f32.mrb[22].mxu1 }
 0x10e   :  { %757 = vst [vmem:[%s1614_s3 + $0xa8] sm:$0xff] %v693_v10  ;;  %789 = vst [vmem:[%s1614_s3 + $0x1a8] sm:$0xff] %v725_v11  ;;  %v469_v16 = vadd.f32 %v984_v14, %v1353_v7  ;;  %v629_v17 = vadd.f32 %v1032_v15, %v1353_v7  ;;  %v463_v18 = vpop.f32.mrb[23].mxu0  ;;  %v623_v19 = vpop.f32.mrb[23].mxu1 }
 0x10f   :  { %756 = vst [vmem:[%s1614_s3 + $0xa0] sm:$0xff] %v692_v12  ;;  %788 = vst [vmem:[%s1614_s3 + $0x1a0] sm:$0xff] %v724_v13  ;;  %v464_v20 = vadd.f32 %v1353_v7, %v463_v18  ;;  %v624_v21 = vadd.f32 %v1353_v7, %v623_v19 }
 0x110   :  { %v695_v22 = vmax.f32 %v469_v16, 0.0  ;;  %v727_v23 = vmax.f32 %v629_v17, 0.0 }
 0x111   :  { %v694_v24 = vmax.f32 %v464_v20, 0.0  ;;  %v726_v25 = vmax.f32 %v624_v21, 0.0  ;;  %v987_v26 = vpop.f32.mrb[24].mxu0  ;;  %v1035_v27 = vpop.f32.mrb[24].mxu1 }
 0x112   :  { %759 = vst [vmem:[%s1614_s3 + $0xb8] sm:$0xff] %v695_v22  ;;  %791 = vst [vmem:[%s1614_s3 + $0x1b8] sm:$0xff] %v727_v23  ;;  %v479_v28 = vadd.f32 %v987_v26, %v1353_v7  ;;  %v639_v29 = vadd.f32 %v1035_v27, %v1353_v7  ;;  %v473_v30 = vpop.f32.mrb[25].mxu0  ;;  %v633_v31 = vpop.f32.mrb[25].mxu1 }
 0x113   :  { %758 = vst [vmem:[%s1614_s3 + $0xb0] sm:$0xff] %v694_v24  ;;  %790 = vst [vmem:[%s1614_s3 + $0x1b0] sm:$0xff] %v726_v25  ;;  %v474_v32 = vadd.f32 %v1353_v7, %v473_v30  ;;  %v634_v33 = vadd.f32 %v1353_v7, %v633_v31 }
 0x114   :  { %v697_v34 = vmax.f32 %v479_v28, 0.0  ;;  %v729_v35 = vmax.f32 %v639_v29, 0.0 }
 0x115   :  { %v696_v36 = vmax.f32 %v474_v32, 0.0  ;;  %v728_v37 = vmax.f32 %v634_v33, 0.0  ;;  %v990_v38 = vpop.f32.mrb[26].mxu0  ;;  %v1038_v39 = vpop.f32.mrb[26].mxu1 }
 0x116   :  { %761 = vst [vmem:[%s1614_s3 + $0xc8] sm:$0xff] %v697_v34  ;;  %793 = vst [vmem:[%s1614_s3 + $0x1c8] sm:$0xff] %v729_v35  ;;  %v489_v40 = vadd.f32 %v990_v38, %v1353_v7  ;;  %v649_v41 = vadd.f32 %v1038_v39, %v1353_v7  ;;  %v483_v42 = vpop.f32.mrb[27].mxu0  ;;  %v643_v43 = vpop.f32.mrb[27].mxu1 }
 0x117   :  { %760 = vst [vmem:[%s1614_s3 + $0xc0] sm:$0xff] %v696_v36  ;;  %792 = vst [vmem:[%s1614_s3 + $0x1c0] sm:$0xff] %v728_v37  ;;  %v484_v44 = vadd.f32 %v1353_v7, %v483_v42  ;;  %v644_v45 = vadd.f32 %v1353_v7, %v643_v43 }
 0x118   :  { %v699_v46 = vmax.f32 %v489_v40, 0.0  ;;  %v731_v47 = vmax.f32 %v649_v41, 0.0 }
 0x119   :  { %v698_v48 = vmax.f32 %v484_v44, 0.0  ;;  %v730_v49 = vmax.f32 %v644_v45, 0.0  ;;  %v993_v50 = vpop.f32.mrb[28].mxu0  ;;  %v1041_v51 = vpop.f32.mrb[28].mxu1 }
 0x11a   :  { %763 = vst [vmem:[%s1614_s3 + $0xd8] sm:$0xff] %v699_v46  ;;  %795 = vst [vmem:[%s1614_s3 + $0x1d8] sm:$0xff] %v731_v47  ;;  %v499_v52 = vadd.f32 %v993_v50, %v1353_v7  ;;  %v659_v53 = vadd.f32 %v1041_v51, %v1353_v7  ;;  %v493_v54 = vpop.f32.mrb[29].mxu0  ;;  %v653_v55 = vpop.f32.mrb[29].mxu1 }
 0x11b   :  { %762 = vst [vmem:[%s1614_s3 + $0xd0] sm:$0xff] %v698_v48  ;;  %794 = vst [vmem:[%s1614_s3 + $0x1d0] sm:$0xff] %v730_v49  ;;  %v494_v56 = vadd.f32 %v1353_v7, %v493_v54  ;;  %v654_v57 = vadd.f32 %v1353_v7, %v653_v55 }
 0x11c   :  { %v701_v58 = vmax.f32 %v499_v52, 0.0  ;;  %v733_v59 = vmax.f32 %v659_v53, 0.0 }
 0x11d   :  { %v700_v60 = vmax.f32 %v494_v56, 0.0  ;;  %v732_v61 = vmax.f32 %v654_v57, 0.0  ;;  %v996_v62 = vpop.f32.mrb[30].mxu0  ;;  %v1044_v63 = vpop.f32.mrb[30].mxu1 }
 0x11e   :  { %765 = vst [vmem:[%s1614_s3 + $0xe8] sm:$0xff] %v701_v58  ;;  %797 = vst [vmem:[%s1614_s3 + $0x1e8] sm:$0xff] %v733_v59  ;;  %v509_v0 = vadd.f32 %v996_v62, %v1353_v7  ;;  %v669_v1 = vadd.f32 %v1044_v63, %v1353_v7  ;;  %v503_v2 = vpop.f32.mrb[31].mxu0  ;;  %v663_v3 = vpop.f32.mrb[31].mxu1 }
 0x11f   :  { %764 = vst [vmem:[%s1614_s3 + $0xe0] sm:$0xff] %v700_v60  ;;  %796 = vst [vmem:[%s1614_s3 + $0x1e0] sm:$0xff] %v732_v61  ;;  %v504_v4 = vadd.f32 %v1353_v7, %v503_v2  ;;  %v664_v5 = vadd.f32 %v1353_v7, %v663_v3 }
 0x120   :  { %v703_v6 = vmax.f32 %v509_v0, 0.0  ;;  %v735_v8 = vmax.f32 %v669_v1, 0.0 }
 0x121   :  { %v702_v9 = vmax.f32 %v504_v4, 0.0  ;;  %v734_v10 = vmax.f32 %v664_v5, 0.0 }
 0x122   :  { %767 = vst [vmem:[%s1614_s3 + $0xf8] sm:$0xff] %v703_v6  ;;  %799 = vst [vmem:[%s1614_s3 + $0x1f8] sm:$0xff] %v735_v8 }
 0x123   :  { %766 = vst [vmem:[%s1614_s3 + $0xf0] sm:$0xff] %v702_v9  ;;  %798 = vst [vmem:[%s1614_s3 + $0x1f0] sm:$0xff] %v734_v10 }

// kernel: ssd_forward.22
= control target key start
LH: loop header
LB: loop body
LE: loop exit
PB: predicated region body
PF: predicated region fallthrough
CT: control target
= control target key end

     0   :  { %vm94_vm0 = vcmask 588800   ;;  %s1646_s1 = inlined_call_operand.vmem [shape: f32[72,128], index: 1, kind: input, shape index: {}]   ;;  %s1647_s0 = inlined_call_operand.vmem [shape: f32[512,72], index: 0, kind: input, shape index: {}]   ;;  %s1648_s2 = inlined_call_operand.vmem [shape: f32[1,128], index: 2, kind: input, shape index: {}]   ;;  %s1649_s3 = inlined_call_operand.vmem [shape: f32[512,128], index: 3, kind: output, shape index: {}]  }
   0x1   :  { %v78_v0 = vld [vmem:[%s1646_s1] sm:$0xff]  ;;  %v79_v1 = vld [vmem:[%s1646_s1 + $0x8] sm:$0xff]  ;;  %v80_v2 = vld [vmem:[%s1646_s1 + $0x10] sm:$0xff] }
   0x2   :  { %v1056_v3 = vpack.c.bf16 %v79_v1, %v78_v0  ;;  %v81_v4 = vld [vmem:[%s1646_s1 + $0x18] sm:$0xff]  ;;  %v82_v6 = vld [vmem:[%s1646_s1 + $0x20] sm:$0xff]  ;;  %v83_v7 = vld [vmem:[%s1646_s1 + $0x28] sm:$0xff] }
   0x3   :  { %v1060_v5 = vpack.c.bf16 %v81_v4, %v80_v2  ;;  %v14_v8 = vld [vmem:[%s1647_s0] sm:$0xff]  ;;  %v1064_v10 = vpack.c.bf16 %v83_v7, %v82_v6  ;;  %v84_v11 = vld [vmem:[%s1646_s1 + $0x30] sm:$0xff]  ;;  %v85_v12 = vld [vmem:[%s1646_s1 + $0x38] sm:$0xff] }
   0x4   :  { %1057 = vmatprep.subr.bf16.mxu0 %v1056_v3  ;;  %1072 = vmatprep.subr.bf16.mxu1 %v1056_v3  ;;  %v46_v9 = vld [vmem:[%s1647_s0 + $0x100] sm:$0xff]  ;;  %v1068_v13 = vpack.c.bf16 %v85_v12, %v84_v11  ;;  %v15_v15 = vld [vmem:[%s1647_s0 + $0x8] sm:$0xff]  ;;  %v16_v17 = vld [vmem:[%s1647_s0 + $0x10] sm:$0xff] }
   0x5   :  { %1059 = vmatpush3.bf16.msra.mxu0 %v1056_v3  ;;  %1077 = vmatpush3.bf16.msra.mxu1 %v1056_v3  ;;  %v86_v14 = vld [vmem:[%s1646_s1 + $0x40] sm:$0xff]  ;;  %v47_v16 = vld [vmem:[%s1647_s0 + $0x108] sm:$0xff]  ;;  %v48_v18 = vld [vmem:[%s1647_s0 + $0x110] sm:$0xff] }
   0x6   :  { %1061 = vmatprep.subr.bf16.mxu0 %v1060_v5  ;;  %1073 = vmatprep.subr.bf16.mxu1 %v1060_v5  ;;  %v17_v19 = vld [vmem:[%s1647_s0 + $0x18] sm:$0xff]  ;;  %v18_v21 = vld [vmem:[%s1647_s0 + $0x20] sm:$0xff]  ;;  %v19_v23 = vld [vmem:[%s1647_s0 + $0x28] sm:$0xff] }
   0x7   :  { %960 = vmatprep.mubr.msk.f32.mxu0 %vm94_vm0, %v14_v8  ;;  %1008 = vmatprep.mubr.msk.f32.mxu1 %vm94_vm0, %v46_v9  ;;  %v49_v20 = vld [vmem:[%s1647_s0 + $0x118] sm:$0xff]  ;;  %v50_v22 = vld [vmem:[%s1647_s0 + $0x120] sm:$0xff]  ;;  %v51_v24 = vld [vmem:[%s1647_s0 + $0x128] sm:$0xff] }
   0x8   :  { %v20_v25 = vld [vmem:[%s1647_s0 + $0x30] sm:$0xff]  ;;  %v21_v27 = vld [vmem:[%s1647_s0 + $0x38] sm:$0xff]  ;;  %v22_v29 = vld [vmem:[%s1647_s0 + $0x40] sm:$0xff] }
   0x9   :  { %1063 = vmatpush3.bf16.msra.mxu0 %v1060_v5  ;;  %1078 = vmatpush3.bf16.msra.mxu1 %v1060_v5  ;;  %v52_v26 = vld [vmem:[%s1647_s0 + $0x130] sm:$0xff]  ;;  %v53_v28 = vld [vmem:[%s1647_s0 + $0x138] sm:$0xff]  ;;  %v54_v30 = vld [vmem:[%s1647_s0 + $0x140] sm:$0xff] }
   0xa   :  { %1065 = vmatprep.subr.bf16.mxu0 %v1064_v10  ;;  %1074 = vmatprep.subr.bf16.mxu1 %v1064_v10  ;;  %v23_v31 = vld [vmem:[%s1647_s0 + $0x48] sm:$0xff]  ;;  %v24_v33 = vld [vmem:[%s1647_s0 + $0x50] sm:$0xff]  ;;  %v25_v35 = vld [vmem:[%s1647_s0 + $0x58] sm:$0xff] }
   0xb   :  { %v55_v32 = vld [vmem:[%s1647_s0 + $0x148] sm:$0xff]  ;;  %v56_v34 = vld [vmem:[%s1647_s0 + $0x150] sm:$0xff]  ;;  %v57_v36 = vld [vmem:[%s1647_s0 + $0x158] sm:$0xff] }
   0xc   :  { %v26_v37 = vld [vmem:[%s1647_s0 + $0x60] sm:$0xff]  ;;  %v27_v39 = vld [vmem:[%s1647_s0 + $0x68] sm:$0xff]  ;;  %v28_v41 = vld [vmem:[%s1647_s0 + $0x70] sm:$0xff] }
   0xd   :  { %1067 = vmatpush3.bf16.msra.mxu0 %v1064_v10  ;;  %1079 = vmatpush3.bf16.msra.mxu1 %v1064_v10  ;;  %v58_v38 = vld [vmem:[%s1647_s0 + $0x160] sm:$0xff]  ;;  %v59_v40 = vld [vmem:[%s1647_s0 + $0x168] sm:$0xff]  ;;  %v60_v42 = vld [vmem:[%s1647_s0 + $0x170] sm:$0xff] }
   0xe   :  { %1069 = vmatprep.subr.bf16.mxu0 %v1068_v13  ;;  %1075 = vmatprep.subr.bf16.mxu1 %v1068_v13  ;;  %v29_v43 = vld [vmem:[%s1647_s0 + $0x78] sm:$0xff]  ;;  %v30_v45 = vld [vmem:[%s1647_s0 + $0x80] sm:$0xff]  ;;  %v31_v47 = vld [vmem:[%s1647_s0 + $0x88] sm:$0xff] }
   0xf   :  { %v61_v44 = vld [vmem:[%s1647_s0 + $0x178] sm:$0xff]  ;;  %v62_v46 = vld [vmem:[%s1647_s0 + $0x180] sm:$0xff]  ;;  %v63_v48 = vld [vmem:[%s1647_s0 + $0x188] sm:$0xff] }
  0x10   :  { %v32_v49 = vld [vmem:[%s1647_s0 + $0x90] sm:$0xff]  ;;  %v33_v51 = vld [vmem:[%s1647_s0 + $0x98] sm:$0xff]  ;;  %v34_v53 = vld [vmem:[%s1647_s0 + $0xa0] sm:$0xff] }
  0x11   :  { %1071 = vmatpush3.bf16.msra.mxu0 %v1068_v13  ;;  %1080 = vmatpush3.bf16.msra.mxu1 %v1068_v13  ;;  %v64_v50 = vld [vmem:[%s1647_s0 + $0x190] sm:$0xff]  ;;  %v65_v52 = vld [vmem:[%s1647_s0 + $0x198] sm:$0xff]  ;;  %v66_v54 = vld [vmem:[%s1647_s0 + $0x1a0] sm:$0xff] }
  0x12   :  { %958 = vmatprep.subr.mxu0 %v86_v14  ;;  %1076 = vmatprep.subr.mxu1 %v86_v14  ;;  %v35_v55 = vld [vmem:[%s1647_s0 + $0xa8] sm:$0xff]  ;;  %v36_v57 = vld [vmem:[%s1647_s0 + $0xb0] sm:$0xff]  ;;  %v37_v59 = vld [vmem:[%s1647_s0 + $0xb8] sm:$0xff] }
  0x13   :  { %v67_v56 = vld [vmem:[%s1647_s0 + $0x1a8] sm:$0xff]  ;;  %v68_v58 = vld [vmem:[%s1647_s0 + $0x1b0] sm:$0xff]  ;;  %v69_v60 = vld [vmem:[%s1647_s0 + $0x1b8] sm:$0xff] }
  0x14   :  { %v38_v61 = vld [vmem:[%s1647_s0 + $0xc0] sm:$0xff]  ;;  %v39_v63 = vld [vmem:[%s1647_s0 + $0xc8] sm:$0xff]  ;;  %v40_v1 = vld [vmem:[%s1647_s0 + $0xd0] sm:$0xff] }
  0x15   :  { %959 = vmatpush3.msra.mxu0 %v86_v14  ;;  %1081 = vmatpush3.msra.mxu1 %v86_v14  ;;  %v70_v62 = vld [vmem:[%s1647_s0 + $0x1c0] sm:$0xff]  ;;  %v71_v0 = vld [vmem:[%s1647_s0 + $0x1c8] sm:$0xff]  ;;  %v72_v2 = vld [vmem:[%s1647_s0 + $0x1d0] sm:$0xff] }
  0x16   :  { %961 = vmatmul.mubr.msk.f32.vlgmr.msra.gmra.mrb[0].mxu0 %vm94_vm0, %v15_v15  ;;  %1009 = vmatmul.mubr.msk.f32.vlgmr.msra.gmra.mrb[0].mxu1 %vm94_vm0, %v47_v16  ;;  %v41_v3 = vld [vmem:[%s1647_s0 + $0xd8] sm:$0xff]  ;;  %v42_v5 = vld [vmem:[%s1647_s0 + $0xe0] sm:$0xff]  ;;  %v43_v7 = vld [vmem:[%s1647_s0 + $0xe8] sm:$0xff] }
  0x17   :  { %963 = vmatprep.mubr.msk.f32.mxu0 %vm94_vm0, %v16_v17  ;;  %1011 = vmatprep.mubr.msk.f32.mxu1 %vm94_vm0, %v48_v18  ;;  %v73_v4 = vld [vmem:[%s1647_s0 + $0x1d8] sm:$0xff]  ;;  %v74_v6 = vld [vmem:[%s1647_s0 + $0x1e0] sm:$0xff]  ;;  %v75_v8 = vld [vmem:[%s1647_s0 + $0x1e8] sm:$0xff] }
  0x18   :  { %v44_v9 = vld [vmem:[%s1647_s0 + $0xf0] sm:$0xff]  ;;  %v45_v11 = vld [vmem:[%s1647_s0 + $0xf8] sm:$0xff]  ;;  %v1388_v13 = vld [vmem:[%s1648_s2] ss:$0 sm:$0xff] }
  0x19   :  { %v76_v10 = vld [vmem:[%s1647_s0 + $0x1f0] sm:$0xff]  ;;  %v77_v12 = vld [vmem:[%s1647_s0 + $0x1f8] sm:$0xff] }
  0x1a   :  { %964 = vmatmul.mubr.msk.f32.gmra.mrb[2].mxu0 %vm94_vm0, %v17_v19  ;;  %1012 = vmatmul.mubr.msk.f32.gmra.mrb[2].mxu1 %vm94_vm0, %v49_v20 }
  0x1b   :  { %966 = vmatprep.mubr.msk.f32.mxu0 %vm94_vm0, %v18_v21  ;;  %1014 = vmatprep.mubr.msk.f32.mxu1 %vm94_vm0, %v50_v22 }
  0x1e   :  { %967 = vmatmul.mubr.msk.f32.gmra.mrb[4].mxu0 %vm94_vm0, %v19_v23  ;;  %1015 = vmatmul.mubr.msk.f32.gmra.mrb[4].mxu1 %vm94_vm0, %v51_v24 }
  0x1f   :  { %969 = vmatprep.mubr.msk.f32.mxu0 %vm94_vm0, %v20_v25  ;;  %1017 = vmatprep.mubr.msk.f32.mxu1 %vm94_vm0, %v52_v26 }
  0x22   :  { %970 = vmatmul.mubr.msk.f32.gmra.mrb[6].mxu0 %vm94_vm0, %v21_v27  ;;  %1018 = vmatmul.mubr.msk.f32.gmra.mrb[6].mxu1 %vm94_vm0, %v53_v28 }
  0x23   :  { %972 = vmatprep.mubr.msk.f32.mxu0 %vm94_vm0, %v22_v29  ;;  %1020 = vmatprep.mubr.msk.f32.mxu1 %vm94_vm0, %v54_v30 }
  0x26   :  { %973 = vmatmul.mubr.msk.f32.gmra.mrb[8].mxu0 %vm94_vm0, %v23_v31  ;;  %1021 = vmatmul.mubr.msk.f32.gmra.mrb[8].mxu1 %vm94_vm0, %v55_v32 }
  0x27   :  { %975 = vmatprep.mubr.msk.f32.mxu0 %vm94_vm0, %v24_v33  ;;  %1023 = vmatprep.mubr.msk.f32.mxu1 %vm94_vm0, %v56_v34 }
  0x2a   :  { %976 = vmatmul.mubr.msk.f32.gmra.mrb[10].mxu0 %vm94_vm0, %v25_v35  ;;  %1024 = vmatmul.mubr.msk.f32.gmra.mrb[10].mxu1 %vm94_vm0, %v57_v36 }
  0x2b   :  { %978 = vmatprep.mubr.msk.f32.mxu0 %vm94_vm0, %v26_v37  ;;  %1026 = vmatprep.mubr.msk.f32.mxu1 %vm94_vm0, %v58_v38 }
  0x2e   :  { %979 = vmatmul.mubr.msk.f32.gmra.mrb[12].mxu0 %vm94_vm0, %v27_v39  ;;  %1027 = vmatmul.mubr.msk.f32.gmra.mrb[12].mxu1 %vm94_vm0, %v59_v40 }
  0x2f   :  { %981 = vmatprep.mubr.msk.f32.mxu0 %vm94_vm0, %v28_v41  ;;  %1029 = vmatprep.mubr.msk.f32.mxu1 %vm94_vm0, %v60_v42 }
  0x32   :  { %982 = vmatmul.mubr.msk.f32.gmra.mrb[14].mxu0 %vm94_vm0, %v29_v43  ;;  %1030 = vmatmul.mubr.msk.f32.gmra.mrb[14].mxu1 %vm94_vm0, %v61_v44 }
  0x33   :  { %984 = vmatprep.mubr.msk.f32.mxu0 %vm94_vm0, %v30_v45  ;;  %1032 = vmatprep.mubr.msk.f32.mxu1 %vm94_vm0, %v62_v46 }
  0x36   :  { %985 = vmatmul.mubr.msk.f32.gmra.mrb[16].mxu0 %vm94_vm0, %v31_v47  ;;  %1033 = vmatmul.mubr.msk.f32.gmra.mrb[16].mxu1 %vm94_vm0, %v63_v48 }
  0x37   :  { %987 = vmatprep.mubr.msk.f32.mxu0 %vm94_vm0, %v32_v49  ;;  %1035 = vmatprep.mubr.msk.f32.mxu1 %vm94_vm0, %v64_v50 }
  0x3a   :  { %988 = vmatmul.mubr.msk.f32.gmra.mrb[18].mxu0 %vm94_vm0, %v33_v51  ;;  %1036 = vmatmul.mubr.msk.f32.gmra.mrb[18].mxu1 %vm94_vm0, %v65_v52 }
  0x3b   :  { %990 = vmatprep.mubr.msk.f32.mxu0 %vm94_vm0, %v34_v53  ;;  %1038 = vmatprep.mubr.msk.f32.mxu1 %vm94_vm0, %v66_v54 }
  0x3e   :  { %991 = vmatmul.mubr.msk.f32.gmra.mrb[20].mxu0 %vm94_vm0, %v35_v55  ;;  %1039 = vmatmul.mubr.msk.f32.gmra.mrb[20].mxu1 %vm94_vm0, %v67_v56 }
  0x3f   :  { %993 = vmatprep.mubr.msk.f32.mxu0 %vm94_vm0, %v36_v57  ;;  %1041 = vmatprep.mubr.msk.f32.mxu1 %vm94_vm0, %v68_v58 }
  0x42   :  { %994 = vmatmul.mubr.msk.f32.gmra.mrb[22].mxu0 %vm94_vm0, %v37_v59  ;;  %1042 = vmatmul.mubr.msk.f32.gmra.mrb[22].mxu1 %vm94_vm0, %v69_v60 }
  0x43   :  { %996 = vmatprep.mubr.msk.f32.mxu0 %vm94_vm0, %v38_v61  ;;  %1044 = vmatprep.mubr.msk.f32.mxu1 %vm94_vm0, %v70_v62 }
  0x46   :  { %997 = vmatmul.mubr.msk.f32.gmra.mrb[24].mxu0 %vm94_vm0, %v39_v63  ;;  %1045 = vmatmul.mubr.msk.f32.gmra.mrb[24].mxu1 %vm94_vm0, %v71_v0 }
  0x47   :  { %999 = vmatprep.mubr.msk.f32.mxu0 %vm94_vm0, %v40_v1  ;;  %1047 = vmatprep.mubr.msk.f32.mxu1 %vm94_vm0, %v72_v2 }
  0x4a   :  { %1000 = vmatmul.mubr.msk.f32.gmra.mrb[26].mxu0 %vm94_vm0, %v41_v3  ;;  %1048 = vmatmul.mubr.msk.f32.gmra.mrb[26].mxu1 %vm94_vm0, %v73_v4 }
  0x4b   :  { %1002 = vmatprep.mubr.msk.f32.mxu0 %vm94_vm0, %v42_v5  ;;  %1050 = vmatprep.mubr.msk.f32.mxu1 %vm94_vm0, %v74_v6 }
  0x4e   :  { %1003 = vmatmul.mubr.msk.f32.gmra.mrb[28].mxu0 %vm94_vm0, %v43_v7  ;;  %1051 = vmatmul.mubr.msk.f32.gmra.mrb[28].mxu1 %vm94_vm0, %v75_v8 }
  0x4f   :  { %1005 = vmatprep.mubr.msk.f32.mxu0 %vm94_vm0, %v44_v9  ;;  %1053 = vmatprep.mubr.msk.f32.mxu1 %vm94_vm0, %v76_v10 }
  0x52   :  { %1006 = vmatmul.mubr.msk.f32.gmra.mrb[30].mxu0 %vm94_vm0, %v45_v11  ;;  %1054 = vmatmul.mubr.msk.f32.gmra.mrb[30].mxu1 %vm94_vm0, %v77_v12 }
  0xe9   :  { %v962_v14 = vpop.f32.mrb[0].mxu0  ;;  %v1010_v15 = vpop.f32.mrb[0].mxu1 }
  0xea   :  { %v359_v16 = vadd.f32 %v962_v14, %v1388_v13  ;;  %v519_v17 = vadd.f32 %v1010_v15, %v1388_v13  ;;  %v353_v18 = vpop.f32.mrb[1].mxu0  ;;  %v513_v19 = vpop.f32.mrb[1].mxu1 }
  0xeb   :  { %v354_v20 = vadd.f32 %v1388_v13, %v353_v18  ;;  %v514_v21 = vadd.f32 %v1388_v13, %v513_v19 }
  0xec   :  { %v673_v22 = vmax.f32 %v359_v16, 0.0  ;;  %v705_v23 = vmax.f32 %v519_v17, 0.0 }
  0xed   :  { %v672_v24 = vmax.f32 %v354_v20, 0.0  ;;  %v704_v25 = vmax.f32 %v514_v21, 0.0  ;;  %v965_v26 = vpop.f32.mrb[2].mxu0  ;;  %v1013_v27 = vpop.f32.mrb[2].mxu1 }
  0xee   :  { %737 = vst [vmem:[%s1649_s3 + $0x8] sm:$0xff] %v673_v22  ;;  %769 = vst [vmem:[%s1649_s3 + $0x108] sm:$0xff] %v705_v23  ;;  %v369_v28 = vadd.f32 %v965_v26, %v1388_v13  ;;  %v529_v29 = vadd.f32 %v1013_v27, %v1388_v13  ;;  %v363_v30 = vpop.f32.mrb[3].mxu0  ;;  %v523_v31 = vpop.f32.mrb[3].mxu1 }
  0xef   :  { %736 = vst [vmem:[%s1649_s3] sm:$0xff] %v672_v24  ;;  %768 = vst [vmem:[%s1649_s3 + $0x100] sm:$0xff] %v704_v25  ;;  %v364_v32 = vadd.f32 %v1388_v13, %v363_v30  ;;  %v524_v33 = vadd.f32 %v1388_v13, %v523_v31 }
  0xf0   :  { %v675_v34 = vmax.f32 %v369_v28, 0.0  ;;  %v707_v35 = vmax.f32 %v529_v29, 0.0 }
  0xf1   :  { %v674_v36 = vmax.f32 %v364_v32, 0.0  ;;  %v706_v37 = vmax.f32 %v524_v33, 0.0  ;;  %v968_v38 = vpop.f32.mrb[4].mxu0  ;;  %v1016_v39 = vpop.f32.mrb[4].mxu1 }
  0xf2   :  { %739 = vst [vmem:[%s1649_s3 + $0x18] sm:$0xff] %v675_v34  ;;  %771 = vst [vmem:[%s1649_s3 + $0x118] sm:$0xff] %v707_v35  ;;  %v379_v40 = vadd.f32 %v968_v38, %v1388_v13  ;;  %v539_v41 = vadd.f32 %v1016_v39, %v1388_v13  ;;  %v373_v42 = vpop.f32.mrb[5].mxu0  ;;  %v533_v43 = vpop.f32.mrb[5].mxu1 }
  0xf3   :  { %738 = vst [vmem:[%s1649_s3 + $0x10] sm:$0xff] %v674_v36  ;;  %770 = vst [vmem:[%s1649_s3 + $0x110] sm:$0xff] %v706_v37  ;;  %v374_v44 = vadd.f32 %v1388_v13, %v373_v42  ;;  %v534_v45 = vadd.f32 %v1388_v13, %v533_v43 }
  0xf4   :  { %v677_v46 = vmax.f32 %v379_v40, 0.0  ;;  %v709_v47 = vmax.f32 %v539_v41, 0.0 }
  0xf5   :  { %v676_v48 = vmax.f32 %v374_v44, 0.0  ;;  %v708_v49 = vmax.f32 %v534_v45, 0.0  ;;  %v971_v50 = vpop.f32.mrb[6].mxu0  ;;  %v1019_v51 = vpop.f32.mrb[6].mxu1 }
  0xf6   :  { %741 = vst [vmem:[%s1649_s3 + $0x28] sm:$0xff] %v677_v46  ;;  %773 = vst [vmem:[%s1649_s3 + $0x128] sm:$0xff] %v709_v47  ;;  %v389_v52 = vadd.f32 %v971_v50, %v1388_v13  ;;  %v549_v53 = vadd.f32 %v1019_v51, %v1388_v13  ;;  %v383_v54 = vpop.f32.mrb[7].mxu0  ;;  %v543_v55 = vpop.f32.mrb[7].mxu1 }
  0xf7   :  { %740 = vst [vmem:[%s1649_s3 + $0x20] sm:$0xff] %v676_v48  ;;  %772 = vst [vmem:[%s1649_s3 + $0x120] sm:$0xff] %v708_v49  ;;  %v384_v56 = vadd.f32 %v1388_v13, %v383_v54  ;;  %v544_v57 = vadd.f32 %v1388_v13, %v543_v55 }
  0xf8   :  { %v679_v58 = vmax.f32 %v389_v52, 0.0  ;;  %v711_v59 = vmax.f32 %v549_v53, 0.0 }
  0xf9   :  { %v678_v60 = vmax.f32 %v384_v56, 0.0  ;;  %v710_v61 = vmax.f32 %v544_v57, 0.0  ;;  %v974_v62 = vpop.f32.mrb[8].mxu0  ;;  %v1022_v63 = vpop.f32.mrb[8].mxu1 }
  0xfa   :  { %743 = vst [vmem:[%s1649_s3 + $0x38] sm:$0xff] %v679_v58  ;;  %775 = vst [vmem:[%s1649_s3 + $0x138] sm:$0xff] %v711_v59  ;;  %v399_v0 = vadd.f32 %v974_v62, %v1388_v13  ;;  %v559_v1 = vadd.f32 %v1022_v63, %v1388_v13  ;;  %v393_v2 = vpop.f32.mrb[9].mxu0  ;;  %v553_v3 = vpop.f32.mrb[9].mxu1 }
  0xfb   :  { %742 = vst [vmem:[%s1649_s3 + $0x30] sm:$0xff] %v678_v60  ;;  %774 = vst [vmem:[%s1649_s3 + $0x130] sm:$0xff] %v710_v61  ;;  %v394_v4 = vadd.f32 %v1388_v13, %v393_v2  ;;  %v554_v5 = vadd.f32 %v1388_v13, %v553_v3 }
  0xfc   :  { %v681_v6 = vmax.f32 %v399_v0, 0.0  ;;  %v713_v7 = vmax.f32 %v559_v1, 0.0 }
  0xfd   :  { %v680_v8 = vmax.f32 %v394_v4, 0.0  ;;  %v712_v9 = vmax.f32 %v554_v5, 0.0  ;;  %v977_v10 = vpop.f32.mrb[10].mxu0  ;;  %v1025_v11 = vpop.f32.mrb[10].mxu1 }
  0xfe   :  { %745 = vst [vmem:[%s1649_s3 + $0x48] sm:$0xff] %v681_v6  ;;  %777 = vst [vmem:[%s1649_s3 + $0x148] sm:$0xff] %v713_v7  ;;  %v409_v12 = vadd.f32 %v977_v10, %v1388_v13  ;;  %v569_v14 = vadd.f32 %v1025_v11, %v1388_v13  ;;  %v403_v15 = vpop.f32.mrb[11].mxu0  ;;  %v563_v16 = vpop.f32.mrb[11].mxu1 }
  0xff   :  { %744 = vst [vmem:[%s1649_s3 + $0x40] sm:$0xff] %v680_v8  ;;  %776 = vst [vmem:[%s1649_s3 + $0x140] sm:$0xff] %v712_v9  ;;  %v404_v17 = vadd.f32 %v1388_v13, %v403_v15  ;;  %v564_v18 = vadd.f32 %v1388_v13, %v563_v16 }
 0x100   :  { %v683_v19 = vmax.f32 %v409_v12, 0.0  ;;  %v715_v20 = vmax.f32 %v569_v14, 0.0 }
 0x101   :  { %v682_v21 = vmax.f32 %v404_v17, 0.0  ;;  %v714_v22 = vmax.f32 %v564_v18, 0.0  ;;  %v980_v23 = vpop.f32.mrb[12].mxu0  ;;  %v1028_v24 = vpop.f32.mrb[12].mxu1 }
 0x102   :  { %747 = vst [vmem:[%s1649_s3 + $0x58] sm:$0xff] %v683_v19  ;;  %779 = vst [vmem:[%s1649_s3 + $0x158] sm:$0xff] %v715_v20  ;;  %v419_v25 = vadd.f32 %v980_v23, %v1388_v13  ;;  %v579_v26 = vadd.f32 %v1028_v24, %v1388_v13  ;;  %v413_v27 = vpop.f32.mrb[13].mxu0  ;;  %v573_v28 = vpop.f32.mrb[13].mxu1 }
 0x103   :  { %746 = vst [vmem:[%s1649_s3 + $0x50] sm:$0xff] %v682_v21  ;;  %778 = vst [vmem:[%s1649_s3 + $0x150] sm:$0xff] %v714_v22  ;;  %v414_v29 = vadd.f32 %v1388_v13, %v413_v27  ;;  %v574_v30 = vadd.f32 %v1388_v13, %v573_v28 }
 0x104   :  { %v685_v31 = vmax.f32 %v419_v25, 0.0  ;;  %v717_v32 = vmax.f32 %v579_v26, 0.0 }
 0x105   :  { %v684_v33 = vmax.f32 %v414_v29, 0.0  ;;  %v716_v34 = vmax.f32 %v574_v30, 0.0  ;;  %v983_v35 = vpop.f32.mrb[14].mxu0  ;;  %v1031_v36 = vpop.f32.mrb[14].mxu1 }
 0x106   :  { %749 = vst [vmem:[%s1649_s3 + $0x68] sm:$0xff] %v685_v31  ;;  %781 = vst [vmem:[%s1649_s3 + $0x168] sm:$0xff] %v717_v32  ;;  %v429_v37 = vadd.f32 %v983_v35, %v1388_v13  ;;  %v589_v38 = vadd.f32 %v1031_v36, %v1388_v13  ;;  %v423_v39 = vpop.f32.mrb[15].mxu0  ;;  %v583_v40 = vpop.f32.mrb[15].mxu1 }
 0x107   :  { %748 = vst [vmem:[%s1649_s3 + $0x60] sm:$0xff] %v684_v33  ;;  %780 = vst [vmem:[%s1649_s3 + $0x160] sm:$0xff] %v716_v34  ;;  %v424_v41 = vadd.f32 %v1388_v13, %v423_v39  ;;  %v584_v42 = vadd.f32 %v1388_v13, %v583_v40 }
 0x108   :  { %v687_v43 = vmax.f32 %v429_v37, 0.0  ;;  %v719_v44 = vmax.f32 %v589_v38, 0.0 }
 0x109   :  { %v686_v45 = vmax.f32 %v424_v41, 0.0  ;;  %v718_v46 = vmax.f32 %v584_v42, 0.0  ;;  %v986_v47 = vpop.f32.mrb[16].mxu0  ;;  %v1034_v48 = vpop.f32.mrb[16].mxu1 }
 0x10a   :  { %751 = vst [vmem:[%s1649_s3 + $0x78] sm:$0xff] %v687_v43  ;;  %783 = vst [vmem:[%s1649_s3 + $0x178] sm:$0xff] %v719_v44  ;;  %v439_v49 = vadd.f32 %v986_v47, %v1388_v13  ;;  %v599_v50 = vadd.f32 %v1034_v48, %v1388_v13  ;;  %v433_v51 = vpop.f32.mrb[17].mxu0  ;;  %v593_v52 = vpop.f32.mrb[17].mxu1 }
 0x10b   :  { %750 = vst [vmem:[%s1649_s3 + $0x70] sm:$0xff] %v686_v45  ;;  %782 = vst [vmem:[%s1649_s3 + $0x170] sm:$0xff] %v718_v46  ;;  %v434_v53 = vadd.f32 %v1388_v13, %v433_v51  ;;  %v594_v54 = vadd.f32 %v1388_v13, %v593_v52 }
 0x10c   :  { %v689_v55 = vmax.f32 %v439_v49, 0.0  ;;  %v721_v56 = vmax.f32 %v599_v50, 0.0 }
 0x10d   :  { %v688_v57 = vmax.f32 %v434_v53, 0.0  ;;  %v720_v58 = vmax.f32 %v594_v54, 0.0  ;;  %v989_v59 = vpop.f32.mrb[18].mxu0  ;;  %v1037_v60 = vpop.f32.mrb[18].mxu1 }
 0x10e   :  { %753 = vst [vmem:[%s1649_s3 + $0x88] sm:$0xff] %v689_v55  ;;  %785 = vst [vmem:[%s1649_s3 + $0x188] sm:$0xff] %v721_v56  ;;  %v449_v61 = vadd.f32 %v989_v59, %v1388_v13  ;;  %v609_v62 = vadd.f32 %v1037_v60, %v1388_v13  ;;  %v443_v63 = vpop.f32.mrb[19].mxu0  ;;  %v603_v0 = vpop.f32.mrb[19].mxu1 }
 0x10f   :  { %752 = vst [vmem:[%s1649_s3 + $0x80] sm:$0xff] %v688_v57  ;;  %784 = vst [vmem:[%s1649_s3 + $0x180] sm:$0xff] %v720_v58  ;;  %v444_v1 = vadd.f32 %v1388_v13, %v443_v63  ;;  %v604_v2 = vadd.f32 %v1388_v13, %v603_v0 }
 0x110   :  { %v691_v3 = vmax.f32 %v449_v61, 0.0  ;;  %v723_v4 = vmax.f32 %v609_v62, 0.0 }
 0x111   :  { %v690_v5 = vmax.f32 %v444_v1, 0.0  ;;  %v722_v6 = vmax.f32 %v604_v2, 0.0  ;;  %v992_v7 = vpop.f32.mrb[20].mxu0  ;;  %v1040_v8 = vpop.f32.mrb[20].mxu1 }
 0x112   :  { %755 = vst [vmem:[%s1649_s3 + $0x98] sm:$0xff] %v691_v3  ;;  %787 = vst [vmem:[%s1649_s3 + $0x198] sm:$0xff] %v723_v4  ;;  %v459_v9 = vadd.f32 %v992_v7, %v1388_v13  ;;  %v619_v10 = vadd.f32 %v1040_v8, %v1388_v13  ;;  %v453_v11 = vpop.f32.mrb[21].mxu0  ;;  %v613_v12 = vpop.f32.mrb[21].mxu1 }
 0x113   :  { %754 = vst [vmem:[%s1649_s3 + $0x90] sm:$0xff] %v690_v5  ;;  %786 = vst [vmem:[%s1649_s3 + $0x190] sm:$0xff] %v722_v6  ;;  %v454_v14 = vadd.f32 %v1388_v13, %v453_v11  ;;  %v614_v15 = vadd.f32 %v1388_v13, %v613_v12 }
 0x114   :  { %v693_v16 = vmax.f32 %v459_v9, 0.0  ;;  %v725_v17 = vmax.f32 %v619_v10, 0.0 }
 0x115   :  { %v692_v18 = vmax.f32 %v454_v14, 0.0  ;;  %v724_v19 = vmax.f32 %v614_v15, 0.0  ;;  %v995_v20 = vpop.f32.mrb[22].mxu0  ;;  %v1043_v21 = vpop.f32.mrb[22].mxu1 }
 0x116   :  { %757 = vst [vmem:[%s1649_s3 + $0xa8] sm:$0xff] %v693_v16  ;;  %789 = vst [vmem:[%s1649_s3 + $0x1a8] sm:$0xff] %v725_v17  ;;  %v469_v22 = vadd.f32 %v995_v20, %v1388_v13  ;;  %v629_v23 = vadd.f32 %v1043_v21, %v1388_v13  ;;  %v463_v24 = vpop.f32.mrb[23].mxu0  ;;  %v623_v25 = vpop.f32.mrb[23].mxu1 }
 0x117   :  { %756 = vst [vmem:[%s1649_s3 + $0xa0] sm:$0xff] %v692_v18  ;;  %788 = vst [vmem:[%s1649_s3 + $0x1a0] sm:$0xff] %v724_v19  ;;  %v464_v26 = vadd.f32 %v1388_v13, %v463_v24  ;;  %v624_v27 = vadd.f32 %v1388_v13, %v623_v25 }
 0x118   :  { %v695_v28 = vmax.f32 %v469_v22, 0.0  ;;  %v727_v29 = vmax.f32 %v629_v23, 0.0 }
 0x119   :  { %v694_v30 = vmax.f32 %v464_v26, 0.0  ;;  %v726_v31 = vmax.f32 %v624_v27, 0.0  ;;  %v998_v32 = vpop.f32.mrb[24].mxu0  ;;  %v1046_v33 = vpop.f32.mrb[24].mxu1 }
 0x11a   :  { %759 = vst [vmem:[%s1649_s3 + $0xb8] sm:$0xff] %v695_v28  ;;  %791 = vst [vmem:[%s1649_s3 + $0x1b8] sm:$0xff] %v727_v29  ;;  %v479_v34 = vadd.f32 %v998_v32, %v1388_v13  ;;  %v639_v35 = vadd.f32 %v1046_v33, %v1388_v13  ;;  %v473_v36 = vpop.f32.mrb[25].mxu0  ;;  %v633_v37 = vpop.f32.mrb[25].mxu1 }
 0x11b   :  { %758 = vst [vmem:[%s1649_s3 + $0xb0] sm:$0xff] %v694_v30  ;;  %790 = vst [vmem:[%s1649_s3 + $0x1b0] sm:$0xff] %v726_v31  ;;  %v474_v38 = vadd.f32 %v1388_v13, %v473_v36  ;;  %v634_v39 = vadd.f32 %v1388_v13, %v633_v37 }
 0x11c   :  { %v697_v40 = vmax.f32 %v479_v34, 0.0  ;;  %v729_v41 = vmax.f32 %v639_v35, 0.0 }
 0x11d   :  { %v696_v42 = vmax.f32 %v474_v38, 0.0  ;;  %v728_v43 = vmax.f32 %v634_v39, 0.0  ;;  %v1001_v44 = vpop.f32.mrb[26].mxu0  ;;  %v1049_v45 = vpop.f32.mrb[26].mxu1 }
 0x11e   :  { %761 = vst [vmem:[%s1649_s3 + $0xc8] sm:$0xff] %v697_v40  ;;  %793 = vst [vmem:[%s1649_s3 + $0x1c8] sm:$0xff] %v729_v41  ;;  %v489_v46 = vadd.f32 %v1001_v44, %v1388_v13  ;;  %v649_v47 = vadd.f32 %v1049_v45, %v1388_v13  ;;  %v483_v48 = vpop.f32.mrb[27].mxu0  ;;  %v643_v49 = vpop.f32.mrb[27].mxu1 }
 0x11f   :  { %760 = vst [vmem:[%s1649_s3 + $0xc0] sm:$0xff] %v696_v42  ;;  %792 = vst [vmem:[%s1649_s3 + $0x1c0] sm:$0xff] %v728_v43  ;;  %v484_v50 = vadd.f32 %v1388_v13, %v483_v48  ;;  %v644_v51 = vadd.f32 %v1388_v13, %v643_v49 }
 0x120   :  { %v699_v52 = vmax.f32 %v489_v46, 0.0  ;;  %v731_v53 = vmax.f32 %v649_v47, 0.0 }
 0x121   :  { %v698_v54 = vmax.f32 %v484_v50, 0.0  ;;  %v730_v55 = vmax.f32 %v644_v51, 0.0  ;;  %v1004_v56 = vpop.f32.mrb[28].mxu0  ;;  %v1052_v57 = vpop.f32.mrb[28].mxu1 }
 0x122   :  { %763 = vst [vmem:[%s1649_s3 + $0xd8] sm:$0xff] %v699_v52  ;;  %795 = vst [vmem:[%s1649_s3 + $0x1d8] sm:$0xff] %v731_v53  ;;  %v499_v58 = vadd.f32 %v1004_v56, %v1388_v13  ;;  %v659_v59 = vadd.f32 %v1052_v57, %v1388_v13  ;;  %v493_v60 = vpop.f32.mrb[29].mxu0  ;;  %v653_v61 = vpop.f32.mrb[29].mxu1 }
 0x123   :  { %762 = vst [vmem:[%s1649_s3 + $0xd0] sm:$0xff] %v698_v54  ;;  %794 = vst [vmem:[%s1649_s3 + $0x1d0] sm:$0xff] %v730_v55  ;;  %v494_v62 = vadd.f32 %v1388_v13, %v493_v60  ;;  %v654_v63 = vadd.f32 %v1388_v13, %v653_v61 }
 0x124   :  { %v701_v0 = vmax.f32 %v499_v58, 0.0  ;;  %v733_v1 = vmax.f32 %v659_v59, 0.0 }
 0x125   :  { %v700_v2 = vmax.f32 %v494_v62, 0.0  ;;  %v732_v3 = vmax.f32 %v654_v63, 0.0  ;;  %v1007_v4 = vpop.f32.mrb[30].mxu0  ;;  %v1055_v5 = vpop.f32.mrb[30].mxu1 }
 0x126   :  { %765 = vst [vmem:[%s1649_s3 + $0xe8] sm:$0xff] %v701_v0  ;;  %797 = vst [vmem:[%s1649_s3 + $0x1e8] sm:$0xff] %v733_v1  ;;  %v509_v6 = vadd.f32 %v1007_v4, %v1388_v13  ;;  %v669_v7 = vadd.f32 %v1055_v5, %v1388_v13  ;;  %v503_v8 = vpop.f32.mrb[31].mxu0  ;;  %v663_v9 = vpop.f32.mrb[31].mxu1 }
 0x127   :  { %764 = vst [vmem:[%s1649_s3 + $0xe0] sm:$0xff] %v700_v2  ;;  %796 = vst [vmem:[%s1649_s3 + $0x1e0] sm:$0xff] %v732_v3  ;;  %v504_v10 = vadd.f32 %v1388_v13, %v503_v8  ;;  %v664_v11 = vadd.f32 %v1388_v13, %v663_v9 }
 0x128   :  { %v703_v12 = vmax.f32 %v509_v6, 0.0  ;;  %v735_v14 = vmax.f32 %v669_v7, 0.0 }
 0x129   :  { %v702_v15 = vmax.f32 %v504_v10, 0.0  ;;  %v734_v16 = vmax.f32 %v664_v11, 0.0 }
 0x12a   :  { %767 = vst [vmem:[%s1649_s3 + $0xf8] sm:$0xff] %v703_v12  ;;  %799 = vst [vmem:[%s1649_s3 + $0x1f8] sm:$0xff] %v735_v14 }
 0x12b   :  { %766 = vst [vmem:[%s1649_s3 + $0xf0] sm:$0xff] %v702_v15  ;;  %798 = vst [vmem:[%s1649_s3 + $0x1f0] sm:$0xff] %v734_v16 }

// kernel: ssd_forward.32
= control target key start
LH: loop header
LB: loop body
LE: loop exit
PB: predicated region body
PF: predicated region fallthrough
CT: control target
= control target key end

     0   :  { %vm94_vm0 = vcmask 588800   ;;  %s1582_s1 = inlined_call_operand.vmem [shape: f32[72,128], index: 1, kind: input, shape index: {}]   ;;  %s1583_s0 = inlined_call_operand.vmem [shape: f32[512,72], index: 0, kind: input, shape index: {}]   ;;  %s1584_s2 = inlined_call_operand.vmem [shape: f32[1,128], index: 2, kind: input, shape index: {}]   ;;  %s1585_s3 = inlined_call_operand.vmem [shape: f32[512,128], index: 3, kind: output, shape index: {}]  }
   0x1   :  { %v78_v0 = vld [vmem:[%s1582_s1] sm:$0xff]  ;;  %v79_v1 = vld [vmem:[%s1582_s1 + $0x8] sm:$0xff]  ;;  %v80_v2 = vld [vmem:[%s1582_s1 + $0x10] sm:$0xff] }
   0x2   :  { %v992_v3 = vpack.c.bf16 %v79_v1, %v78_v0  ;;  %v81_v4 = vld [vmem:[%s1582_s1 + $0x18] sm:$0xff]  ;;  %v82_v6 = vld [vmem:[%s1582_s1 + $0x20] sm:$0xff]  ;;  %v83_v7 = vld [vmem:[%s1582_s1 + $0x28] sm:$0xff] }
   0x3   :  { %v996_v5 = vpack.c.bf16 %v81_v4, %v80_v2  ;;  %v14_v8 = vld [vmem:[%s1583_s0] sm:$0xff]  ;;  %v1000_v10 = vpack.c.bf16 %v83_v7, %v82_v6  ;;  %v84_v11 = vld [vmem:[%s1582_s1 + $0x30] sm:$0xff]  ;;  %v85_v12 = vld [vmem:[%s1582_s1 + $0x38] sm:$0xff] }
   0x4   :  { %993 = vmatprep.subr.bf16.mxu0 %v992_v3  ;;  %1008 = vmatprep.subr.bf16.mxu1 %v992_v3  ;;  %v46_v9 = vld [vmem:[%s1583_s0 + $0x100] sm:$0xff]  ;;  %v1004_v13 = vpack.c.bf16 %v85_v12, %v84_v11  ;;  %v15_v15 = vld [vmem:[%s1583_s0 + $0x8] sm:$0xff]  ;;  %v16_v17 = vld [vmem:[%s1583_s0 + $0x10] sm:$0xff] }
   0x5   :  { %995 = vmatpush3.bf16.msra.mxu0 %v992_v3  ;;  %1013 = vmatpush3.bf16.msra.mxu1 %v992_v3  ;;  %v86_v14 = vld [vmem:[%s1582_s1 + $0x40] sm:$0xff]  ;;  %v47_v16 = vld [vmem:[%s1583_s0 + $0x108] sm:$0xff]  ;;  %v48_v18 = vld [vmem:[%s1583_s0 + $0x110] sm:$0xff] }
   0x6   :  { %997 = vmatprep.subr.bf16.mxu0 %v996_v5  ;;  %1009 = vmatprep.subr.bf16.mxu1 %v996_v5  ;;  %v17_v19 = vld [vmem:[%s1583_s0 + $0x18] sm:$0xff]  ;;  %v18_v21 = vld [vmem:[%s1583_s0 + $0x20] sm:$0xff]  ;;  %v19_v23 = vld [vmem:[%s1583_s0 + $0x28] sm:$0xff] }
   0x7   :  { %896 = vmatprep.mubr.msk.f32.mxu0 %vm94_vm0, %v14_v8  ;;  %944 = vmatprep.mubr.msk.f32.mxu1 %vm94_vm0, %v46_v9  ;;  %v49_v20 = vld [vmem:[%s1583_s0 + $0x118] sm:$0xff]  ;;  %v50_v22 = vld [vmem:[%s1583_s0 + $0x120] sm:$0xff]  ;;  %v51_v24 = vld [vmem:[%s1583_s0 + $0x128] sm:$0xff] }
   0x8   :  { %v20_v25 = vld [vmem:[%s1583_s0 + $0x30] sm:$0xff]  ;;  %v21_v27 = vld [vmem:[%s1583_s0 + $0x38] sm:$0xff]  ;;  %v22_v29 = vld [vmem:[%s1583_s0 + $0x40] sm:$0xff] }
   0x9   :  { %999 = vmatpush3.bf16.msra.mxu0 %v996_v5  ;;  %1014 = vmatpush3.bf16.msra.mxu1 %v996_v5  ;;  %v52_v26 = vld [vmem:[%s1583_s0 + $0x130] sm:$0xff]  ;;  %v53_v28 = vld [vmem:[%s1583_s0 + $0x138] sm:$0xff]  ;;  %v54_v30 = vld [vmem:[%s1583_s0 + $0x140] sm:$0xff] }
   0xa   :  { %1001 = vmatprep.subr.bf16.mxu0 %v1000_v10  ;;  %1010 = vmatprep.subr.bf16.mxu1 %v1000_v10  ;;  %v23_v31 = vld [vmem:[%s1583_s0 + $0x48] sm:$0xff]  ;;  %v24_v33 = vld [vmem:[%s1583_s0 + $0x50] sm:$0xff]  ;;  %v25_v35 = vld [vmem:[%s1583_s0 + $0x58] sm:$0xff] }
   0xb   :  { %v55_v32 = vld [vmem:[%s1583_s0 + $0x148] sm:$0xff]  ;;  %v56_v34 = vld [vmem:[%s1583_s0 + $0x150] sm:$0xff]  ;;  %v57_v36 = vld [vmem:[%s1583_s0 + $0x158] sm:$0xff] }
   0xc   :  { %v26_v37 = vld [vmem:[%s1583_s0 + $0x60] sm:$0xff]  ;;  %v27_v39 = vld [vmem:[%s1583_s0 + $0x68] sm:$0xff]  ;;  %v28_v41 = vld [vmem:[%s1583_s0 + $0x70] sm:$0xff] }
   0xd   :  { %1003 = vmatpush3.bf16.msra.mxu0 %v1000_v10  ;;  %1015 = vmatpush3.bf16.msra.mxu1 %v1000_v10  ;;  %v58_v38 = vld [vmem:[%s1583_s0 + $0x160] sm:$0xff]  ;;  %v59_v40 = vld [vmem:[%s1583_s0 + $0x168] sm:$0xff]  ;;  %v60_v42 = vld [vmem:[%s1583_s0 + $0x170] sm:$0xff] }
   0xe   :  { %1005 = vmatprep.subr.bf16.mxu0 %v1004_v13  ;;  %1011 = vmatprep.subr.bf16.mxu1 %v1004_v13  ;;  %v29_v43 = vld [vmem:[%s1583_s0 + $0x78] sm:$0xff]  ;;  %v30_v45 = vld [vmem:[%s1583_s0 + $0x80] sm:$0xff]  ;;  %v31_v47 = vld [vmem:[%s1583_s0 + $0x88] sm:$0xff] }
   0xf   :  { %v61_v44 = vld [vmem:[%s1583_s0 + $0x178] sm:$0xff]  ;;  %v62_v46 = vld [vmem:[%s1583_s0 + $0x180] sm:$0xff]  ;;  %v63_v48 = vld [vmem:[%s1583_s0 + $0x188] sm:$0xff] }
  0x10   :  { %v32_v49 = vld [vmem:[%s1583_s0 + $0x90] sm:$0xff]  ;;  %v33_v51 = vld [vmem:[%s1583_s0 + $0x98] sm:$0xff]  ;;  %v34_v53 = vld [vmem:[%s1583_s0 + $0xa0] sm:$0xff] }
  0x11   :  { %1007 = vmatpush3.bf16.msra.mxu0 %v1004_v13  ;;  %1016 = vmatpush3.bf16.msra.mxu1 %v1004_v13  ;;  %v64_v50 = vld [vmem:[%s1583_s0 + $0x190] sm:$0xff]  ;;  %v65_v52 = vld [vmem:[%s1583_s0 + $0x198] sm:$0xff]  ;;  %v66_v54 = vld [vmem:[%s1583_s0 + $0x1a0] sm:$0xff] }
  0x12   :  { %894 = vmatprep.subr.mxu0 %v86_v14  ;;  %1012 = vmatprep.subr.mxu1 %v86_v14  ;;  %v35_v55 = vld [vmem:[%s1583_s0 + $0xa8] sm:$0xff]  ;;  %v36_v57 = vld [vmem:[%s1583_s0 + $0xb0] sm:$0xff]  ;;  %v37_v59 = vld [vmem:[%s1583_s0 + $0xb8] sm:$0xff] }
  0x13   :  { %v67_v56 = vld [vmem:[%s1583_s0 + $0x1a8] sm:$0xff]  ;;  %v68_v58 = vld [vmem:[%s1583_s0 + $0x1b0] sm:$0xff]  ;;  %v69_v60 = vld [vmem:[%s1583_s0 + $0x1b8] sm:$0xff] }
  0x14   :  { %v38_v61 = vld [vmem:[%s1583_s0 + $0xc0] sm:$0xff]  ;;  %v39_v63 = vld [vmem:[%s1583_s0 + $0xc8] sm:$0xff]  ;;  %v40_v1 = vld [vmem:[%s1583_s0 + $0xd0] sm:$0xff] }
  0x15   :  { %895 = vmatpush3.msra.mxu0 %v86_v14  ;;  %1017 = vmatpush3.msra.mxu1 %v86_v14  ;;  %v70_v62 = vld [vmem:[%s1583_s0 + $0x1c0] sm:$0xff]  ;;  %v71_v0 = vld [vmem:[%s1583_s0 + $0x1c8] sm:$0xff]  ;;  %v72_v2 = vld [vmem:[%s1583_s0 + $0x1d0] sm:$0xff] }
  0x16   :  { %897 = vmatmul.mubr.msk.f32.vlgmr.msra.gmra.mrb[0].mxu0 %vm94_vm0, %v15_v15  ;;  %945 = vmatmul.mubr.msk.f32.vlgmr.msra.gmra.mrb[0].mxu1 %vm94_vm0, %v47_v16  ;;  %v41_v3 = vld [vmem:[%s1583_s0 + $0xd8] sm:$0xff]  ;;  %v42_v5 = vld [vmem:[%s1583_s0 + $0xe0] sm:$0xff]  ;;  %v43_v7 = vld [vmem:[%s1583_s0 + $0xe8] sm:$0xff] }
  0x17   :  { %899 = vmatprep.mubr.msk.f32.mxu0 %vm94_vm0, %v16_v17  ;;  %947 = vmatprep.mubr.msk.f32.mxu1 %vm94_vm0, %v48_v18  ;;  %v73_v4 = vld [vmem:[%s1583_s0 + $0x1d8] sm:$0xff]  ;;  %v74_v6 = vld [vmem:[%s1583_s0 + $0x1e0] sm:$0xff]  ;;  %v75_v8 = vld [vmem:[%s1583_s0 + $0x1e8] sm:$0xff] }
  0x18   :  { %v44_v9 = vld [vmem:[%s1583_s0 + $0xf0] sm:$0xff]  ;;  %v45_v11 = vld [vmem:[%s1583_s0 + $0xf8] sm:$0xff]  ;;  %v1324_v13 = vld [vmem:[%s1584_s2] ss:$0 sm:$0xff] }
  0x19   :  { %v76_v10 = vld [vmem:[%s1583_s0 + $0x1f0] sm:$0xff]  ;;  %v77_v12 = vld [vmem:[%s1583_s0 + $0x1f8] sm:$0xff] }
  0x1a   :  { %900 = vmatmul.mubr.msk.f32.gmra.mrb[2].mxu0 %vm94_vm0, %v17_v19  ;;  %948 = vmatmul.mubr.msk.f32.gmra.mrb[2].mxu1 %vm94_vm0, %v49_v20 }
  0x1b   :  { %902 = vmatprep.mubr.msk.f32.mxu0 %vm94_vm0, %v18_v21  ;;  %950 = vmatprep.mubr.msk.f32.mxu1 %vm94_vm0, %v50_v22 }
  0x1e   :  { %903 = vmatmul.mubr.msk.f32.gmra.mrb[4].mxu0 %vm94_vm0, %v19_v23  ;;  %951 = vmatmul.mubr.msk.f32.gmra.mrb[4].mxu1 %vm94_vm0, %v51_v24 }
  0x1f   :  { %905 = vmatprep.mubr.msk.f32.mxu0 %vm94_vm0, %v20_v25  ;;  %953 = vmatprep.mubr.msk.f32.mxu1 %vm94_vm0, %v52_v26 }
  0x22   :  { %906 = vmatmul.mubr.msk.f32.gmra.mrb[6].mxu0 %vm94_vm0, %v21_v27  ;;  %954 = vmatmul.mubr.msk.f32.gmra.mrb[6].mxu1 %vm94_vm0, %v53_v28 }
  0x23   :  { %908 = vmatprep.mubr.msk.f32.mxu0 %vm94_vm0, %v22_v29  ;;  %956 = vmatprep.mubr.msk.f32.mxu1 %vm94_vm0, %v54_v30 }
  0x26   :  { %909 = vmatmul.mubr.msk.f32.gmra.mrb[8].mxu0 %vm94_vm0, %v23_v31  ;;  %957 = vmatmul.mubr.msk.f32.gmra.mrb[8].mxu1 %vm94_vm0, %v55_v32 }
  0x27   :  { %911 = vmatprep.mubr.msk.f32.mxu0 %vm94_vm0, %v24_v33  ;;  %959 = vmatprep.mubr.msk.f32.mxu1 %vm94_vm0, %v56_v34 }
  0x2a   :  { %912 = vmatmul.mubr.msk.f32.gmra.mrb[10].mxu0 %vm94_vm0, %v25_v35  ;;  %960 = vmatmul.mubr.msk.f32.gmra.mrb[10].mxu1 %vm94_vm0, %v57_v36 }
  0x2b   :  { %914 = vmatprep.mubr.msk.f32.mxu0 %vm94_vm0, %v26_v37  ;;  %962 = vmatprep.mubr.msk.f32.mxu1 %vm94_vm0, %v58_v38 }
  0x2e   :  { %915 = vmatmul.mubr.msk.f32.gmra.mrb[12].mxu0 %vm94_vm0, %v27_v39  ;;  %963 = vmatmul.mubr.msk.f32.gmra.mrb[12].mxu1 %vm94_vm0, %v59_v40 }
  0x2f   :  { %917 = vmatprep.mubr.msk.f32.mxu0 %vm94_vm0, %v28_v41  ;;  %965 = vmatprep.mubr.msk.f32.mxu1 %vm94_vm0, %v60_v42 }
  0x32   :  { %918 = vmatmul.mubr.msk.f32.gmra.mrb[14].mxu0 %vm94_vm0, %v29_v43  ;;  %966 = vmatmul.mubr.msk.f32.gmra.mrb[14].mxu1 %vm94_vm0, %v61_v44 }
  0x33   :  { %920 = vmatprep.mubr.msk.f32.mxu0 %vm94_vm0, %v30_v45  ;;  %968 = vmatprep.mubr.msk.f32.mxu1 %vm94_vm0, %v62_v46 }
  0x36   :  { %921 = vmatmul.mubr.msk.f32.gmra.mrb[16].mxu0 %vm94_vm0, %v31_v47  ;;  %969 = vmatmul.mubr.msk.f32.gmra.mrb[16].mxu1 %vm94_vm0, %v63_v48 }
  0x37   :  { %923 = vmatprep.mubr.msk.f32.mxu0 %vm94_vm0, %v32_v49  ;;  %971 = vmatprep.mubr.msk.f32.mxu1 %vm94_vm0, %v64_v50 }
  0x3a   :  { %924 = vmatmul.mubr.msk.f32.gmra.mrb[18].mxu0 %vm94_vm0, %v33_v51  ;;  %972 = vmatmul.mubr.msk.f32.gmra.mrb[18].mxu1 %vm94_vm0, %v65_v52 }
  0x3b   :  { %926 = vmatprep.mubr.msk.f32.mxu0 %vm94_vm0, %v34_v53  ;;  %974 = vmatprep.mubr.msk.f32.mxu1 %vm94_vm0, %v66_v54 }
  0x3e   :  { %927 = vmatmul.mubr.msk.f32.gmra.mrb[20].mxu0 %vm94_vm0, %v35_v55  ;;  %975 = vmatmul.mubr.msk.f32.gmra.mrb[20].mxu1 %vm94_vm0, %v67_v56 }
  0x3f   :  { %929 = vmatprep.mubr.msk.f32.mxu0 %vm94_vm0, %v36_v57  ;;  %977 = vmatprep.mubr.msk.f32.mxu1 %vm94_vm0, %v68_v58 }
  0x42   :  { %930 = vmatmul.mubr.msk.f32.gmra.mrb[22].mxu0 %vm94_vm0, %v37_v59  ;;  %978 = vmatmul.mubr.msk.f32.gmra.mrb[22].mxu1 %vm94_vm0, %v69_v60 }
  0x43   :  { %932 = vmatprep.mubr.msk.f32.mxu0 %vm94_vm0, %v38_v61  ;;  %980 = vmatprep.mubr.msk.f32.mxu1 %vm94_vm0, %v70_v62 }
  0x46   :  { %933 = vmatmul.mubr.msk.f32.gmra.mrb[24].mxu0 %vm94_vm0, %v39_v63  ;;  %981 = vmatmul.mubr.msk.f32.gmra.mrb[24].mxu1 %vm94_vm0, %v71_v0 }
  0x47   :  { %935 = vmatprep.mubr.msk.f32.mxu0 %vm94_vm0, %v40_v1  ;;  %983 = vmatprep.mubr.msk.f32.mxu1 %vm94_vm0, %v72_v2 }
  0x4a   :  { %936 = vmatmul.mubr.msk.f32.gmra.mrb[26].mxu0 %vm94_vm0, %v41_v3  ;;  %984 = vmatmul.mubr.msk.f32.gmra.mrb[26].mxu1 %vm94_vm0, %v73_v4 }
  0x4b   :  { %938 = vmatprep.mubr.msk.f32.mxu0 %vm94_vm0, %v42_v5  ;;  %986 = vmatprep.mubr.msk.f32.mxu1 %vm94_vm0, %v74_v6 }
  0x4e   :  { %939 = vmatmul.mubr.msk.f32.gmra.mrb[28].mxu0 %vm94_vm0, %v43_v7  ;;  %987 = vmatmul.mubr.msk.f32.gmra.mrb[28].mxu1 %vm94_vm0, %v75_v8 }
  0x4f   :  { %941 = vmatprep.mubr.msk.f32.mxu0 %vm94_vm0, %v44_v9  ;;  %989 = vmatprep.mubr.msk.f32.mxu1 %vm94_vm0, %v76_v10 }
  0x52   :  { %942 = vmatmul.mubr.msk.f32.gmra.mrb[30].mxu0 %vm94_vm0, %v45_v11  ;;  %990 = vmatmul.mubr.msk.f32.gmra.mrb[30].mxu1 %vm94_vm0, %v77_v12 }
  0xe9   :  { %v898_v14 = vpop.f32.mrb[0].mxu0  ;;  %v946_v15 = vpop.f32.mrb[0].mxu1 }
  0xea   :  { %v359_v16 = vadd.f32 %v898_v14, %v1324_v13  ;;  %v519_v17 = vadd.f32 %v946_v15, %v1324_v13  ;;  %v353_v18 = vpop.f32.mrb[1].mxu0  ;;  %v513_v19 = vpop.f32.mrb[1].mxu1 }
  0xeb   :  { %v354_v20 = vadd.f32 %v1324_v13, %v353_v18  ;;  %v514_v21 = vadd.f32 %v1324_v13, %v513_v19 }
  0xec   :  { %673 = vst [vmem:[%s1585_s3 + $0x8] sm:$0xff] %v359_v16  ;;  %705 = vst [vmem:[%s1585_s3 + $0x108] sm:$0xff] %v519_v17 }
  0xed   :  { %672 = vst [vmem:[%s1585_s3] sm:$0xff] %v354_v20  ;;  %704 = vst [vmem:[%s1585_s3 + $0x100] sm:$0xff] %v514_v21  ;;  %v901_v22 = vpop.f32.mrb[2].mxu0  ;;  %v949_v23 = vpop.f32.mrb[2].mxu1 }
  0xee   :  { %v369_v24 = vadd.f32 %v901_v22, %v1324_v13  ;;  %v529_v25 = vadd.f32 %v949_v23, %v1324_v13  ;;  %v363_v26 = vpop.f32.mrb[3].mxu0  ;;  %v523_v27 = vpop.f32.mrb[3].mxu1 }
  0xef   :  { %v364_v28 = vadd.f32 %v1324_v13, %v363_v26  ;;  %v524_v29 = vadd.f32 %v1324_v13, %v523_v27 }
  0xf0   :  { %675 = vst [vmem:[%s1585_s3 + $0x18] sm:$0xff] %v369_v24  ;;  %707 = vst [vmem:[%s1585_s3 + $0x118] sm:$0xff] %v529_v25 }
  0xf1   :  { %674 = vst [vmem:[%s1585_s3 + $0x10] sm:$0xff] %v364_v28  ;;  %706 = vst [vmem:[%s1585_s3 + $0x110] sm:$0xff] %v524_v29  ;;  %v904_v30 = vpop.f32.mrb[4].mxu0  ;;  %v952_v31 = vpop.f32.mrb[4].mxu1 }
  0xf2   :  { %v379_v32 = vadd.f32 %v904_v30, %v1324_v13  ;;  %v539_v33 = vadd.f32 %v952_v31, %v1324_v13  ;;  %v373_v34 = vpop.f32.mrb[5].mxu0  ;;  %v533_v35 = vpop.f32.mrb[5].mxu1 }
  0xf3   :  { %v374_v36 = vadd.f32 %v1324_v13, %v373_v34  ;;  %v534_v37 = vadd.f32 %v1324_v13, %v533_v35 }
  0xf4   :  { %677 = vst [vmem:[%s1585_s3 + $0x28] sm:$0xff] %v379_v32  ;;  %709 = vst [vmem:[%s1585_s3 + $0x128] sm:$0xff] %v539_v33 }
  0xf5   :  { %676 = vst [vmem:[%s1585_s3 + $0x20] sm:$0xff] %v374_v36  ;;  %708 = vst [vmem:[%s1585_s3 + $0x120] sm:$0xff] %v534_v37  ;;  %v907_v38 = vpop.f32.mrb[6].mxu0  ;;  %v955_v39 = vpop.f32.mrb[6].mxu1 }
  0xf6   :  { %v389_v40 = vadd.f32 %v907_v38, %v1324_v13  ;;  %v549_v41 = vadd.f32 %v955_v39, %v1324_v13  ;;  %v383_v42 = vpop.f32.mrb[7].mxu0  ;;  %v543_v43 = vpop.f32.mrb[7].mxu1 }
  0xf7   :  { %v384_v44 = vadd.f32 %v1324_v13, %v383_v42  ;;  %v544_v45 = vadd.f32 %v1324_v13, %v543_v43 }
  0xf8   :  { %679 = vst [vmem:[%s1585_s3 + $0x38] sm:$0xff] %v389_v40  ;;  %711 = vst [vmem:[%s1585_s3 + $0x138] sm:$0xff] %v549_v41 }
  0xf9   :  { %678 = vst [vmem:[%s1585_s3 + $0x30] sm:$0xff] %v384_v44  ;;  %710 = vst [vmem:[%s1585_s3 + $0x130] sm:$0xff] %v544_v45  ;;  %v910_v46 = vpop.f32.mrb[8].mxu0  ;;  %v958_v47 = vpop.f32.mrb[8].mxu1 }
  0xfa   :  { %v399_v48 = vadd.f32 %v910_v46, %v1324_v13  ;;  %v559_v49 = vadd.f32 %v958_v47, %v1324_v13  ;;  %v393_v50 = vpop.f32.mrb[9].mxu0  ;;  %v553_v51 = vpop.f32.mrb[9].mxu1 }
  0xfb   :  { %v394_v52 = vadd.f32 %v1324_v13, %v393_v50  ;;  %v554_v53 = vadd.f32 %v1324_v13, %v553_v51 }
  0xfc   :  { %681 = vst [vmem:[%s1585_s3 + $0x48] sm:$0xff] %v399_v48  ;;  %713 = vst [vmem:[%s1585_s3 + $0x148] sm:$0xff] %v559_v49 }
  0xfd   :  { %680 = vst [vmem:[%s1585_s3 + $0x40] sm:$0xff] %v394_v52  ;;  %712 = vst [vmem:[%s1585_s3 + $0x140] sm:$0xff] %v554_v53  ;;  %v913_v54 = vpop.f32.mrb[10].mxu0  ;;  %v961_v55 = vpop.f32.mrb[10].mxu1 }
  0xfe   :  { %v409_v56 = vadd.f32 %v913_v54, %v1324_v13  ;;  %v569_v57 = vadd.f32 %v961_v55, %v1324_v13  ;;  %v403_v58 = vpop.f32.mrb[11].mxu0  ;;  %v563_v59 = vpop.f32.mrb[11].mxu1 }
  0xff   :  { %v404_v60 = vadd.f32 %v1324_v13, %v403_v58  ;;  %v564_v61 = vadd.f32 %v1324_v13, %v563_v59 }
 0x100   :  { %683 = vst [vmem:[%s1585_s3 + $0x58] sm:$0xff] %v409_v56  ;;  %715 = vst [vmem:[%s1585_s3 + $0x158] sm:$0xff] %v569_v57 }
 0x101   :  { %682 = vst [vmem:[%s1585_s3 + $0x50] sm:$0xff] %v404_v60  ;;  %714 = vst [vmem:[%s1585_s3 + $0x150] sm:$0xff] %v564_v61  ;;  %v916_v62 = vpop.f32.mrb[12].mxu0  ;;  %v964_v63 = vpop.f32.mrb[12].mxu1 }
 0x102   :  { %v419_v0 = vadd.f32 %v916_v62, %v1324_v13  ;;  %v579_v1 = vadd.f32 %v964_v63, %v1324_v13  ;;  %v413_v2 = vpop.f32.mrb[13].mxu0  ;;  %v573_v3 = vpop.f32.mrb[13].mxu1 }
 0x103   :  { %v414_v4 = vadd.f32 %v1324_v13, %v413_v2  ;;  %v574_v5 = vadd.f32 %v1324_v13, %v573_v3 }
 0x104   :  { %685 = vst [vmem:[%s1585_s3 + $0x68] sm:$0xff] %v419_v0  ;;  %717 = vst [vmem:[%s1585_s3 + $0x168] sm:$0xff] %v579_v1 }
 0x105   :  { %684 = vst [vmem:[%s1585_s3 + $0x60] sm:$0xff] %v414_v4  ;;  %716 = vst [vmem:[%s1585_s3 + $0x160] sm:$0xff] %v574_v5  ;;  %v919_v6 = vpop.f32.mrb[14].mxu0  ;;  %v967_v7 = vpop.f32.mrb[14].mxu1 }
 0x106   :  { %v429_v8 = vadd.f32 %v919_v6, %v1324_v13  ;;  %v589_v9 = vadd.f32 %v967_v7, %v1324_v13  ;;  %v423_v10 = vpop.f32.mrb[15].mxu0  ;;  %v583_v11 = vpop.f32.mrb[15].mxu1 }
 0x107   :  { %v424_v12 = vadd.f32 %v1324_v13, %v423_v10  ;;  %v584_v14 = vadd.f32 %v1324_v13, %v583_v11 }
 0x108   :  { %687 = vst [vmem:[%s1585_s3 + $0x78] sm:$0xff] %v429_v8  ;;  %719 = vst [vmem:[%s1585_s3 + $0x178] sm:$0xff] %v589_v9 }
 0x109   :  { %686 = vst [vmem:[%s1585_s3 + $0x70] sm:$0xff] %v424_v12  ;;  %718 = vst [vmem:[%s1585_s3 + $0x170] sm:$0xff] %v584_v14  ;;  %v922_v15 = vpop.f32.mrb[16].mxu0  ;;  %v970_v16 = vpop.f32.mrb[16].mxu1 }
 0x10a   :  { %v439_v17 = vadd.f32 %v922_v15, %v1324_v13  ;;  %v599_v18 = vadd.f32 %v970_v16, %v1324_v13  ;;  %v433_v19 = vpop.f32.mrb[17].mxu0  ;;  %v593_v20 = vpop.f32.mrb[17].mxu1 }
 0x10b   :  { %v434_v21 = vadd.f32 %v1324_v13, %v433_v19  ;;  %v594_v22 = vadd.f32 %v1324_v13, %v593_v20 }
 0x10c   :  { %689 = vst [vmem:[%s1585_s3 + $0x88] sm:$0xff] %v439_v17  ;;  %721 = vst [vmem:[%s1585_s3 + $0x188] sm:$0xff] %v599_v18 }
 0x10d   :  { %688 = vst [vmem:[%s1585_s3 + $0x80] sm:$0xff] %v434_v21  ;;  %720 = vst [vmem:[%s1585_s3 + $0x180] sm:$0xff] %v594_v22  ;;  %v925_v23 = vpop.f32.mrb[18].mxu0  ;;  %v973_v24 = vpop.f32.mrb[18].mxu1 }
 0x10e   :  { %v449_v25 = vadd.f32 %v925_v23, %v1324_v13  ;;  %v609_v26 = vadd.f32 %v973_v24, %v1324_v13  ;;  %v443_v27 = vpop.f32.mrb[19].mxu0  ;;  %v603_v28 = vpop.f32.mrb[19].mxu1 }
 0x10f   :  { %v444_v29 = vadd.f32 %v1324_v13, %v443_v27  ;;  %v604_v30 = vadd.f32 %v1324_v13, %v603_v28 }
 0x110   :  { %691 = vst [vmem:[%s1585_s3 + $0x98] sm:$0xff] %v449_v25  ;;  %723 = vst [vmem:[%s1585_s3 + $0x198] sm:$0xff] %v609_v26 }
 0x111   :  { %690 = vst [vmem:[%s1585_s3 + $0x90] sm:$0xff] %v444_v29  ;;  %722 = vst [vmem:[%s1585_s3 + $0x190] sm:$0xff] %v604_v30  ;;  %v928_v31 = vpop.f32.mrb[20].mxu0  ;;  %v976_v32 = vpop.f32.mrb[20].mxu1 }
 0x112   :  { %v459_v33 = vadd.f32 %v928_v31, %v1324_v13  ;;  %v619_v34 = vadd.f32 %v976_v32, %v1324_v13  ;;  %v453_v35 = vpop.f32.mrb[21].mxu0  ;;  %v613_v36 = vpop.f32.mrb[21].mxu1 }
 0x113   :  { %v454_v37 = vadd.f32 %v1324_v13, %v453_v35  ;;  %v614_v38 = vadd.f32 %v1324_v13, %v613_v36 }
 0x114   :  { %693 = vst [vmem:[%s1585_s3 + $0xa8] sm:$0xff] %v459_v33  ;;  %725 = vst [vmem:[%s1585_s3 + $0x1a8] sm:$0xff] %v619_v34 }
 0x115   :  { %692 = vst [vmem:[%s1585_s3 + $0xa0] sm:$0xff] %v454_v37  ;;  %724 = vst [vmem:[%s1585_s3 + $0x1a0] sm:$0xff] %v614_v38  ;;  %v931_v39 = vpop.f32.mrb[22].mxu0  ;;  %v979_v40 = vpop.f32.mrb[22].mxu1 }
 0x116   :  { %v469_v41 = vadd.f32 %v931_v39, %v1324_v13  ;;  %v629_v42 = vadd.f32 %v979_v40, %v1324_v13  ;;  %v463_v43 = vpop.f32.mrb[23].mxu0  ;;  %v623_v44 = vpop.f32.mrb[23].mxu1 }
 0x117   :  { %v464_v45 = vadd.f32 %v1324_v13, %v463_v43  ;;  %v624_v46 = vadd.f32 %v1324_v13, %v623_v44 }
 0x118   :  { %695 = vst [vmem:[%s1585_s3 + $0xb8] sm:$0xff] %v469_v41  ;;  %727 = vst [vmem:[%s1585_s3 + $0x1b8] sm:$0xff] %v629_v42 }
 0x119   :  { %694 = vst [vmem:[%s1585_s3 + $0xb0] sm:$0xff] %v464_v45  ;;  %726 = vst [vmem:[%s1585_s3 + $0x1b0] sm:$0xff] %v624_v46  ;;  %v934_v47 = vpop.f32.mrb[24].mxu0  ;;  %v982_v48 = vpop.f32.mrb[24].mxu1 }
 0x11a   :  { %v479_v49 = vadd.f32 %v934_v47, %v1324_v13  ;;  %v639_v50 = vadd.f32 %v982_v48, %v1324_v13  ;;  %v473_v51 = vpop.f32.mrb[25].mxu0  ;;  %v633_v52 = vpop.f32.mrb[25].mxu1 }
 0x11b   :  { %v474_v53 = vadd.f32 %v1324_v13, %v473_v51  ;;  %v634_v54 = vadd.f32 %v1324_v13, %v633_v52 }
 0x11c   :  { %697 = vst [vmem:[%s1585_s3 + $0xc8] sm:$0xff] %v479_v49  ;;  %729 = vst [vmem:[%s1585_s3 + $0x1c8] sm:$0xff] %v639_v50 }
 0x11d   :  { %696 = vst [vmem:[%s1585_s3 + $0xc0] sm:$0xff] %v474_v53  ;;  %728 = vst [vmem:[%s1585_s3 + $0x1c0] sm:$0xff] %v634_v54  ;;  %v937_v55 = vpop.f32.mrb[26].mxu0  ;;  %v985_v56 = vpop.f32.mrb[26].mxu1 }
 0x11e   :  { %v489_v57 = vadd.f32 %v937_v55, %v1324_v13  ;;  %v649_v58 = vadd.f32 %v985_v56, %v1324_v13  ;;  %v483_v59 = vpop.f32.mrb[27].mxu0  ;;  %v643_v60 = vpop.f32.mrb[27].mxu1 }
 0x11f   :  { %v484_v61 = vadd.f32 %v1324_v13, %v483_v59  ;;  %v644_v62 = vadd.f32 %v1324_v13, %v643_v60 }
 0x120   :  { %699 = vst [vmem:[%s1585_s3 + $0xd8] sm:$0xff] %v489_v57  ;;  %731 = vst [vmem:[%s1585_s3 + $0x1d8] sm:$0xff] %v649_v58 }
 0x121   :  { %698 = vst [vmem:[%s1585_s3 + $0xd0] sm:$0xff] %v484_v61  ;;  %730 = vst [vmem:[%s1585_s3 + $0x1d0] sm:$0xff] %v644_v62  ;;  %v940_v63 = vpop.f32.mrb[28].mxu0  ;;  %v988_v0 = vpop.f32.mrb[28].mxu1 }
 0x122   :  { %v499_v1 = vadd.f32 %v940_v63, %v1324_v13  ;;  %v659_v2 = vadd.f32 %v988_v0, %v1324_v13  ;;  %v493_v3 = vpop.f32.mrb[29].mxu0  ;;  %v653_v4 = vpop.f32.mrb[29].mxu1 }
 0x123   :  { %v494_v5 = vadd.f32 %v1324_v13, %v493_v3  ;;  %v654_v6 = vadd.f32 %v1324_v13, %v653_v4 }
 0x124   :  { %701 = vst [vmem:[%s1585_s3 + $0xe8] sm:$0xff] %v499_v1  ;;  %733 = vst [vmem:[%s1585_s3 + $0x1e8] sm:$0xff] %v659_v2 }
 0x125   :  { %700 = vst [vmem:[%s1585_s3 + $0xe0] sm:$0xff] %v494_v5  ;;  %732 = vst [vmem:[%s1585_s3 + $0x1e0] sm:$0xff] %v654_v6  ;;  %v943_v7 = vpop.f32.mrb[30].mxu0  ;;  %v991_v8 = vpop.f32.mrb[30].mxu1 }
 0x126   :  { %v509_v9 = vadd.f32 %v943_v7, %v1324_v13  ;;  %v669_v10 = vadd.f32 %v991_v8, %v1324_v13  ;;  %v503_v11 = vpop.f32.mrb[31].mxu0  ;;  %v663_v12 = vpop.f32.mrb[31].mxu1 }
 0x127   :  { %v504_v14 = vadd.f32 %v1324_v13, %v503_v11  ;;  %v664_v15 = vadd.f32 %v1324_v13, %v663_v12 }
 0x128   :  { %703 = vst [vmem:[%s1585_s3 + $0xf8] sm:$0xff] %v509_v9  ;;  %735 = vst [vmem:[%s1585_s3 + $0x1f8] sm:$0xff] %v669_v10 }
 0x129   :  { %702 = vst [vmem:[%s1585_s3 + $0xf0] sm:$0xff] %v504_v14  ;;  %734 = vst [vmem:[%s1585_s3 + $0x1f0] sm:$0xff] %v664_v15 }

// kernel: ssd_forward.33
= control target key start
LH: loop header
LB: loop body
LE: loop exit
PB: predicated region body
PF: predicated region fallthrough
CT: control target
= control target key end

     0   :  { %vm158_vm0 = vcmask 588800   ;;  %s1710_s1 = inlined_call_operand.vmem [shape: f32[72,128], index: 1, kind: input, shape index: {}]   ;;  %s1711_s0 = inlined_call_operand.vmem [shape: f32[512,72], index: 0, kind: input, shape index: {}]   ;;  %s1712_s2 = inlined_call_operand.vmem [shape: f32[1,128], index: 2, kind: input, shape index: {}]   ;;  %s1713_s3 = inlined_call_operand.vmem [shape: f32[512,128], index: 3, kind: output, shape index: {}]  }
   0x1   :  { %v142_v0 = vld [vmem:[%s1710_s1] sm:$0xff]  ;;  %v143_v1 = vld [vmem:[%s1710_s1 + $0x8] sm:$0xff]  ;;  %v144_v2 = vld [vmem:[%s1710_s1 + $0x10] sm:$0xff] }
   0x2   :  { %v1120_v3 = vpack.c.bf16 %v143_v1, %v142_v0  ;;  %v145_v4 = vld [vmem:[%s1710_s1 + $0x18] sm:$0xff]  ;;  %v146_v6 = vld [vmem:[%s1710_s1 + $0x20] sm:$0xff]  ;;  %v147_v7 = vld [vmem:[%s1710_s1 + $0x28] sm:$0xff] }
   0x3   :  { %v1124_v5 = vpack.c.bf16 %v145_v4, %v144_v2  ;;  %v14_v8 = vld [vmem:[%s1711_s0] sm:$0xff]  ;;  %v1128_v12 = vpack.c.bf16 %v147_v7, %v146_v6  ;;  %v148_v13 = vld [vmem:[%s1710_s1 + $0x30] sm:$0xff]  ;;  %v149_v14 = vld [vmem:[%s1710_s1 + $0x38] sm:$0xff] }
   0x4   :  { %1121 = vmatprep.subr.bf16.mxu0 %v1120_v3  ;;  %1136 = vmatprep.subr.bf16.mxu1 %v1120_v3  ;;  %v46_v9 = vld [vmem:[%s1711_s0 + $0x100] sm:$0xff]  ;;  %v78_v10 = vmax.f32 %v14_v8, 0.0  ;;  %v1132_v15 = vpack.c.bf16 %v149_v14, %v148_v13  ;;  %v15_v17 = vld [vmem:[%s1711_s0 + $0x8] sm:$0xff]  ;;  %v16_v19 = vld [vmem:[%s1711_s0 + $0x10] sm:$0xff] }
   0x5   :  { %1123 = vmatpush3.bf16.msra.mxu0 %v1120_v3  ;;  %1141 = vmatpush3.bf16.msra.mxu1 %v1120_v3  ;;  %v110_v11 = vmax.f32 %v46_v9, 0.0  ;;  %v150_v16 = vld [vmem:[%s1710_s1 + $0x40] sm:$0xff]  ;;  %v47_v18 = vld [vmem:[%s1711_s0 + $0x108] sm:$0xff]  ;;  %v48_v20 = vld [vmem:[%s1711_s0 + $0x110] sm:$0xff]  ;;  %v79_v21 = vmax.f32 %v15_v17, 0.0  ;;  %v80_v23 = vmax.f32 %v16_v19, 0.0 }
   0x6   :  { %1125 = vmatprep.subr.bf16.mxu0 %v1124_v5  ;;  %1137 = vmatprep.subr.bf16.mxu1 %v1124_v5  ;;  %v111_v22 = vmax.f32 %v47_v18, 0.0  ;;  %v112_v24 = vmax.f32 %v48_v20, 0.0  ;;  %v17_v25 = vld [vmem:[%s1711_s0 + $0x18] sm:$0xff]  ;;  %v18_v27 = vld [vmem:[%s1711_s0 + $0x20] sm:$0xff]  ;;  %v19_v33 = vld [vmem:[%s1711_s0 + $0x28] sm:$0xff] }
   0x7   :  { %1024 = vmatprep.mubr.msk.f32.mxu0 %vm158_vm0, %v78_v10  ;;  %1072 = vmatprep.mubr.msk.f32.mxu1 %vm158_vm0, %v110_v11  ;;  %v49_v26 = vld [vmem:[%s1711_s0 + $0x118] sm:$0xff]  ;;  %v50_v28 = vld [vmem:[%s1711_s0 + $0x120] sm:$0xff]  ;;  %v81_v29 = vmax.f32 %v17_v25, 0.0  ;;  %v82_v31 = vmax.f32 %v18_v27, 0.0  ;;  %v51_v34 = vld [vmem:[%s1711_s0 + $0x128] sm:$0xff]  ;;  %v83_v37 = vmax.f32 %v19_v33, 0.0 }
   0x8   :  { %v113_v30 = vmax.f32 %v49_v26, 0.0  ;;  %v114_v32 = vmax.f32 %v50_v28, 0.0  ;;  %v20_v35 = vld [vmem:[%s1711_s0 + $0x30] sm:$0xff]  ;;  %v115_v38 = vmax.f32 %v51_v34, 0.0  ;;  %v21_v41 = vld [vmem:[%s1711_s0 + $0x38] sm:$0xff]  ;;  %v22_v43 = vld [vmem:[%s1711_s0 + $0x40] sm:$0xff] }
   0x9   :  { %1127 = vmatpush3.bf16.msra.mxu0 %v1124_v5  ;;  %1142 = vmatpush3.bf16.msra.mxu1 %v1124_v5  ;;  %v52_v36 = vld [vmem:[%s1711_s0 + $0x130] sm:$0xff]  ;;  %v84_v39 = vmax.f32 %v20_v35, 0.0  ;;  %v53_v42 = vld [vmem:[%s1711_s0 + $0x138] sm:$0xff]  ;;  %v54_v44 = vld [vmem:[%s1711_s0 + $0x140] sm:$0xff]  ;;  %v85_v45 = vmax.f32 %v21_v41, 0.0  ;;  %v86_v47 = vmax.f32 %v22_v43, 0.0 }
   0xa   :  { %1129 = vmatprep.subr.bf16.mxu0 %v1128_v12  ;;  %1138 = vmatprep.subr.bf16.mxu1 %v1128_v12  ;;  %v116_v40 = vmax.f32 %v52_v36, 0.0  ;;  %v117_v46 = vmax.f32 %v53_v42, 0.0  ;;  %v118_v48 = vmax.f32 %v54_v44, 0.0  ;;  %v23_v49 = vld [vmem:[%s1711_s0 + $0x48] sm:$0xff]  ;;  %v24_v51 = vld [vmem:[%s1711_s0 + $0x50] sm:$0xff]  ;;  %v25_v57 = vld [vmem:[%s1711_s0 + $0x58] sm:$0xff] }
   0xb   :  { %v55_v50 = vld [vmem:[%s1711_s0 + $0x148] sm:$0xff]  ;;  %v56_v52 = vld [vmem:[%s1711_s0 + $0x150] sm:$0xff]  ;;  %v87_v53 = vmax.f32 %v23_v49, 0.0  ;;  %v88_v55 = vmax.f32 %v24_v51, 0.0  ;;  %v57_v58 = vld [vmem:[%s1711_s0 + $0x158] sm:$0xff]  ;;  %v89_v61 = vmax.f32 %v25_v57, 0.0 }
   0xc   :  { %v119_v54 = vmax.f32 %v55_v50, 0.0  ;;  %v120_v56 = vmax.f32 %v56_v52, 0.0  ;;  %v26_v59 = vld [vmem:[%s1711_s0 + $0x60] sm:$0xff]  ;;  %v121_v62 = vmax.f32 %v57_v58, 0.0  ;;  %v27_v1 = vld [vmem:[%s1711_s0 + $0x68] sm:$0xff]  ;;  %v28_v3 = vld [vmem:[%s1711_s0 + $0x70] sm:$0xff] }
   0xd   :  { %1131 = vmatpush3.bf16.msra.mxu0 %v1128_v12  ;;  %1143 = vmatpush3.bf16.msra.mxu1 %v1128_v12  ;;  %v58_v60 = vld [vmem:[%s1711_s0 + $0x160] sm:$0xff]  ;;  %v90_v63 = vmax.f32 %v26_v59, 0.0  ;;  %v59_v2 = vld [vmem:[%s1711_s0 + $0x168] sm:$0xff]  ;;  %v60_v4 = vld [vmem:[%s1711_s0 + $0x170] sm:$0xff]  ;;  %v91_v5 = vmax.f32 %v27_v1, 0.0  ;;  %v92_v7 = vmax.f32 %v28_v3, 0.0 }
   0xe   :  { %1133 = vmatprep.subr.bf16.mxu0 %v1132_v15  ;;  %1139 = vmatprep.subr.bf16.mxu1 %v1132_v15  ;;  %v122_v0 = vmax.f32 %v58_v60, 0.0  ;;  %v123_v6 = vmax.f32 %v59_v2, 0.0  ;;  %v124_v8 = vmax.f32 %v60_v4, 0.0  ;;  %v29_v9 = vld [vmem:[%s1711_s0 + $0x78] sm:$0xff]  ;;  %v30_v11 = vld [vmem:[%s1711_s0 + $0x80] sm:$0xff]  ;;  %v31_v17 = vld [vmem:[%s1711_s0 + $0x88] sm:$0xff] }
   0xf   :  { %v61_v10 = vld [vmem:[%s1711_s0 + $0x178] sm:$0xff]  ;;  %v62_v12 = vld [vmem:[%s1711_s0 + $0x180] sm:$0xff]  ;;  %v93_v13 = vmax.f32 %v29_v9, 0.0  ;;  %v63_v18 = vld [vmem:[%s1711_s0 + $0x188] sm:$0xff] }
  0x10   :  { %v125_v14 = vmax.f32 %v61_v10, 0.0  ;;  %v32_v19 = vld [vmem:[%s1711_s0 + $0x90] sm:$0xff]  ;;  %v33_v25 = vld [vmem:[%s1711_s0 + $0x98] sm:$0xff]  ;;  %v34_v27 = vld [vmem:[%s1711_s0 + $0xa0] sm:$0xff] }
  0x11   :  { %1135 = vmatpush3.bf16.msra.mxu0 %v1132_v15  ;;  %1144 = vmatpush3.bf16.msra.mxu1 %v1132_v15  ;;  %v94_v15 = vmax.f32 %v30_v11, 0.0  ;;  %v64_v20 = vld [vmem:[%s1711_s0 + $0x190] sm:$0xff]  ;;  %v65_v26 = vld [vmem:[%s1711_s0 + $0x198] sm:$0xff]  ;;  %v66_v28 = vld [vmem:[%s1711_s0 + $0x1a0] sm:$0xff] }
  0x12   :  { %1022 = vmatprep.subr.mxu0 %v150_v16  ;;  %1140 = vmatprep.subr.mxu1 %v150_v16  ;;  %v35_v33 = vld [vmem:[%s1711_s0 + $0xa8] sm:$0xff]  ;;  %v36_v35 = vld [vmem:[%s1711_s0 + $0xb0] sm:$0xff]  ;;  %v37_v41 = vld [vmem:[%s1711_s0 + $0xb8] sm:$0xff] }
  0x13   :  { %v67_v34 = vld [vmem:[%s1711_s0 + $0x1a8] sm:$0xff]  ;;  %v68_v36 = vld [vmem:[%s1711_s0 + $0x1b0] sm:$0xff]  ;;  %v69_v42 = vld [vmem:[%s1711_s0 + $0x1b8] sm:$0xff] }
  0x14   :  { %v38_v43 = vld [vmem:[%s1711_s0 + $0xc0] sm:$0xff]  ;;  %v39_v49 = vld [vmem:[%s1711_s0 + $0xc8] sm:$0xff]  ;;  %v40_v51 = vld [vmem:[%s1711_s0 + $0xd0] sm:$0xff] }
  0x15   :  { %1023 = vmatpush3.msra.mxu0 %v150_v16  ;;  %1145 = vmatpush3.msra.mxu1 %v150_v16  ;;  %v126_v16 = vmax.f32 %v62_v12, 0.0  ;;  %v70_v44 = vld [vmem:[%s1711_s0 + $0x1c0] sm:$0xff]  ;;  %v71_v50 = vld [vmem:[%s1711_s0 + $0x1c8] sm:$0xff]  ;;  %v72_v52 = vld [vmem:[%s1711_s0 + $0x1d0] sm:$0xff] }
  0x16   :  { %1025 = vmatmul.mubr.msk.f32.vlgmr.msra.gmra.mrb[0].mxu0 %vm158_vm0, %v79_v21  ;;  %1073 = vmatmul.mubr.msk.f32.vlgmr.msra.gmra.mrb[0].mxu1 %vm158_vm0, %v111_v22  ;;  %v95_v21 = vmax.f32 %v31_v17, 0.0  ;;  %v127_v22 = vmax.f32 %v63_v18, 0.0  ;;  %v41_v57 = vld [vmem:[%s1711_s0 + $0xd8] sm:$0xff]  ;;  %v42_v59 = vld [vmem:[%s1711_s0 + $0xe0] sm:$0xff]  ;;  %v43_v1 = vld [vmem:[%s1711_s0 + $0xe8] sm:$0xff] }
  0x17   :  { %1027 = vmatprep.mubr.msk.f32.mxu0 %vm158_vm0, %v80_v23  ;;  %1075 = vmatprep.mubr.msk.f32.mxu1 %vm158_vm0, %v112_v24  ;;  %v96_v23 = vmax.f32 %v32_v19, 0.0  ;;  %v128_v24 = vmax.f32 %v64_v20, 0.0  ;;  %v73_v58 = vld [vmem:[%s1711_s0 + $0x1d8] sm:$0xff]  ;;  %v74_v60 = vld [vmem:[%s1711_s0 + $0x1e0] sm:$0xff]  ;;  %v75_v2 = vld [vmem:[%s1711_s0 + $0x1e8] sm:$0xff] }
  0x18   :  { %v44_v3 = vld [vmem:[%s1711_s0 + $0xf0] sm:$0xff]  ;;  %v45_v9 = vld [vmem:[%s1711_s0 + $0xf8] sm:$0xff] }
  0x19   :  { %v76_v4 = vld [vmem:[%s1711_s0 + $0x1f0] sm:$0xff]  ;;  %v77_v10 = vld [vmem:[%s1711_s0 + $0x1f8] sm:$0xff]  ;;  %v109_v11 = vmax.f32 %v45_v9, 0.0 }
  0x1a   :  { %1028 = vmatmul.mubr.msk.f32.gmra.mrb[2].mxu0 %vm158_vm0, %v81_v29  ;;  %1076 = vmatmul.mubr.msk.f32.gmra.mrb[2].mxu1 %vm158_vm0, %v113_v30  ;;  %v97_v29 = vmax.f32 %v33_v25, 0.0  ;;  %v129_v30 = vmax.f32 %v65_v26, 0.0  ;;  %v141_v12 = vmax.f32 %v77_v10, 0.0 }
  0x1b   :  { %1030 = vmatprep.mubr.msk.f32.mxu0 %vm158_vm0, %v82_v31  ;;  %1078 = vmatprep.mubr.msk.f32.mxu1 %vm158_vm0, %v114_v32  ;;  %v98_v31 = vmax.f32 %v34_v27, 0.0  ;;  %v130_v32 = vmax.f32 %v66_v28, 0.0 }
  0x1e   :  { %1031 = vmatmul.mubr.msk.f32.gmra.mrb[4].mxu0 %vm158_vm0, %v83_v37  ;;  %1079 = vmatmul.mubr.msk.f32.gmra.mrb[4].mxu1 %vm158_vm0, %v115_v38  ;;  %v99_v37 = vmax.f32 %v35_v33, 0.0  ;;  %v131_v38 = vmax.f32 %v67_v34, 0.0 }
  0x1f   :  { %1033 = vmatprep.mubr.msk.f32.mxu0 %vm158_vm0, %v84_v39  ;;  %1081 = vmatprep.mubr.msk.f32.mxu1 %vm158_vm0, %v116_v40  ;;  %v100_v39 = vmax.f32 %v36_v35, 0.0  ;;  %v132_v40 = vmax.f32 %v68_v36, 0.0 }
  0x22   :  { %1034 = vmatmul.mubr.msk.f32.gmra.mrb[6].mxu0 %vm158_vm0, %v85_v45  ;;  %1082 = vmatmul.mubr.msk.f32.gmra.mrb[6].mxu1 %vm158_vm0, %v117_v46  ;;  %v101_v45 = vmax.f32 %v37_v41, 0.0  ;;  %v133_v46 = vmax.f32 %v69_v42, 0.0 }
  0x23   :  { %1036 = vmatprep.mubr.msk.f32.mxu0 %vm158_vm0, %v86_v47  ;;  %1084 = vmatprep.mubr.msk.f32.mxu1 %vm158_vm0, %v118_v48  ;;  %v102_v47 = vmax.f32 %v38_v43, 0.0  ;;  %v134_v48 = vmax.f32 %v70_v44, 0.0 }
  0x26   :  { %1037 = vmatmul.mubr.msk.f32.gmra.mrb[8].mxu0 %vm158_vm0, %v87_v53  ;;  %1085 = vmatmul.mubr.msk.f32.gmra.mrb[8].mxu1 %vm158_vm0, %v119_v54  ;;  %v103_v53 = vmax.f32 %v39_v49, 0.0  ;;  %v135_v54 = vmax.f32 %v71_v50, 0.0 }
  0x27   :  { %1039 = vmatprep.mubr.msk.f32.mxu0 %vm158_vm0, %v88_v55  ;;  %1087 = vmatprep.mubr.msk.f32.mxu1 %vm158_vm0, %v120_v56  ;;  %v104_v55 = vmax.f32 %v40_v51, 0.0  ;;  %v136_v56 = vmax.f32 %v72_v52, 0.0 }
  0x2a   :  { %1040 = vmatmul.mubr.msk.f32.gmra.mrb[10].mxu0 %vm158_vm0, %v89_v61  ;;  %1088 = vmatmul.mubr.msk.f32.gmra.mrb[10].mxu1 %vm158_vm0, %v121_v62  ;;  %v105_v61 = vmax.f32 %v41_v57, 0.0  ;;  %v137_v62 = vmax.f32 %v73_v58, 0.0 }
  0x2b   :  { %1042 = vmatprep.mubr.msk.f32.mxu0 %vm158_vm0, %v90_v63  ;;  %1090 = vmatprep.mubr.msk.f32.mxu1 %vm158_vm0, %v122_v0  ;;  %v106_v63 = vmax.f32 %v42_v59, 0.0  ;;  %v138_v0 = vmax.f32 %v74_v60, 0.0 }
  0x2e   :  { %1043 = vmatmul.mubr.msk.f32.gmra.mrb[12].mxu0 %vm158_vm0, %v91_v5  ;;  %1091 = vmatmul.mubr.msk.f32.gmra.mrb[12].mxu1 %vm158_vm0, %v123_v6  ;;  %v107_v5 = vmax.f32 %v43_v1, 0.0  ;;  %v139_v6 = vmax.f32 %v75_v2, 0.0 }
  0x2f   :  { %1045 = vmatprep.mubr.msk.f32.mxu0 %vm158_vm0, %v92_v7  ;;  %1093 = vmatprep.mubr.msk.f32.mxu1 %vm158_vm0, %v124_v8  ;;  %v108_v7 = vmax.f32 %v44_v3, 0.0  ;;  %v140_v8 = vmax.f32 %v76_v4, 0.0 }
  0x32   :  { %1046 = vmatmul.mubr.msk.f32.gmra.mrb[14].mxu0 %vm158_vm0, %v93_v13  ;;  %1094 = vmatmul.mubr.msk.f32.gmra.mrb[14].mxu1 %vm158_vm0, %v125_v14  ;;  %v1452_v13 = vld [vmem:[%s1712_s2] ss:$0 sm:$0xff] }
  0x33   :  { %1048 = vmatprep.mubr.msk.f32.mxu0 %vm158_vm0, %v94_v15  ;;  %1096 = vmatprep.mubr.msk.f32.mxu1 %vm158_vm0, %v126_v16 }
  0x36   :  { %1049 = vmatmul.mubr.msk.f32.gmra.mrb[16].mxu0 %vm158_vm0, %v95_v21  ;;  %1097 = vmatmul.mubr.msk.f32.gmra.mrb[16].mxu1 %vm158_vm0, %v127_v22 }
  0x37   :  { %1051 = vmatprep.mubr.msk.f32.mxu0 %vm158_vm0, %v96_v23  ;;  %1099 = vmatprep.mubr.msk.f32.mxu1 %vm158_vm0, %v128_v24 }
  0x3a   :  { %1052 = vmatmul.mubr.msk.f32.gmra.mrb[18].mxu0 %vm158_vm0, %v97_v29  ;;  %1100 = vmatmul.mubr.msk.f32.gmra.mrb[18].mxu1 %vm158_vm0, %v129_v30 }
  0x3b   :  { %1054 = vmatprep.mubr.msk.f32.mxu0 %vm158_vm0, %v98_v31  ;;  %1102 = vmatprep.mubr.msk.f32.mxu1 %vm158_vm0, %v130_v32 }
  0x3e   :  { %1055 = vmatmul.mubr.msk.f32.gmra.mrb[20].mxu0 %vm158_vm0, %v99_v37  ;;  %1103 = vmatmul.mubr.msk.f32.gmra.mrb[20].mxu1 %vm158_vm0, %v131_v38 }
  0x3f   :  { %1057 = vmatprep.mubr.msk.f32.mxu0 %vm158_vm0, %v100_v39  ;;  %1105 = vmatprep.mubr.msk.f32.mxu1 %vm158_vm0, %v132_v40 }
  0x42   :  { %1058 = vmatmul.mubr.msk.f32.gmra.mrb[22].mxu0 %vm158_vm0, %v101_v45  ;;  %1106 = vmatmul.mubr.msk.f32.gmra.mrb[22].mxu1 %vm158_vm0, %v133_v46 }
  0x43   :  { %1060 = vmatprep.mubr.msk.f32.mxu0 %vm158_vm0, %v102_v47  ;;  %1108 = vmatprep.mubr.msk.f32.mxu1 %vm158_vm0, %v134_v48 }
  0x46   :  { %1061 = vmatmul.mubr.msk.f32.gmra.mrb[24].mxu0 %vm158_vm0, %v103_v53  ;;  %1109 = vmatmul.mubr.msk.f32.gmra.mrb[24].mxu1 %vm158_vm0, %v135_v54 }
  0x47   :  { %1063 = vmatprep.mubr.msk.f32.mxu0 %vm158_vm0, %v104_v55  ;;  %1111 = vmatprep.mubr.msk.f32.mxu1 %vm158_vm0, %v136_v56 }
  0x4a   :  { %1064 = vmatmul.mubr.msk.f32.gmra.mrb[26].mxu0 %vm158_vm0, %v105_v61  ;;  %1112 = vmatmul.mubr.msk.f32.gmra.mrb[26].mxu1 %vm158_vm0, %v137_v62 }
  0x4b   :  { %1066 = vmatprep.mubr.msk.f32.mxu0 %vm158_vm0, %v106_v63  ;;  %1114 = vmatprep.mubr.msk.f32.mxu1 %vm158_vm0, %v138_v0 }
  0x4e   :  { %1067 = vmatmul.mubr.msk.f32.gmra.mrb[28].mxu0 %vm158_vm0, %v107_v5  ;;  %1115 = vmatmul.mubr.msk.f32.gmra.mrb[28].mxu1 %vm158_vm0, %v139_v6 }
  0x4f   :  { %1069 = vmatprep.mubr.msk.f32.mxu0 %vm158_vm0, %v108_v7  ;;  %1117 = vmatprep.mubr.msk.f32.mxu1 %vm158_vm0, %v140_v8 }
  0x52   :  { %1070 = vmatmul.mubr.msk.f32.gmra.mrb[30].mxu0 %vm158_vm0, %v109_v11  ;;  %1118 = vmatmul.mubr.msk.f32.gmra.mrb[30].mxu1 %vm158_vm0, %v141_v12 }
  0xe9   :  { %v1026_v14 = vpop.f32.mrb[0].mxu0  ;;  %v1074_v15 = vpop.f32.mrb[0].mxu1 }
  0xea   :  { %v423_v16 = vadd.f32 %v1026_v14, %v1452_v13  ;;  %v583_v17 = vadd.f32 %v1074_v15, %v1452_v13  ;;  %v417_v18 = vpop.f32.mrb[1].mxu0  ;;  %v577_v19 = vpop.f32.mrb[1].mxu1 }
  0xeb   :  { %v418_v20 = vadd.f32 %v1452_v13, %v417_v18  ;;  %v578_v21 = vadd.f32 %v1452_v13, %v577_v19 }
  0xec   :  { %v737_v22 = vmax.f32 %v423_v16, 0.0  ;;  %v769_v23 = vmax.f32 %v583_v17, 0.0 }
  0xed   :  { %v736_v24 = vmax.f32 %v418_v20, 0.0  ;;  %v768_v25 = vmax.f32 %v578_v21, 0.0  ;;  %v1029_v26 = vpop.f32.mrb[2].mxu0  ;;  %v1077_v27 = vpop.f32.mrb[2].mxu1 }
  0xee   :  { %801 = vst [vmem:[%s1713_s3 + $0x8] sm:$0xff] %v737_v22  ;;  %833 = vst [vmem:[%s1713_s3 + $0x108] sm:$0xff] %v769_v23  ;;  %v433_v28 = vadd.f32 %v1029_v26, %v1452_v13  ;;  %v593_v29 = vadd.f32 %v1077_v27, %v1452_v13  ;;  %v427_v30 = vpop.f32.mrb[3].mxu0  ;;  %v587_v31 = vpop.f32.mrb[3].mxu1 }
  0xef   :  { %800 = vst [vmem:[%s1713_s3] sm:$0xff] %v736_v24  ;;  %832 = vst [vmem:[%s1713_s3 + $0x100] sm:$0xff] %v768_v25  ;;  %v428_v32 = vadd.f32 %v1452_v13, %v427_v30  ;;  %v588_v33 = vadd.f32 %v1452_v13, %v587_v31 }
  0xf0   :  { %v739_v34 = vmax.f32 %v433_v28, 0.0  ;;  %v771_v35 = vmax.f32 %v593_v29, 0.0 }
  0xf1   :  { %v738_v36 = vmax.f32 %v428_v32, 0.0  ;;  %v770_v37 = vmax.f32 %v588_v33, 0.0  ;;  %v1032_v38 = vpop.f32.mrb[4].mxu0  ;;  %v1080_v39 = vpop.f32.mrb[4].mxu1 }
  0xf2   :  { %803 = vst [vmem:[%s1713_s3 + $0x18] sm:$0xff] %v739_v34  ;;  %835 = vst [vmem:[%s1713_s3 + $0x118] sm:$0xff] %v771_v35  ;;  %v443_v40 = vadd.f32 %v1032_v38, %v1452_v13  ;;  %v603_v41 = vadd.f32 %v1080_v39, %v1452_v13  ;;  %v437_v42 = vpop.f32.mrb[5].mxu0  ;;  %v597_v43 = vpop.f32.mrb[5].mxu1 }
  0xf3   :  { %802 = vst [vmem:[%s1713_s3 + $0x10] sm:$0xff] %v738_v36  ;;  %834 = vst [vmem:[%s1713_s3 + $0x110] sm:$0xff] %v770_v37  ;;  %v438_v44 = vadd.f32 %v1452_v13, %v437_v42  ;;  %v598_v45 = vadd.f32 %v1452_v13, %v597_v43 }
  0xf4   :  { %v741_v46 = vmax.f32 %v443_v40, 0.0  ;;  %v773_v47 = vmax.f32 %v603_v41, 0.0 }
  0xf5   :  { %v740_v48 = vmax.f32 %v438_v44, 0.0  ;;  %v772_v49 = vmax.f32 %v598_v45, 0.0  ;;  %v1035_v50 = vpop.f32.mrb[6].mxu0  ;;  %v1083_v51 = vpop.f32.mrb[6].mxu1 }
  0xf6   :  { %805 = vst [vmem:[%s1713_s3 + $0x28] sm:$0xff] %v741_v46  ;;  %837 = vst [vmem:[%s1713_s3 + $0x128] sm:$0xff] %v773_v47  ;;  %v453_v52 = vadd.f32 %v1035_v50, %v1452_v13  ;;  %v613_v53 = vadd.f32 %v1083_v51, %v1452_v13  ;;  %v447_v54 = vpop.f32.mrb[7].mxu0  ;;  %v607_v55 = vpop.f32.mrb[7].mxu1 }
  0xf7   :  { %804 = vst [vmem:[%s1713_s3 + $0x20] sm:$0xff] %v740_v48  ;;  %836 = vst [vmem:[%s1713_s3 + $0x120] sm:$0xff] %v772_v49  ;;  %v448_v56 = vadd.f32 %v1452_v13, %v447_v54  ;;  %v608_v57 = vadd.f32 %v1452_v13, %v607_v55 }
  0xf8   :  { %v743_v58 = vmax.f32 %v453_v52, 0.0  ;;  %v775_v59 = vmax.f32 %v613_v53, 0.0 }
  0xf9   :  { %v742_v60 = vmax.f32 %v448_v56, 0.0  ;;  %v774_v61 = vmax.f32 %v608_v57, 0.0  ;;  %v1038_v62 = vpop.f32.mrb[8].mxu0  ;;  %v1086_v63 = vpop.f32.mrb[8].mxu1 }
  0xfa   :  { %807 = vst [vmem:[%s1713_s3 + $0x38] sm:$0xff] %v743_v58  ;;  %839 = vst [vmem:[%s1713_s3 + $0x138] sm:$0xff] %v775_v59  ;;  %v463_v0 = vadd.f32 %v1038_v62, %v1452_v13  ;;  %v623_v1 = vadd.f32 %v1086_v63, %v1452_v13  ;;  %v457_v2 = vpop.f32.mrb[9].mxu0  ;;  %v617_v3 = vpop.f32.mrb[9].mxu1 }
  0xfb   :  { %806 = vst [vmem:[%s1713_s3 + $0x30] sm:$0xff] %v742_v60  ;;  %838 = vst [vmem:[%s1713_s3 + $0x130] sm:$0xff] %v774_v61  ;;  %v458_v4 = vadd.f32 %v1452_v13, %v457_v2  ;;  %v618_v5 = vadd.f32 %v1452_v13, %v617_v3 }
  0xfc   :  { %v745_v6 = vmax.f32 %v463_v0, 0.0  ;;  %v777_v7 = vmax.f32 %v623_v1, 0.0 }
  0xfd   :  { %v744_v8 = vmax.f32 %v458_v4, 0.0  ;;  %v776_v9 = vmax.f32 %v618_v5, 0.0  ;;  %v1041_v10 = vpop.f32.mrb[10].mxu0  ;;  %v1089_v11 = vpop.f32.mrb[10].mxu1 }
  0xfe   :  { %809 = vst [vmem:[%s1713_s3 + $0x48] sm:$0xff] %v745_v6  ;;  %841 = vst [vmem:[%s1713_s3 + $0x148] sm:$0xff] %v777_v7  ;;  %v473_v12 = vadd.f32 %v1041_v10, %v1452_v13  ;;  %v633_v14 = vadd.f32 %v1089_v11, %v1452_v13  ;;  %v467_v15 = vpop.f32.mrb[11].mxu0  ;;  %v627_v16 = vpop.f32.mrb[11].mxu1 }
  0xff   :  { %808 = vst [vmem:[%s1713_s3 + $0x40] sm:$0xff] %v744_v8  ;;  %840 = vst [vmem:[%s1713_s3 + $0x140] sm:$0xff] %v776_v9  ;;  %v468_v17 = vadd.f32 %v1452_v13, %v467_v15  ;;  %v628_v18 = vadd.f32 %v1452_v13, %v627_v16 }
 0x100   :  { %v747_v19 = vmax.f32 %v473_v12, 0.0  ;;  %v779_v20 = vmax.f32 %v633_v14, 0.0 }
 0x101   :  { %v746_v21 = vmax.f32 %v468_v17, 0.0  ;;  %v778_v22 = vmax.f32 %v628_v18, 0.0  ;;  %v1044_v23 = vpop.f32.mrb[12].mxu0  ;;  %v1092_v24 = vpop.f32.mrb[12].mxu1 }
 0x102   :  { %811 = vst [vmem:[%s1713_s3 + $0x58] sm:$0xff] %v747_v19  ;;  %843 = vst [vmem:[%s1713_s3 + $0x158] sm:$0xff] %v779_v20  ;;  %v483_v25 = vadd.f32 %v1044_v23, %v1452_v13  ;;  %v643_v26 = vadd.f32 %v1092_v24, %v1452_v13  ;;  %v477_v27 = vpop.f32.mrb[13].mxu0  ;;  %v637_v28 = vpop.f32.mrb[13].mxu1 }
 0x103   :  { %810 = vst [vmem:[%s1713_s3 + $0x50] sm:$0xff] %v746_v21  ;;  %842 = vst [vmem:[%s1713_s3 + $0x150] sm:$0xff] %v778_v22  ;;  %v478_v29 = vadd.f32 %v1452_v13, %v477_v27  ;;  %v638_v30 = vadd.f32 %v1452_v13, %v637_v28 }
 0x104   :  { %v749_v31 = vmax.f32 %v483_v25, 0.0  ;;  %v781_v32 = vmax.f32 %v643_v26, 0.0 }
 0x105   :  { %v748_v33 = vmax.f32 %v478_v29, 0.0  ;;  %v780_v34 = vmax.f32 %v638_v30, 0.0  ;;  %v1047_v35 = vpop.f32.mrb[14].mxu0  ;;  %v1095_v36 = vpop.f32.mrb[14].mxu1 }
 0x106   :  { %813 = vst [vmem:[%s1713_s3 + $0x68] sm:$0xff] %v749_v31  ;;  %845 = vst [vmem:[%s1713_s3 + $0x168] sm:$0xff] %v781_v32  ;;  %v493_v37 = vadd.f32 %v1047_v35, %v1452_v13  ;;  %v653_v38 = vadd.f32 %v1095_v36, %v1452_v13  ;;  %v487_v39 = vpop.f32.mrb[15].mxu0  ;;  %v647_v40 = vpop.f32.mrb[15].mxu1 }
 0x107   :  { %812 = vst [vmem:[%s1713_s3 + $0x60] sm:$0xff] %v748_v33  ;;  %844 = vst [vmem:[%s1713_s3 + $0x160] sm:$0xff] %v780_v34  ;;  %v488_v41 = vadd.f32 %v1452_v13, %v487_v39  ;;  %v648_v42 = vadd.f32 %v1452_v13, %v647_v40 }
 0x108   :  { %v751_v43 = vmax.f32 %v493_v37, 0.0  ;;  %v783_v44 = vmax.f32 %v653_v38, 0.0 }
 0x109   :  { %v750_v45 = vmax.f32 %v488_v41, 0.0  ;;  %v782_v46 = vmax.f32 %v648_v42, 0.0  ;;  %v1050_v47 = vpop.f32.mrb[16].mxu0  ;;  %v1098_v48 = vpop.f32.mrb[16].mxu1 }
 0x10a   :  { %815 = vst [vmem:[%s1713_s3 + $0x78] sm:$0xff] %v751_v43  ;;  %847 = vst [vmem:[%s1713_s3 + $0x178] sm:$0xff] %v783_v44  ;;  %v503_v49 = vadd.f32 %v1050_v47, %v1452_v13  ;;  %v663_v50 = vadd.f32 %v1098_v48, %v1452_v13  ;;  %v497_v51 = vpop.f32.mrb[17].mxu0  ;;  %v657_v52 = vpop.f32.mrb[17].mxu1 }
 0x10b   :  { %814 = vst [vmem:[%s1713_s3 + $0x70] sm:$0xff] %v750_v45  ;;  %846 = vst [vmem:[%s1713_s3 + $0x170] sm:$0xff] %v782_v46  ;;  %v498_v53 = vadd.f32 %v1452_v13, %v497_v51  ;;  %v658_v54 = vadd.f32 %v1452_v13, %v657_v52 }
 0x10c   :  { %v753_v55 = vmax.f32 %v503_v49, 0.0  ;;  %v785_v56 = vmax.f32 %v663_v50, 0.0 }
 0x10d   :  { %v752_v57 = vmax.f32 %v498_v53, 0.0  ;;  %v784_v58 = vmax.f32 %v658_v54, 0.0  ;;  %v1053_v59 = vpop.f32.mrb[18].mxu0  ;;  %v1101_v60 = vpop.f32.mrb[18].mxu1 }
 0x10e   :  { %817 = vst [vmem:[%s1713_s3 + $0x88] sm:$0xff] %v753_v55  ;;  %849 = vst [vmem:[%s1713_s3 + $0x188] sm:$0xff] %v785_v56  ;;  %v513_v61 = vadd.f32 %v1053_v59, %v1452_v13  ;;  %v673_v62 = vadd.f32 %v1101_v60, %v1452_v13  ;;  %v507_v63 = vpop.f32.mrb[19].mxu0  ;;  %v667_v0 = vpop.f32.mrb[19].mxu1 }
 0x10f   :  { %816 = vst [vmem:[%s1713_s3 + $0x80] sm:$0xff] %v752_v57  ;;  %848 = vst [vmem:[%s1713_s3 + $0x180] sm:$0xff] %v784_v58  ;;  %v508_v1 = vadd.f32 %v1452_v13, %v507_v63  ;;  %v668_v2 = vadd.f32 %v1452_v13, %v667_v0 }
 0x110   :  { %v755_v3 = vmax.f32 %v513_v61, 0.0  ;;  %v787_v4 = vmax.f32 %v673_v62, 0.0 }
 0x111   :  { %v754_v5 = vmax.f32 %v508_v1, 0.0  ;;  %v786_v6 = vmax.f32 %v668_v2, 0.0  ;;  %v1056_v7 = vpop.f32.mrb[20].mxu0  ;;  %v1104_v8 = vpop.f32.mrb[20].mxu1 }
 0x112   :  { %819 = vst [vmem:[%s1713_s3 + $0x98] sm:$0xff] %v755_v3  ;;  %851 = vst [vmem:[%s1713_s3 + $0x198] sm:$0xff] %v787_v4  ;;  %v523_v9 = vadd.f32 %v1056_v7, %v1452_v13  ;;  %v683_v10 = vadd.f32 %v1104_v8, %v1452_v13  ;;  %v517_v11 = vpop.f32.mrb[21].mxu0  ;;  %v677_v12 = vpop.f32.mrb[21].mxu1 }
 0x113   :  { %818 = vst [vmem:[%s1713_s3 + $0x90] sm:$0xff] %v754_v5  ;;  %850 = vst [vmem:[%s1713_s3 + $0x190] sm:$0xff] %v786_v6  ;;  %v518_v14 = vadd.f32 %v1452_v13, %v517_v11  ;;  %v678_v15 = vadd.f32 %v1452_v13, %v677_v12 }
 0x114   :  { %v757_v16 = vmax.f32 %v523_v9, 0.0  ;;  %v789_v17 = vmax.f32 %v683_v10, 0.0 }
 0x115   :  { %v756_v18 = vmax.f32 %v518_v14, 0.0  ;;  %v788_v19 = vmax.f32 %v678_v15, 0.0  ;;  %v1059_v20 = vpop.f32.mrb[22].mxu0  ;;  %v1107_v21 = vpop.f32.mrb[22].mxu1 }
 0x116   :  { %821 = vst [vmem:[%s1713_s3 + $0xa8] sm:$0xff] %v757_v16  ;;  %853 = vst [vmem:[%s1713_s3 + $0x1a8] sm:$0xff] %v789_v17  ;;  %v533_v22 = vadd.f32 %v1059_v20, %v1452_v13  ;;  %v693_v23 = vadd.f32 %v1107_v21, %v1452_v13  ;;  %v527_v24 = vpop.f32.mrb[23].mxu0  ;;  %v687_v25 = vpop.f32.mrb[23].mxu1 }
 0x117   :  { %820 = vst [vmem:[%s1713_s3 + $0xa0] sm:$0xff] %v756_v18  ;;  %852 = vst [vmem:[%s1713_s3 + $0x1a0] sm:$0xff] %v788_v19  ;;  %v528_v26 = vadd.f32 %v1452_v13, %v527_v24  ;;  %v688_v27 = vadd.f32 %v1452_v13, %v687_v25 }
 0x118   :  { %v759_v28 = vmax.f32 %v533_v22, 0.0  ;;  %v791_v29 = vmax.f32 %v693_v23, 0.0 }
 0x119   :  { %v758_v30 = vmax.f32 %v528_v26, 0.0  ;;  %v790_v31 = vmax.f32 %v688_v27, 0.0  ;;  %v1062_v32 = vpop.f32.mrb[24].mxu0  ;;  %v1110_v33 = vpop.f32.mrb[24].mxu1 }
 0x11a   :  { %823 = vst [vmem:[%s1713_s3 + $0xb8] sm:$0xff] %v759_v28  ;;  %855 = vst [vmem:[%s1713_s3 + $0x1b8] sm:$0xff] %v791_v29  ;;  %v543_v34 = vadd.f32 %v1062_v32, %v1452_v13  ;;  %v703_v35 = vadd.f32 %v1110_v33, %v1452_v13  ;;  %v537_v36 = vpop.f32.mrb[25].mxu0  ;;  %v697_v37 = vpop.f32.mrb[25].mxu1 }
 0x11b   :  { %822 = vst [vmem:[%s1713_s3 + $0xb0] sm:$0xff] %v758_v30  ;;  %854 = vst [vmem:[%s1713_s3 + $0x1b0] sm:$0xff] %v790_v31  ;;  %v538_v38 = vadd.f32 %v1452_v13, %v537_v36  ;;  %v698_v39 = vadd.f32 %v1452_v13, %v697_v37 }
 0x11c   :  { %v761_v40 = vmax.f32 %v543_v34, 0.0  ;;  %v793_v41 = vmax.f32 %v703_v35, 0.0 }
 0x11d   :  { %v760_v42 = vmax.f32 %v538_v38, 0.0  ;;  %v792_v43 = vmax.f32 %v698_v39, 0.0  ;;  %v1065_v44 = vpop.f32.mrb[26].mxu0  ;;  %v1113_v45 = vpop.f32.mrb[26].mxu1 }
 0x11e   :  { %825 = vst [vmem:[%s1713_s3 + $0xc8] sm:$0xff] %v761_v40  ;;  %857 = vst [vmem:[%s1713_s3 + $0x1c8] sm:$0xff] %v793_v41  ;;  %v553_v46 = vadd.f32 %v1065_v44, %v1452_v13  ;;  %v713_v47 = vadd.f32 %v1113_v45, %v1452_v13  ;;  %v547_v48 = vpop.f32.mrb[27].mxu0  ;;  %v707_v49 = vpop.f32.mrb[27].mxu1 }
 0x11f   :  { %824 = vst [vmem:[%s1713_s3 + $0xc0] sm:$0xff] %v760_v42  ;;  %856 = vst [vmem:[%s1713_s3 + $0x1c0] sm:$0xff] %v792_v43  ;;  %v548_v50 = vadd.f32 %v1452_v13, %v547_v48  ;;  %v708_v51 = vadd.f32 %v1452_v13, %v707_v49 }
 0x120   :  { %v763_v52 = vmax.f32 %v553_v46, 0.0  ;;  %v795_v53 = vmax.f32 %v713_v47, 0.0 }
 0x121   :  { %v762_v54 = vmax.f32 %v548_v50, 0.0  ;;  %v794_v55 = vmax.f32 %v708_v51, 0.0  ;;  %v1068_v56 = vpop.f32.mrb[28].mxu0  ;;  %v1116_v57 = vpop.f32.mrb[28].mxu1 }
 0x122   :  { %827 = vst [vmem:[%s1713_s3 + $0xd8] sm:$0xff] %v763_v52  ;;  %859 = vst [vmem:[%s1713_s3 + $0x1d8] sm:$0xff] %v795_v53  ;;  %v563_v58 = vadd.f32 %v1068_v56, %v1452_v13  ;;  %v723_v59 = vadd.f32 %v1116_v57, %v1452_v13  ;;  %v557_v60 = vpop.f32.mrb[29].mxu0  ;;  %v717_v61 = vpop.f32.mrb[29].mxu1 }
 0x123   :  { %826 = vst [vmem:[%s1713_s3 + $0xd0] sm:$0xff] %v762_v54  ;;  %858 = vst [vmem:[%s1713_s3 + $0x1d0] sm:$0xff] %v794_v55  ;;  %v558_v62 = vadd.f32 %v1452_v13, %v557_v60  ;;  %v718_v63 = vadd.f32 %v1452_v13, %v717_v61 }
 0x124   :  { %v765_v0 = vmax.f32 %v563_v58, 0.0  ;;  %v797_v1 = vmax.f32 %v723_v59, 0.0 }
 0x125   :  { %v764_v2 = vmax.f32 %v558_v62, 0.0  ;;  %v796_v3 = vmax.f32 %v718_v63, 0.0  ;;  %v1071_v4 = vpop.f32.mrb[30].mxu0  ;;  %v1119_v5 = vpop.f32.mrb[30].mxu1 }
 0x126   :  { %829 = vst [vmem:[%s1713_s3 + $0xe8] sm:$0xff] %v765_v0  ;;  %861 = vst [vmem:[%s1713_s3 + $0x1e8] sm:$0xff] %v797_v1  ;;  %v573_v6 = vadd.f32 %v1071_v4, %v1452_v13  ;;  %v733_v7 = vadd.f32 %v1119_v5, %v1452_v13  ;;  %v567_v8 = vpop.f32.mrb[31].mxu0  ;;  %v727_v9 = vpop.f32.mrb[31].mxu1 }
 0x127   :  { %828 = vst [vmem:[%s1713_s3 + $0xe0] sm:$0xff] %v764_v2  ;;  %860 = vst [vmem:[%s1713_s3 + $0x1e0] sm:$0xff] %v796_v3  ;;  %v568_v10 = vadd.f32 %v1452_v13, %v567_v8  ;;  %v728_v11 = vadd.f32 %v1452_v13, %v727_v9 }
 0x128   :  { %v767_v12 = vmax.f32 %v573_v6, 0.0  ;;  %v799_v14 = vmax.f32 %v733_v7, 0.0 }
 0x129   :  { %v766_v15 = vmax.f32 %v568_v10, 0.0  ;;  %v798_v16 = vmax.f32 %v728_v11, 0.0 }
 0x12a   :  { %831 = vst [vmem:[%s1713_s3 + $0xf8] sm:$0xff] %v767_v12  ;;  %863 = vst [vmem:[%s1713_s3 + $0x1f8] sm:$0xff] %v799_v14 }
 0x12b   :  { %830 = vst [vmem:[%s1713_s3 + $0xf0] sm:$0xff] %v766_v15  ;;  %862 = vst [vmem:[%s1713_s3 + $0x1f0] sm:$0xff] %v798_v16 }

// kernel: ssd_forward.34
= control target key start
LH: loop header
LB: loop body
LE: loop exit
PB: predicated region body
PF: predicated region fallthrough
CT: control target
= control target key end

     0   :  { %vm86_vm0 = vcmask 64512   ;;  %s1566_s1 = inlined_call_operand.vmem [shape: f32[8,128], index: 1, kind: input, shape index: {}]   ;;  %s1567_s0 = inlined_call_operand.vmem [shape: f32[512,8], index: 0, kind: input, shape index: {}]   ;;  %s1568_s2 = inlined_call_operand.vmem [shape: f32[1,128], index: 2, kind: input, shape index: {}]   ;;  %s1569_s3 = inlined_call_operand.vmem [shape: f32[512,128], index: 3, kind: output, shape index: {}]  }
   0x1   :  { %v78_v0 = vld [vmem:[%s1566_s1] sm:$0xff]  ;;  %v15_v3 = vld [vmem:[%s1567_s0 + $0x8] sm:$0xff]  ;;  %v16_v5 = vld [vmem:[%s1567_s0 + $0x10] sm:$0xff] }
   0x2   :  { %v14_v1 = vld [vmem:[%s1567_s0] sm:$0xff]  ;;  %926 = vmatprep.subr.mxu0 %v78_v0  ;;  %1024 = vmatprep.subr.mxu1 %v78_v0  ;;  %v47_v4 = vld [vmem:[%s1567_s0 + $0x108] sm:$0xff]  ;;  %v48_v6 = vld [vmem:[%s1567_s0 + $0x110] sm:$0xff] }
   0x3   :  { %v46_v2 = vld [vmem:[%s1567_s0 + $0x100] sm:$0xff]  ;;  %927 = vmatpush3.msra.mxu0 %v78_v0  ;;  %1025 = vmatpush3.msra.mxu1 %v78_v0  ;;  %v17_v7 = vld [vmem:[%s1567_s0 + $0x18] sm:$0xff]  ;;  %v19_v11 = vld [vmem:[%s1567_s0 + $0x28] sm:$0xff] }
   0x4   :  { %928 = vmatprep.mubr.msk.f32.mxu0 %vm86_vm0, %v14_v1  ;;  %976 = vmatprep.mubr.msk.f32.mxu1 %vm86_vm0, %v46_v2  ;;  %v49_v8 = vld [vmem:[%s1567_s0 + $0x118] sm:$0xff]  ;;  %v18_v9 = vld [vmem:[%s1567_s0 + $0x20] sm:$0xff]  ;;  %v51_v12 = vld [vmem:[%s1567_s0 + $0x128] sm:$0xff] }
   0x5   :  { %929 = vmatmul.mubr.msk.f32.vlgmr.msra.gmra.mrb[0].mxu0 %vm86_vm0, %v15_v3  ;;  %977 = vmatmul.mubr.msk.f32.vlgmr.msra.gmra.mrb[0].mxu1 %vm86_vm0, %v47_v4  ;;  %v50_v10 = vld [vmem:[%s1567_s0 + $0x120] sm:$0xff]  ;;  %v20_v13 = vld [vmem:[%s1567_s0 + $0x30] sm:$0xff]  ;;  %v21_v15 = vld [vmem:[%s1567_s0 + $0x38] sm:$0xff] }
   0x6   :  { %931 = vmatprep.mubr.msk.f32.mxu0 %vm86_vm0, %v16_v5  ;;  %979 = vmatprep.mubr.msk.f32.mxu1 %vm86_vm0, %v48_v6  ;;  %v52_v14 = vld [vmem:[%s1567_s0 + $0x130] sm:$0xff]  ;;  %v53_v16 = vld [vmem:[%s1567_s0 + $0x138] sm:$0xff]  ;;  %v22_v17 = vld [vmem:[%s1567_s0 + $0x40] sm:$0xff] }
   0x7   :  { %v54_v18 = vld [vmem:[%s1567_s0 + $0x140] sm:$0xff]  ;;  %v23_v19 = vld [vmem:[%s1567_s0 + $0x48] sm:$0xff]  ;;  %v24_v21 = vld [vmem:[%s1567_s0 + $0x50] sm:$0xff] }
   0x8   :  { %v55_v20 = vld [vmem:[%s1567_s0 + $0x148] sm:$0xff]  ;;  %v56_v22 = vld [vmem:[%s1567_s0 + $0x150] sm:$0xff]  ;;  %v25_v23 = vld [vmem:[%s1567_s0 + $0x58] sm:$0xff] }
   0x9   :  { %932 = vmatmul.mubr.msk.f32.gmra.mrb[2].mxu0 %vm86_vm0, %v17_v7  ;;  %980 = vmatmul.mubr.msk.f32.gmra.mrb[2].mxu1 %vm86_vm0, %v49_v8  ;;  %v57_v24 = vld [vmem:[%s1567_s0 + $0x158] sm:$0xff]  ;;  %v26_v25 = vld [vmem:[%s1567_s0 + $0x60] sm:$0xff]  ;;  %v27_v27 = vld [vmem:[%s1567_s0 + $0x68] sm:$0xff] }
   0xa   :  { %934 = vmatprep.mubr.msk.f32.mxu0 %vm86_vm0, %v18_v9  ;;  %982 = vmatprep.mubr.msk.f32.mxu1 %vm86_vm0, %v50_v10  ;;  %v58_v26 = vld [vmem:[%s1567_s0 + $0x160] sm:$0xff]  ;;  %v59_v28 = vld [vmem:[%s1567_s0 + $0x168] sm:$0xff]  ;;  %v28_v29 = vld [vmem:[%s1567_s0 + $0x70] sm:$0xff] }
   0xb   :  { %v60_v30 = vld [vmem:[%s1567_s0 + $0x170] sm:$0xff]  ;;  %v29_v31 = vld [vmem:[%s1567_s0 + $0x78] sm:$0xff]  ;;  %v30_v33 = vld [vmem:[%s1567_s0 + $0x80] sm:$0xff] }
   0xc   :  { %v61_v32 = vld [vmem:[%s1567_s0 + $0x178] sm:$0xff]  ;;  %v62_v34 = vld [vmem:[%s1567_s0 + $0x180] sm:$0xff]  ;;  %v31_v35 = vld [vmem:[%s1567_s0 + $0x88] sm:$0xff] }
   0xd   :  { %935 = vmatmul.mubr.msk.f32.gmra.mrb[4].mxu0 %vm86_vm0, %v19_v11  ;;  %983 = vmatmul.mubr.msk.f32.gmra.mrb[4].mxu1 %vm86_vm0, %v51_v12  ;;  %v63_v36 = vld [vmem:[%s1567_s0 + $0x188] sm:$0xff]  ;;  %v32_v37 = vld [vmem:[%s1567_s0 + $0x90] sm:$0xff]  ;;  %v33_v39 = vld [vmem:[%s1567_s0 + $0x98] sm:$0xff] }
   0xe   :  { %937 = vmatprep.mubr.msk.f32.mxu0 %vm86_vm0, %v20_v13  ;;  %985 = vmatprep.mubr.msk.f32.mxu1 %vm86_vm0, %v52_v14  ;;  %v64_v38 = vld [vmem:[%s1567_s0 + $0x190] sm:$0xff]  ;;  %v65_v40 = vld [vmem:[%s1567_s0 + $0x198] sm:$0xff]  ;;  %v34_v41 = vld [vmem:[%s1567_s0 + $0xa0] sm:$0xff] }
   0xf   :  { %v66_v42 = vld [vmem:[%s1567_s0 + $0x1a0] sm:$0xff]  ;;  %v35_v43 = vld [vmem:[%s1567_s0 + $0xa8] sm:$0xff]  ;;  %v36_v45 = vld [vmem:[%s1567_s0 + $0xb0] sm:$0xff] }
  0x10   :  { %v67_v44 = vld [vmem:[%s1567_s0 + $0x1a8] sm:$0xff]  ;;  %v68_v46 = vld [vmem:[%s1567_s0 + $0x1b0] sm:$0xff]  ;;  %v37_v47 = vld [vmem:[%s1567_s0 + $0xb8] sm:$0xff] }
  0x11   :  { %938 = vmatmul.mubr.msk.f32.gmra.mrb[6].mxu0 %vm86_vm0, %v21_v15  ;;  %986 = vmatmul.mubr.msk.f32.gmra.mrb[6].mxu1 %vm86_vm0, %v53_v16  ;;  %v69_v48 = vld [vmem:[%s1567_s0 + $0x1b8] sm:$0xff]  ;;  %v38_v49 = vld [vmem:[%s1567_s0 + $0xc0] sm:$0xff]  ;;  %v39_v51 = vld [vmem:[%s1567_s0 + $0xc8] sm:$0xff] }
  0x12   :  { %940 = vmatprep.mubr.msk.f32.mxu0 %vm86_vm0, %v22_v17  ;;  %988 = vmatprep.mubr.msk.f32.mxu1 %vm86_vm0, %v54_v18  ;;  %v70_v50 = vld [vmem:[%s1567_s0 + $0x1c0] sm:$0xff]  ;;  %v71_v52 = vld [vmem:[%s1567_s0 + $0x1c8] sm:$0xff]  ;;  %v40_v53 = vld [vmem:[%s1567_s0 + $0xd0] sm:$0xff] }
  0x13   :  { %v72_v54 = vld [vmem:[%s1567_s0 + $0x1d0] sm:$0xff]  ;;  %v41_v55 = vld [vmem:[%s1567_s0 + $0xd8] sm:$0xff]  ;;  %v42_v57 = vld [vmem:[%s1567_s0 + $0xe0] sm:$0xff] }
  0x14   :  { %v73_v56 = vld [vmem:[%s1567_s0 + $0x1d8] sm:$0xff]  ;;  %v74_v58 = vld [vmem:[%s1567_s0 + $0x1e0] sm:$0xff]  ;;  %v43_v59 = vld [vmem:[%s1567_s0 + $0xe8] sm:$0xff] }
  0x15   :  { %941 = vmatmul.mubr.msk.f32.gmra.mrb[8].mxu0 %vm86_vm0, %v23_v19  ;;  %989 = vmatmul.mubr.msk.f32.gmra.mrb[8].mxu1 %vm86_vm0, %v55_v20  ;;  %v75_v60 = vld [vmem:[%s1567_s0 + $0x1e8] sm:$0xff]  ;;  %v44_v61 = vld [vmem:[%s1567_s0 + $0xf0] sm:$0xff]  ;;  %v45_v63 = vld [vmem:[%s1567_s0 + $0xf8] sm:$0xff] }
  0x16   :  { %943 = vmatprep.mubr.msk.f32.mxu0 %vm86_vm0, %v24_v21  ;;  %991 = vmatprep.mubr.msk.f32.mxu1 %vm86_vm0, %v56_v22  ;;  %v76_v62 = vld [vmem:[%s1567_s0 + $0x1f0] sm:$0xff]  ;;  %v77_v0 = vld [vmem:[%s1567_s0 + $0x1f8] sm:$0xff]  ;;  %v1308_v1 = vld [vmem:[%s1568_s2] ss:$0 sm:$0xff] }
  0x19   :  { %944 = vmatmul.mubr.msk.f32.gmra.mrb[10].mxu0 %vm86_vm0, %v25_v23  ;;  %992 = vmatmul.mubr.msk.f32.gmra.mrb[10].mxu1 %vm86_vm0, %v57_v24 }
  0x1a   :  { %946 = vmatprep.mubr.msk.f32.mxu0 %vm86_vm0, %v26_v25  ;;  %994 = vmatprep.mubr.msk.f32.mxu1 %vm86_vm0, %v58_v26 }
  0x1d   :  { %947 = vmatmul.mubr.msk.f32.gmra.mrb[12].mxu0 %vm86_vm0, %v27_v27  ;;  %995 = vmatmul.mubr.msk.f32.gmra.mrb[12].mxu1 %vm86_vm0, %v59_v28 }
  0x1e   :  { %949 = vmatprep.mubr.msk.f32.mxu0 %vm86_vm0, %v28_v29  ;;  %997 = vmatprep.mubr.msk.f32.mxu1 %vm86_vm0, %v60_v30 }
  0x21   :  { %950 = vmatmul.mubr.msk.f32.gmra.mrb[14].mxu0 %vm86_vm0, %v29_v31  ;;  %998 = vmatmul.mubr.msk.f32.gmra.mrb[14].mxu1 %vm86_vm0, %v61_v32 }
  0x22   :  { %952 = vmatprep.mubr.msk.f32.mxu0 %vm86_vm0, %v30_v33  ;;  %1000 = vmatprep.mubr.msk.f32.mxu1 %vm86_vm0, %v62_v34 }
  0x25   :  { %953 = vmatmul.mubr.msk.f32.gmra.mrb[16].mxu0 %vm86_vm0, %v31_v35  ;;  %1001 = vmatmul.mubr.msk.f32.gmra.mrb[16].mxu1 %vm86_vm0, %v63_v36 }
  0x26   :  { %955 = vmatprep.mubr.msk.f32.mxu0 %vm86_vm0, %v32_v37  ;;  %1003 = vmatprep.mubr.msk.f32.mxu1 %vm86_vm0, %v64_v38 }
  0x29   :  { %956 = vmatmul.mubr.msk.f32.gmra.mrb[18].mxu0 %vm86_vm0, %v33_v39  ;;  %1004 = vmatmul.mubr.msk.f32.gmra.mrb[18].mxu1 %vm86_vm0, %v65_v40 }
  0x2a   :  { %958 = vmatprep.mubr.msk.f32.mxu0 %vm86_vm0, %v34_v41  ;;  %1006 = vmatprep.mubr.msk.f32.mxu1 %vm86_vm0, %v66_v42 }
  0x2d   :  { %959 = vmatmul.mubr.msk.f32.gmra.mrb[20].mxu0 %vm86_vm0, %v35_v43  ;;  %1007 = vmatmul.mubr.msk.f32.gmra.mrb[20].mxu1 %vm86_vm0, %v67_v44 }
  0x2e   :  { %961 = vmatprep.mubr.msk.f32.mxu0 %vm86_vm0, %v36_v45  ;;  %1009 = vmatprep.mubr.msk.f32.mxu1 %vm86_vm0, %v68_v46 }
  0x31   :  { %962 = vmatmul.mubr.msk.f32.gmra.mrb[22].mxu0 %vm86_vm0, %v37_v47  ;;  %1010 = vmatmul.mubr.msk.f32.gmra.mrb[22].mxu1 %vm86_vm0, %v69_v48 }
  0x32   :  { %964 = vmatprep.mubr.msk.f32.mxu0 %vm86_vm0, %v38_v49  ;;  %1012 = vmatprep.mubr.msk.f32.mxu1 %vm86_vm0, %v70_v50 }
  0x35   :  { %965 = vmatmul.mubr.msk.f32.gmra.mrb[24].mxu0 %vm86_vm0, %v39_v51  ;;  %1013 = vmatmul.mubr.msk.f32.gmra.mrb[24].mxu1 %vm86_vm0, %v71_v52 }
  0x36   :  { %967 = vmatprep.mubr.msk.f32.mxu0 %vm86_vm0, %v40_v53  ;;  %1015 = vmatprep.mubr.msk.f32.mxu1 %vm86_vm0, %v72_v54 }
  0x39   :  { %968 = vmatmul.mubr.msk.f32.gmra.mrb[26].mxu0 %vm86_vm0, %v41_v55  ;;  %1016 = vmatmul.mubr.msk.f32.gmra.mrb[26].mxu1 %vm86_vm0, %v73_v56 }
  0x3a   :  { %970 = vmatprep.mubr.msk.f32.mxu0 %vm86_vm0, %v42_v57  ;;  %1018 = vmatprep.mubr.msk.f32.mxu1 %vm86_vm0, %v74_v58 }
  0x3d   :  { %971 = vmatmul.mubr.msk.f32.gmra.mrb[28].mxu0 %vm86_vm0, %v43_v59  ;;  %1019 = vmatmul.mubr.msk.f32.gmra.mrb[28].mxu1 %vm86_vm0, %v75_v60 }
  0x3e   :  { %973 = vmatprep.mubr.msk.f32.mxu0 %vm86_vm0, %v44_v61  ;;  %1021 = vmatprep.mubr.msk.f32.mxu1 %vm86_vm0, %v76_v62 }
  0x41   :  { %974 = vmatmul.mubr.msk.f32.gmra.mrb[30].mxu0 %vm86_vm0, %v45_v63  ;;  %1022 = vmatmul.mubr.msk.f32.gmra.mrb[30].mxu1 %vm86_vm0, %v77_v0 }
  0xd8   :  { %v930_v2 = vpop.f32.mrb[0].mxu0  ;;  %v978_v3 = vpop.f32.mrb[0].mxu1 }
  0xd9   :  { %v351_v4 = vadd.f32 %v930_v2, %v1308_v1  ;;  %v511_v5 = vadd.f32 %v978_v3, %v1308_v1  ;;  %v345_v6 = vpop.f32.mrb[1].mxu0  ;;  %v505_v7 = vpop.f32.mrb[1].mxu1 }
  0xda   :  { %v346_v8 = vadd.f32 %v1308_v1, %v345_v6  ;;  %v506_v9 = vadd.f32 %v1308_v1, %v505_v7 }
  0xdb   :  { %v665_v10 = vmax.f32 %v351_v4, 0.0  ;;  %v697_v11 = vmax.f32 %v511_v5, 0.0 }
  0xdc   :  { %v664_v12 = vmax.f32 %v346_v8, 0.0  ;;  %v696_v13 = vmax.f32 %v506_v9, 0.0  ;;  %v933_v14 = vpop.f32.mrb[2].mxu0  ;;  %v981_v15 = vpop.f32.mrb[2].mxu1 }
  0xdd   :  { %729 = vst [vmem:[%s1569_s3 + $0x8] sm:$0xff] %v665_v10  ;;  %761 = vst [vmem:[%s1569_s3 + $0x108] sm:$0xff] %v697_v11  ;;  %v361_v16 = vadd.f32 %v933_v14, %v1308_v1  ;;  %v521_v17 = vadd.f32 %v981_v15, %v1308_v1  ;;  %v355_v18 = vpop.f32.mrb[3].mxu0  ;;  %v515_v19 = vpop.f32.mrb[3].mxu1 }
  0xde   :  { %728 = vst [vmem:[%s1569_s3] sm:$0xff] %v664_v12  ;;  %760 = vst [vmem:[%s1569_s3 + $0x100] sm:$0xff] %v696_v13  ;;  %v356_v20 = vadd.f32 %v1308_v1, %v355_v18  ;;  %v516_v21 = vadd.f32 %v1308_v1, %v515_v19 }
  0xdf   :  { %v667_v22 = vmax.f32 %v361_v16, 0.0  ;;  %v699_v23 = vmax.f32 %v521_v17, 0.0 }
  0xe0   :  { %v666_v24 = vmax.f32 %v356_v20, 0.0  ;;  %v698_v25 = vmax.f32 %v516_v21, 0.0  ;;  %v936_v26 = vpop.f32.mrb[4].mxu0  ;;  %v984_v27 = vpop.f32.mrb[4].mxu1 }
  0xe1   :  { %731 = vst [vmem:[%s1569_s3 + $0x18] sm:$0xff] %v667_v22  ;;  %763 = vst [vmem:[%s1569_s3 + $0x118] sm:$0xff] %v699_v23  ;;  %v371_v28 = vadd.f32 %v936_v26, %v1308_v1  ;;  %v531_v29 = vadd.f32 %v984_v27, %v1308_v1  ;;  %v365_v30 = vpop.f32.mrb[5].mxu0  ;;  %v525_v31 = vpop.f32.mrb[5].mxu1 }
  0xe2   :  { %730 = vst [vmem:[%s1569_s3 + $0x10] sm:$0xff] %v666_v24  ;;  %762 = vst [vmem:[%s1569_s3 + $0x110] sm:$0xff] %v698_v25  ;;  %v366_v32 = vadd.f32 %v1308_v1, %v365_v30  ;;  %v526_v33 = vadd.f32 %v1308_v1, %v525_v31 }
  0xe3   :  { %v669_v34 = vmax.f32 %v371_v28, 0.0  ;;  %v701_v35 = vmax.f32 %v531_v29, 0.0 }
  0xe4   :  { %v668_v36 = vmax.f32 %v366_v32, 0.0  ;;  %v700_v37 = vmax.f32 %v526_v33, 0.0  ;;  %v939_v38 = vpop.f32.mrb[6].mxu0  ;;  %v987_v39 = vpop.f32.mrb[6].mxu1 }
  0xe5   :  { %733 = vst [vmem:[%s1569_s3 + $0x28] sm:$0xff] %v669_v34  ;;  %765 = vst [vmem:[%s1569_s3 + $0x128] sm:$0xff] %v701_v35  ;;  %v381_v40 = vadd.f32 %v939_v38, %v1308_v1  ;;  %v541_v41 = vadd.f32 %v987_v39, %v1308_v1  ;;  %v375_v42 = vpop.f32.mrb[7].mxu0  ;;  %v535_v43 = vpop.f32.mrb[7].mxu1 }
  0xe6   :  { %732 = vst [vmem:[%s1569_s3 + $0x20] sm:$0xff] %v668_v36  ;;  %764 = vst [vmem:[%s1569_s3 + $0x120] sm:$0xff] %v700_v37  ;;  %v376_v44 = vadd.f32 %v1308_v1, %v375_v42  ;;  %v536_v45 = vadd.f32 %v1308_v1, %v535_v43 }
  0xe7   :  { %v671_v46 = vmax.f32 %v381_v40, 0.0  ;;  %v703_v47 = vmax.f32 %v541_v41, 0.0 }
  0xe8   :  { %v670_v48 = vmax.f32 %v376_v44, 0.0  ;;  %v702_v49 = vmax.f32 %v536_v45, 0.0  ;;  %v942_v50 = vpop.f32.mrb[8].mxu0  ;;  %v990_v51 = vpop.f32.mrb[8].mxu1 }
  0xe9   :  { %735 = vst [vmem:[%s1569_s3 + $0x38] sm:$0xff] %v671_v46  ;;  %767 = vst [vmem:[%s1569_s3 + $0x138] sm:$0xff] %v703_v47  ;;  %v391_v52 = vadd.f32 %v942_v50, %v1308_v1  ;;  %v551_v53 = vadd.f32 %v990_v51, %v1308_v1  ;;  %v385_v54 = vpop.f32.mrb[9].mxu0  ;;  %v545_v55 = vpop.f32.mrb[9].mxu1 }
  0xea   :  { %734 = vst [vmem:[%s1569_s3 + $0x30] sm:$0xff] %v670_v48  ;;  %766 = vst [vmem:[%s1569_s3 + $0x130] sm:$0xff] %v702_v49  ;;  %v386_v56 = vadd.f32 %v1308_v1, %v385_v54  ;;  %v546_v57 = vadd.f32 %v1308_v1, %v545_v55 }
  0xeb   :  { %v673_v58 = vmax.f32 %v391_v52, 0.0  ;;  %v705_v59 = vmax.f32 %v551_v53, 0.0 }
  0xec   :  { %v672_v60 = vmax.f32 %v386_v56, 0.0  ;;  %v704_v61 = vmax.f32 %v546_v57, 0.0  ;;  %v945_v62 = vpop.f32.mrb[10].mxu0  ;;  %v993_v63 = vpop.f32.mrb[10].mxu1 }
  0xed   :  { %737 = vst [vmem:[%s1569_s3 + $0x48] sm:$0xff] %v673_v58  ;;  %769 = vst [vmem:[%s1569_s3 + $0x148] sm:$0xff] %v705_v59  ;;  %v401_v0 = vadd.f32 %v945_v62, %v1308_v1  ;;  %v561_v2 = vadd.f32 %v993_v63, %v1308_v1  ;;  %v395_v3 = vpop.f32.mrb[11].mxu0  ;;  %v555_v4 = vpop.f32.mrb[11].mxu1 }
  0xee   :  { %736 = vst [vmem:[%s1569_s3 + $0x40] sm:$0xff] %v672_v60  ;;  %768 = vst [vmem:[%s1569_s3 + $0x140] sm:$0xff] %v704_v61  ;;  %v396_v5 = vadd.f32 %v1308_v1, %v395_v3  ;;  %v556_v6 = vadd.f32 %v1308_v1, %v555_v4 }
  0xef   :  { %v675_v7 = vmax.f32 %v401_v0, 0.0  ;;  %v707_v8 = vmax.f32 %v561_v2, 0.0 }
  0xf0   :  { %v674_v9 = vmax.f32 %v396_v5, 0.0  ;;  %v706_v10 = vmax.f32 %v556_v6, 0.0  ;;  %v948_v11 = vpop.f32.mrb[12].mxu0  ;;  %v996_v12 = vpop.f32.mrb[12].mxu1 }
  0xf1   :  { %739 = vst [vmem:[%s1569_s3 + $0x58] sm:$0xff] %v675_v7  ;;  %771 = vst [vmem:[%s1569_s3 + $0x158] sm:$0xff] %v707_v8  ;;  %v411_v13 = vadd.f32 %v948_v11, %v1308_v1  ;;  %v571_v14 = vadd.f32 %v996_v12, %v1308_v1  ;;  %v405_v15 = vpop.f32.mrb[13].mxu0  ;;  %v565_v16 = vpop.f32.mrb[13].mxu1 }
  0xf2   :  { %738 = vst [vmem:[%s1569_s3 + $0x50] sm:$0xff] %v674_v9  ;;  %770 = vst [vmem:[%s1569_s3 + $0x150] sm:$0xff] %v706_v10  ;;  %v406_v17 = vadd.f32 %v1308_v1, %v405_v15  ;;  %v566_v18 = vadd.f32 %v1308_v1, %v565_v16 }
  0xf3   :  { %v677_v19 = vmax.f32 %v411_v13, 0.0  ;;  %v709_v20 = vmax.f32 %v571_v14, 0.0 }
  0xf4   :  { %v676_v21 = vmax.f32 %v406_v17, 0.0  ;;  %v708_v22 = vmax.f32 %v566_v18, 0.0  ;;  %v951_v23 = vpop.f32.mrb[14].mxu0  ;;  %v999_v24 = vpop.f32.mrb[14].mxu1 }
  0xf5   :  { %741 = vst [vmem:[%s1569_s3 + $0x68] sm:$0xff] %v677_v19  ;;  %773 = vst [vmem:[%s1569_s3 + $0x168] sm:$0xff] %v709_v20  ;;  %v421_v25 = vadd.f32 %v951_v23, %v1308_v1  ;;  %v581_v26 = vadd.f32 %v999_v24, %v1308_v1  ;;  %v415_v27 = vpop.f32.mrb[15].mxu0  ;;  %v575_v28 = vpop.f32.mrb[15].mxu1 }
  0xf6   :  { %740 = vst [vmem:[%s1569_s3 + $0x60] sm:$0xff] %v676_v21  ;;  %772 = vst [vmem:[%s1569_s3 + $0x160] sm:$0xff] %v708_v22  ;;  %v416_v29 = vadd.f32 %v1308_v1, %v415_v27  ;;  %v576_v30 = vadd.f32 %v1308_v1, %v575_v28 }
  0xf7   :  { %v679_v31 = vmax.f32 %v421_v25, 0.0  ;;  %v711_v32 = vmax.f32 %v581_v26, 0.0 }
  0xf8   :  { %v678_v33 = vmax.f32 %v416_v29, 0.0  ;;  %v710_v34 = vmax.f32 %v576_v30, 0.0  ;;  %v954_v35 = vpop.f32.mrb[16].mxu0  ;;  %v1002_v36 = vpop.f32.mrb[16].mxu1 }
  0xf9   :  { %743 = vst [vmem:[%s1569_s3 + $0x78] sm:$0xff] %v679_v31  ;;  %775 = vst [vmem:[%s1569_s3 + $0x178] sm:$0xff] %v711_v32  ;;  %v431_v37 = vadd.f32 %v954_v35, %v1308_v1  ;;  %v591_v38 = vadd.f32 %v1002_v36, %v1308_v1  ;;  %v425_v39 = vpop.f32.mrb[17].mxu0  ;;  %v585_v40 = vpop.f32.mrb[17].mxu1 }
  0xfa   :  { %742 = vst [vmem:[%s1569_s3 + $0x70] sm:$0xff] %v678_v33  ;;  %774 = vst [vmem:[%s1569_s3 + $0x170] sm:$0xff] %v710_v34  ;;  %v426_v41 = vadd.f32 %v1308_v1, %v425_v39  ;;  %v586_v42 = vadd.f32 %v1308_v1, %v585_v40 }
  0xfb   :  { %v681_v43 = vmax.f32 %v431_v37, 0.0  ;;  %v713_v44 = vmax.f32 %v591_v38, 0.0 }
  0xfc   :  { %v680_v45 = vmax.f32 %v426_v41, 0.0  ;;  %v712_v46 = vmax.f32 %v586_v42, 0.0  ;;  %v957_v47 = vpop.f32.mrb[18].mxu0  ;;  %v1005_v48 = vpop.f32.mrb[18].mxu1 }
  0xfd   :  { %745 = vst [vmem:[%s1569_s3 + $0x88] sm:$0xff] %v681_v43  ;;  %777 = vst [vmem:[%s1569_s3 + $0x188] sm:$0xff] %v713_v44  ;;  %v441_v49 = vadd.f32 %v957_v47, %v1308_v1  ;;  %v601_v50 = vadd.f32 %v1005_v48, %v1308_v1  ;;  %v435_v51 = vpop.f32.mrb[19].mxu0  ;;  %v595_v52 = vpop.f32.mrb[19].mxu1 }
  0xfe   :  { %744 = vst [vmem:[%s1569_s3 + $0x80] sm:$0xff] %v680_v45  ;;  %776 = vst [vmem:[%s1569_s3 + $0x180] sm:$0xff] %v712_v46  ;;  %v436_v53 = vadd.f32 %v1308_v1, %v435_v51  ;;  %v596_v54 = vadd.f32 %v1308_v1, %v595_v52 }
  0xff   :  { %v683_v55 = vmax.f32 %v441_v49, 0.0  ;;  %v715_v56 = vmax.f32 %v601_v50, 0.0 }
 0x100   :  { %v682_v57 = vmax.f32 %v436_v53, 0.0  ;;  %v714_v58 = vmax.f32 %v596_v54, 0.0  ;;  %v960_v59 = vpop.f32.mrb[20].mxu0  ;;  %v1008_v60 = vpop.f32.mrb[20].mxu1 }
 0x101   :  { %747 = vst [vmem:[%s1569_s3 + $0x98] sm:$0xff] %v683_v55  ;;  %779 = vst [vmem:[%s1569_s3 + $0x198] sm:$0xff] %v715_v56  ;;  %v451_v61 = vadd.f32 %v960_v59, %v1308_v1  ;;  %v611_v62 = vadd.f32 %v1008_v60, %v1308_v1  ;;  %v445_v63 = vpop.f32.mrb[21].mxu0  ;;  %v605_v0 = vpop.f32.mrb[21].mxu1 }
 0x102   :  { %746 = vst [vmem:[%s1569_s3 + $0x90] sm:$0xff] %v682_v57  ;;  %778 = vst [vmem:[%s1569_s3 + $0x190] sm:$0xff] %v714_v58  ;;  %v446_v2 = vadd.f32 %v1308_v1, %v445_v63  ;;  %v606_v3 = vadd.f32 %v1308_v1, %v605_v0 }
 0x103   :  { %v685_v4 = vmax.f32 %v451_v61, 0.0  ;;  %v717_v5 = vmax.f32 %v611_v62, 0.0 }
 0x104   :  { %v684_v6 = vmax.f32 %v446_v2, 0.0  ;;  %v716_v7 = vmax.f32 %v606_v3, 0.0  ;;  %v963_v8 = vpop.f32.mrb[22].mxu0  ;;  %v1011_v9 = vpop.f32.mrb[22].mxu1 }
 0x105   :  { %749 = vst [vmem:[%s1569_s3 + $0xa8] sm:$0xff] %v685_v4  ;;  %781 = vst [vmem:[%s1569_s3 + $0x1a8] sm:$0xff] %v717_v5  ;;  %v461_v10 = vadd.f32 %v963_v8, %v1308_v1  ;;  %v621_v11 = vadd.f32 %v1011_v9, %v1308_v1  ;;  %v455_v12 = vpop.f32.mrb[23].mxu0  ;;  %v615_v13 = vpop.f32.mrb[23].mxu1 }
 0x106   :  { %748 = vst [vmem:[%s1569_s3 + $0xa0] sm:$0xff] %v684_v6  ;;  %780 = vst [vmem:[%s1569_s3 + $0x1a0] sm:$0xff] %v716_v7  ;;  %v456_v14 = vadd.f32 %v1308_v1, %v455_v12  ;;  %v616_v15 = vadd.f32 %v1308_v1, %v615_v13 }
 0x107   :  { %v687_v16 = vmax.f32 %v461_v10, 0.0  ;;  %v719_v17 = vmax.f32 %v621_v11, 0.0 }
 0x108   :  { %v686_v18 = vmax.f32 %v456_v14, 0.0  ;;  %v718_v19 = vmax.f32 %v616_v15, 0.0  ;;  %v966_v20 = vpop.f32.mrb[24].mxu0  ;;  %v1014_v21 = vpop.f32.mrb[24].mxu1 }
 0x109   :  { %751 = vst [vmem:[%s1569_s3 + $0xb8] sm:$0xff] %v687_v16  ;;  %783 = vst [vmem:[%s1569_s3 + $0x1b8] sm:$0xff] %v719_v17  ;;  %v471_v22 = vadd.f32 %v966_v20, %v1308_v1  ;;  %v631_v23 = vadd.f32 %v1014_v21, %v1308_v1  ;;  %v465_v24 = vpop.f32.mrb[25].mxu0  ;;  %v625_v25 = vpop.f32.mrb[25].mxu1 }
 0x10a   :  { %750 = vst [vmem:[%s1569_s3 + $0xb0] sm:$0xff] %v686_v18  ;;  %782 = vst [vmem:[%s1569_s3 + $0x1b0] sm:$0xff] %v718_v19  ;;  %v466_v26 = vadd.f32 %v1308_v1, %v465_v24  ;;  %v626_v27 = vadd.f32 %v1308_v1, %v625_v25 }
 0x10b   :  { %v689_v28 = vmax.f32 %v471_v22, 0.0  ;;  %v721_v29 = vmax.f32 %v631_v23, 0.0 }
 0x10c   :  { %v688_v30 = vmax.f32 %v466_v26, 0.0  ;;  %v720_v31 = vmax.f32 %v626_v27, 0.0  ;;  %v969_v32 = vpop.f32.mrb[26].mxu0  ;;  %v1017_v33 = vpop.f32.mrb[26].mxu1 }
 0x10d   :  { %753 = vst [vmem:[%s1569_s3 + $0xc8] sm:$0xff] %v689_v28  ;;  %785 = vst [vmem:[%s1569_s3 + $0x1c8] sm:$0xff] %v721_v29  ;;  %v481_v34 = vadd.f32 %v969_v32, %v1308_v1  ;;  %v641_v35 = vadd.f32 %v1017_v33, %v1308_v1  ;;  %v475_v36 = vpop.f32.mrb[27].mxu0  ;;  %v635_v37 = vpop.f32.mrb[27].mxu1 }
 0x10e   :  { %752 = vst [vmem:[%s1569_s3 + $0xc0] sm:$0xff] %v688_v30  ;;  %784 = vst [vmem:[%s1569_s3 + $0x1c0] sm:$0xff] %v720_v31  ;;  %v476_v38 = vadd.f32 %v1308_v1, %v475_v36  ;;  %v636_v39 = vadd.f32 %v1308_v1, %v635_v37 }
 0x10f   :  { %v691_v40 = vmax.f32 %v481_v34, 0.0  ;;  %v723_v41 = vmax.f32 %v641_v35, 0.0 }
 0x110   :  { %v690_v42 = vmax.f32 %v476_v38, 0.0  ;;  %v722_v43 = vmax.f32 %v636_v39, 0.0  ;;  %v972_v44 = vpop.f32.mrb[28].mxu0  ;;  %v1020_v45 = vpop.f32.mrb[28].mxu1 }
 0x111   :  { %755 = vst [vmem:[%s1569_s3 + $0xd8] sm:$0xff] %v691_v40  ;;  %787 = vst [vmem:[%s1569_s3 + $0x1d8] sm:$0xff] %v723_v41  ;;  %v491_v46 = vadd.f32 %v972_v44, %v1308_v1  ;;  %v651_v47 = vadd.f32 %v1020_v45, %v1308_v1  ;;  %v485_v48 = vpop.f32.mrb[29].mxu0  ;;  %v645_v49 = vpop.f32.mrb[29].mxu1 }
 0x112   :  { %754 = vst [vmem:[%s1569_s3 + $0xd0] sm:$0xff] %v690_v42  ;;  %786 = vst [vmem:[%s1569_s3 + $0x1d0] sm:$0xff] %v722_v43  ;;  %v486_v50 = vadd.f32 %v1308_v1, %v485_v48  ;;  %v646_v51 = vadd.f32 %v1308_v1, %v645_v49 }
 0x113   :  { %v693_v52 = vmax.f32 %v491_v46, 0.0  ;;  %v725_v53 = vmax.f32 %v651_v47, 0.0 }
 0x114   :  { %v692_v54 = vmax.f32 %v486_v50, 0.0  ;;  %v724_v55 = vmax.f32 %v646_v51, 0.0  ;;  %v975_v56 = vpop.f32.mrb[30].mxu0  ;;  %v1023_v57 = vpop.f32.mrb[30].mxu1 }
 0x115   :  { %757 = vst [vmem:[%s1569_s3 + $0xe8] sm:$0xff] %v693_v52  ;;  %789 = vst [vmem:[%s1569_s3 + $0x1e8] sm:$0xff] %v725_v53  ;;  %v501_v58 = vadd.f32 %v975_v56, %v1308_v1  ;;  %v661_v59 = vadd.f32 %v1023_v57, %v1308_v1  ;;  %v495_v60 = vpop.f32.mrb[31].mxu0  ;;  %v655_v61 = vpop.f32.mrb[31].mxu1 }
 0x116   :  { %756 = vst [vmem:[%s1569_s3 + $0xe0] sm:$0xff] %v692_v54  ;;  %788 = vst [vmem:[%s1569_s3 + $0x1e0] sm:$0xff] %v724_v55  ;;  %v496_v62 = vadd.f32 %v1308_v1, %v495_v60  ;;  %v656_v63 = vadd.f32 %v1308_v1, %v655_v61 }
 0x117   :  { %v695_v0 = vmax.f32 %v501_v58, 0.0  ;;  %v727_v2 = vmax.f32 %v661_v59, 0.0 }
 0x118   :  { %v694_v3 = vmax.f32 %v496_v62, 0.0  ;;  %v726_v4 = vmax.f32 %v656_v63, 0.0 }
 0x119   :  { %759 = vst [vmem:[%s1569_s3 + $0xf8] sm:$0xff] %v695_v0  ;;  %791 = vst [vmem:[%s1569_s3 + $0x1f8] sm:$0xff] %v727_v2 }
 0x11a   :  { %758 = vst [vmem:[%s1569_s3 + $0xf0] sm:$0xff] %v694_v3  ;;  %790 = vst [vmem:[%s1569_s3 + $0x1f0] sm:$0xff] %v726_v4 }

// kernel: ssd_forward.35
= control target key start
LH: loop header
LB: loop body
LE: loop exit
PB: predicated region body
PF: predicated region fallthrough
CT: control target
= control target key end

     0   :  { %vm46_vm0 = vcmask 588800   ;;  %s548_s1 = inlined_call_operand.vmem [shape: f32[72,128], index: 1, kind: input, shape index: {}]   ;;  %s549_s0 = inlined_call_operand.vmem [shape: f32[128,72], index: 0, kind: input, shape index: {}]   ;;  %s550_s2 = inlined_call_operand.vmem [shape: f32[1,128], index: 2, kind: input, shape index: {}]   ;;  %s551_s3 = inlined_call_operand.vmem [shape: f32[128,128], index: 3, kind: output, shape index: {}]  }
   0x1   :  { %v30_v0 = vld [vmem:[%s548_s1] sm:$0xff]  ;;  %v31_v1 = vld [vmem:[%s548_s1 + $0x8] sm:$0xff]  ;;  %v32_v2 = vld [vmem:[%s548_s1 + $0x10] sm:$0xff] }
   0x2   :  { %v360_v3 = vpack.c.bf16 %v31_v1, %v30_v0  ;;  %v33_v4 = vld [vmem:[%s548_s1 + $0x18] sm:$0xff]  ;;  %v34_v6 = vld [vmem:[%s548_s1 + $0x20] sm:$0xff]  ;;  %v35_v7 = vld [vmem:[%s548_s1 + $0x28] sm:$0xff] }
   0x3   :  { %v364_v5 = vpack.c.bf16 %v33_v4, %v32_v2  ;;  %v14_v8 = vld [vmem:[%s549_s0] sm:$0xff]  ;;  %v368_v10 = vpack.c.bf16 %v35_v7, %v34_v6  ;;  %v36_v11 = vld [vmem:[%s548_s1 + $0x30] sm:$0xff]  ;;  %v37_v12 = vld [vmem:[%s548_s1 + $0x38] sm:$0xff] }
   0x4   :  { %361 = vmatprep.subr.bf16.mxu0 %v360_v3  ;;  %376 = vmatprep.subr.bf16.mxu1 %v360_v3  ;;  %v22_v9 = vld [vmem:[%s549_s0 + $0x40] sm:$0xff]  ;;  %v372_v13 = vpack.c.bf16 %v37_v12, %v36_v11  ;;  %v15_v15 = vld [vmem:[%s549_s0 + $0x8] sm:$0xff]  ;;  %v16_v17 = vld [vmem:[%s549_s0 + $0x10] sm:$0xff] }
   0x5   :  { %363 = vmatpush3.bf16.msra.mxu0 %v360_v3  ;;  %381 = vmatpush3.bf16.msra.mxu1 %v360_v3  ;;  %v38_v14 = vld [vmem:[%s548_s1 + $0x40] sm:$0xff]  ;;  %v23_v16 = vld [vmem:[%s549_s0 + $0x48] sm:$0xff]  ;;  %v24_v18 = vld [vmem:[%s549_s0 + $0x50] sm:$0xff] }
   0x6   :  { %365 = vmatprep.subr.bf16.mxu0 %v364_v5  ;;  %377 = vmatprep.subr.bf16.mxu1 %v364_v5  ;;  %v17_v19 = vld [vmem:[%s549_s0 + $0x18] sm:$0xff]  ;;  %v18_v21 = vld [vmem:[%s549_s0 + $0x20] sm:$0xff]  ;;  %v19_v23 = vld [vmem:[%s549_s0 + $0x28] sm:$0xff] }
   0x7   :  { %336 = vmatprep.mubr.msk.f32.mxu0 %vm46_vm0, %v14_v8  ;;  %348 = vmatprep.mubr.msk.f32.mxu1 %vm46_vm0, %v22_v9  ;;  %v25_v20 = vld [vmem:[%s549_s0 + $0x58] sm:$0xff]  ;;  %v26_v22 = vld [vmem:[%s549_s0 + $0x60] sm:$0xff]  ;;  %v27_v24 = vld [vmem:[%s549_s0 + $0x68] sm:$0xff] }
   0x8   :  { %v20_v25 = vld [vmem:[%s549_s0 + $0x30] sm:$0xff]  ;;  %v21_v27 = vld [vmem:[%s549_s0 + $0x38] sm:$0xff]  ;;  %v276_v29 = vld [vmem:[%s550_s2] ss:$0 sm:$0xff] }
   0x9   :  { %367 = vmatpush3.bf16.msra.mxu0 %v364_v5  ;;  %382 = vmatpush3.bf16.msra.mxu1 %v364_v5  ;;  %v28_v26 = vld [vmem:[%s549_s0 + $0x70] sm:$0xff]  ;;  %v29_v28 = vld [vmem:[%s549_s0 + $0x78] sm:$0xff] }
   0xa   :  { %369 = vmatprep.subr.bf16.mxu0 %v368_v10  ;;  %378 = vmatprep.subr.bf16.mxu1 %v368_v10 }
   0xd   :  { %371 = vmatpush3.bf16.msra.mxu0 %v368_v10  ;;  %383 = vmatpush3.bf16.msra.mxu1 %v368_v10 }
   0xe   :  { %373 = vmatprep.subr.bf16.mxu0 %v372_v13  ;;  %379 = vmatprep.subr.bf16.mxu1 %v372_v13 }
  0x11   :  { %375 = vmatpush3.bf16.msra.mxu0 %v372_v13  ;;  %384 = vmatpush3.bf16.msra.mxu1 %v372_v13 }
  0x12   :  { %334 = vmatprep.subr.mxu0 %v38_v14  ;;  %380 = vmatprep.subr.mxu1 %v38_v14 }
  0x15   :  { %335 = vmatpush3.msra.mxu0 %v38_v14  ;;  %385 = vmatpush3.msra.mxu1 %v38_v14 }
  0x16   :  { %337 = vmatmul.mubr.msk.f32.vlgmr.msra.gmra.mrb[0].mxu0 %vm46_vm0, %v15_v15  ;;  %349 = vmatmul.mubr.msk.f32.vlgmr.msra.gmra.mrb[0].mxu1 %vm46_vm0, %v23_v16 }
  0x17   :  { %339 = vmatprep.mubr.msk.f32.mxu0 %vm46_vm0, %v16_v17  ;;  %351 = vmatprep.mubr.msk.f32.mxu1 %vm46_vm0, %v24_v18 }
  0x1a   :  { %340 = vmatmul.mubr.msk.f32.gmra.mrb[2].mxu0 %vm46_vm0, %v17_v19  ;;  %352 = vmatmul.mubr.msk.f32.gmra.mrb[2].mxu1 %vm46_vm0, %v25_v20 }
  0x1b   :  { %342 = vmatprep.mubr.msk.f32.mxu0 %vm46_vm0, %v18_v21  ;;  %354 = vmatprep.mubr.msk.f32.mxu1 %vm46_vm0, %v26_v22 }
  0x1e   :  { %343 = vmatmul.mubr.msk.f32.gmra.mrb[4].mxu0 %vm46_vm0, %v19_v23  ;;  %355 = vmatmul.mubr.msk.f32.gmra.mrb[4].mxu1 %vm46_vm0, %v27_v24 }
  0x1f   :  { %345 = vmatprep.mubr.msk.f32.mxu0 %vm46_vm0, %v20_v25  ;;  %357 = vmatprep.mubr.msk.f32.mxu1 %vm46_vm0, %v28_v26 }
  0x22   :  { %346 = vmatmul.mubr.msk.f32.gmra.mrb[6].mxu0 %vm46_vm0, %v21_v27  ;;  %358 = vmatmul.mubr.msk.f32.gmra.mrb[6].mxu1 %vm46_vm0, %v29_v28 }
  0xe9   :  { %v338_v30 = vpop.f32.mrb[0].mxu0  ;;  %v350_v31 = vpop.f32.mrb[0].mxu1 }
  0xea   :  { %v167_v32 = vadd.f32 %v338_v30, %v276_v29  ;;  %v207_v33 = vadd.f32 %v350_v31, %v276_v29  ;;  %v161_v34 = vpop.f32.mrb[1].mxu0  ;;  %v201_v35 = vpop.f32.mrb[1].mxu1 }
  0xeb   :  { %v162_v36 = vadd.f32 %v276_v29, %v161_v34  ;;  %v202_v37 = vadd.f32 %v276_v29, %v201_v35 }
  0xec   :  { %v241_v38 = vmax.f32 %v167_v32, 0.0  ;;  %v249_v39 = vmax.f32 %v207_v33, 0.0 }
  0xed   :  { %v240_v40 = vmax.f32 %v162_v36, 0.0  ;;  %v248_v41 = vmax.f32 %v202_v37, 0.0  ;;  %v341_v42 = vpop.f32.mrb[2].mxu0  ;;  %v353_v43 = vpop.f32.mrb[2].mxu1 }
  0xee   :  { %257 = vst [vmem:[%s551_s3 + $0x8] sm:$0xff] %v241_v38  ;;  %265 = vst [vmem:[%s551_s3 + $0x48] sm:$0xff] %v249_v39  ;;  %v177_v44 = vadd.f32 %v341_v42, %v276_v29  ;;  %v217_v45 = vadd.f32 %v353_v43, %v276_v29  ;;  %v171_v46 = vpop.f32.mrb[3].mxu0  ;;  %v211_v47 = vpop.f32.mrb[3].mxu1 }
  0xef   :  { %256 = vst [vmem:[%s551_s3] sm:$0xff] %v240_v40  ;;  %264 = vst [vmem:[%s551_s3 + $0x40] sm:$0xff] %v248_v41  ;;  %v172_v48 = vadd.f32 %v276_v29, %v171_v46  ;;  %v212_v49 = vadd.f32 %v276_v29, %v211_v47 }
  0xf0   :  { %v243_v50 = vmax.f32 %v177_v44, 0.0  ;;  %v251_v51 = vmax.f32 %v217_v45, 0.0 }
  0xf1   :  { %v242_v52 = vmax.f32 %v172_v48, 0.0  ;;  %v250_v53 = vmax.f32 %v212_v49, 0.0  ;;  %v344_v54 = vpop.f32.mrb[4].mxu0  ;;  %v356_v55 = vpop.f32.mrb[4].mxu1 }
  0xf2   :  { %259 = vst [vmem:[%s551_s3 + $0x18] sm:$0xff] %v243_v50  ;;  %267 = vst [vmem:[%s551_s3 + $0x58] sm:$0xff] %v251_v51  ;;  %v187_v56 = vadd.f32 %v344_v54, %v276_v29  ;;  %v227_v57 = vadd.f32 %v356_v55, %v276_v29  ;;  %v181_v58 = vpop.f32.mrb[5].mxu0  ;;  %v221_v59 = vpop.f32.mrb[5].mxu1 }
  0xf3   :  { %258 = vst [vmem:[%s551_s3 + $0x10] sm:$0xff] %v242_v52  ;;  %266 = vst [vmem:[%s551_s3 + $0x50] sm:$0xff] %v250_v53  ;;  %v182_v60 = vadd.f32 %v276_v29, %v181_v58  ;;  %v222_v61 = vadd.f32 %v276_v29, %v221_v59 }
  0xf4   :  { %v245_v62 = vmax.f32 %v187_v56, 0.0  ;;  %v253_v63 = vmax.f32 %v227_v57, 0.0 }
  0xf5   :  { %v244_v0 = vmax.f32 %v182_v60, 0.0  ;;  %v252_v1 = vmax.f32 %v222_v61, 0.0  ;;  %v347_v2 = vpop.f32.mrb[6].mxu0  ;;  %v359_v3 = vpop.f32.mrb[6].mxu1 }
  0xf6   :  { %261 = vst [vmem:[%s551_s3 + $0x28] sm:$0xff] %v245_v62  ;;  %269 = vst [vmem:[%s551_s3 + $0x68] sm:$0xff] %v253_v63  ;;  %v197_v4 = vadd.f32 %v347_v2, %v276_v29  ;;  %v237_v5 = vadd.f32 %v359_v3, %v276_v29  ;;  %v191_v6 = vpop.f32.mrb[7].mxu0  ;;  %v231_v7 = vpop.f32.mrb[7].mxu1 }
  0xf7   :  { %260 = vst [vmem:[%s551_s3 + $0x20] sm:$0xff] %v244_v0  ;;  %268 = vst [vmem:[%s551_s3 + $0x60] sm:$0xff] %v252_v1  ;;  %v192_v8 = vadd.f32 %v276_v29, %v191_v6  ;;  %v232_v9 = vadd.f32 %v276_v29, %v231_v7 }
  0xf8   :  { %v247_v10 = vmax.f32 %v197_v4, 0.0  ;;  %v255_v11 = vmax.f32 %v237_v5, 0.0 }
  0xf9   :  { %v246_v12 = vmax.f32 %v192_v8, 0.0  ;;  %v254_v13 = vmax.f32 %v232_v9, 0.0 }
  0xfa   :  { %263 = vst [vmem:[%s551_s3 + $0x38] sm:$0xff] %v247_v10  ;;  %271 = vst [vmem:[%s551_s3 + $0x78] sm:$0xff] %v255_v11 }
  0xfb   :  { %262 = vst [vmem:[%s551_s3 + $0x30] sm:$0xff] %v246_v12  ;;  %270 = vst [vmem:[%s551_s3 + $0x70] sm:$0xff] %v254_v13 }

// kernel: ssd_forward.36
= control target key start
LH: loop header
LB: loop body
LE: loop exit
PB: predicated region body
PF: predicated region fallthrough
CT: control target
= control target key end

     0   :  { %vm39_vm0 = vcmask 130048   ;;  %s479_s1 = inlined_call_operand.vmem [shape: f32[16,128], index: 1, kind: input, shape index: {}]   ;;  %s480_s0 = inlined_call_operand.vmem [shape: f32[128,16], index: 0, kind: input, shape index: {}]   ;;  %s481_s2 = inlined_call_operand.vmem [shape: f32[1,128], index: 2, kind: input, shape index: {}]   ;;  %s482_s3 = inlined_call_operand.vmem [shape: f32[128,128], index: 3, kind: output, shape index: {}]  }
   0x1   :  { %v30_v0 = vld [vmem:[%s479_s1] sm:$0xff]  ;;  %v31_v1 = vld [vmem:[%s479_s1 + $0x8] sm:$0xff]  ;;  %v16_v7 = vld [vmem:[%s480_s0 + $0x10] sm:$0xff] }
   0x2   :  { %v14_v2 = vld [vmem:[%s480_s0] sm:$0xff]  ;;  %v332_v3 = vpack.c.bf16 %v31_v1, %v30_v0  ;;  %v15_v5 = vld [vmem:[%s480_s0 + $0x8] sm:$0xff]  ;;  %v24_v8 = vld [vmem:[%s480_s0 + $0x50] sm:$0xff] }
   0x3   :  { %308 = vmatprep.mubr.msk.f32.mxu0 %vm39_vm0, %v14_v2  ;;  %v22_v4 = vld [vmem:[%s480_s0 + $0x40] sm:$0xff]  ;;  %v23_v6 = vld [vmem:[%s480_s0 + $0x48] sm:$0xff]  ;;  %v17_v9 = vld [vmem:[%s480_s0 + $0x18] sm:$0xff] }
   0x4   :  { %320 = vmatprep.mubr.msk.f32.mxu1 %vm39_vm0, %v22_v4  ;;  %333 = vmatprep.subr.bf16.mxu0 %v332_v3  ;;  %v25_v10 = vld [vmem:[%s480_s0 + $0x58] sm:$0xff]  ;;  %v18_v11 = vld [vmem:[%s480_s0 + $0x20] sm:$0xff]  ;;  %v19_v13 = vld [vmem:[%s480_s0 + $0x28] sm:$0xff] }
   0x5   :  { %336 = vmatprep.subr.bf16.mxu1 %v332_v3  ;;  %335 = vmatpush3.bf16.msra.mxu0 %v332_v3  ;;  %v26_v12 = vld [vmem:[%s480_s0 + $0x60] sm:$0xff]  ;;  %v27_v14 = vld [vmem:[%s480_s0 + $0x68] sm:$0xff]  ;;  %v20_v15 = vld [vmem:[%s480_s0 + $0x30] sm:$0xff] }
   0x6   :  { %337 = vmatpush3.bf16.msra.mxu1 %v332_v3  ;;  %v28_v16 = vld [vmem:[%s480_s0 + $0x70] sm:$0xff]  ;;  %v21_v17 = vld [vmem:[%s480_s0 + $0x38] sm:$0xff]  ;;  %v269_v19 = vld [vmem:[%s481_s2] ss:$0 sm:$0xff] }
   0x7   :  { %v29_v18 = vld [vmem:[%s480_s0 + $0x78] sm:$0xff] }
   0x8   :  { %309 = vmatmul.mubr.msk.f32.vlgmr.msra.gmra.mrb[0].mxu0 %vm39_vm0, %v15_v5 }
   0x9   :  { %321 = vmatmul.mubr.msk.f32.vlgmr.msra.gmra.mrb[0].mxu1 %vm39_vm0, %v23_v6  ;;  %311 = vmatprep.mubr.msk.f32.mxu0 %vm39_vm0, %v16_v7 }
   0xa   :  { %323 = vmatprep.mubr.msk.f32.mxu1 %vm39_vm0, %v24_v8 }
   0xc   :  { %312 = vmatmul.mubr.msk.f32.gmra.mrb[2].mxu0 %vm39_vm0, %v17_v9 }
   0xd   :  { %324 = vmatmul.mubr.msk.f32.gmra.mrb[2].mxu1 %vm39_vm0, %v25_v10  ;;  %314 = vmatprep.mubr.msk.f32.mxu0 %vm39_vm0, %v18_v11 }
   0xe   :  { %326 = vmatprep.mubr.msk.f32.mxu1 %vm39_vm0, %v26_v12 }
  0x10   :  { %315 = vmatmul.mubr.msk.f32.gmra.mrb[4].mxu0 %vm39_vm0, %v19_v13 }
  0x11   :  { %327 = vmatmul.mubr.msk.f32.gmra.mrb[4].mxu1 %vm39_vm0, %v27_v14  ;;  %317 = vmatprep.mubr.msk.f32.mxu0 %vm39_vm0, %v20_v15 }
  0x12   :  { %329 = vmatprep.mubr.msk.f32.mxu1 %vm39_vm0, %v28_v16 }
  0x14   :  { %318 = vmatmul.mubr.msk.f32.gmra.mrb[6].mxu0 %vm39_vm0, %v21_v17 }
  0x15   :  { %330 = vmatmul.mubr.msk.f32.gmra.mrb[6].mxu1 %vm39_vm0, %v29_v18 }
  0xdb   :  { %v310_v20 = vpop.f32.mrb[0].mxu0 }
  0xdc   :  { %v322_v21 = vpop.f32.mrb[0].mxu1  ;;  %v160_v22 = vadd.f32 %v310_v20, %v269_v19  ;;  %v154_v24 = vpop.f32.mrb[1].mxu0 }
  0xdd   :  { %v200_v23 = vadd.f32 %v322_v21, %v269_v19  ;;  %v194_v25 = vpop.f32.mrb[1].mxu1  ;;  %v155_v26 = vadd.f32 %v269_v19, %v154_v24 }
  0xde   :  { %v195_v27 = vadd.f32 %v269_v19, %v194_v25  ;;  %v234_v28 = vmax.f32 %v160_v22, 0.0 }
  0xdf   :  { %v242_v29 = vmax.f32 %v200_v23, 0.0  ;;  %v233_v30 = vmax.f32 %v155_v26, 0.0  ;;  %v313_v32 = vpop.f32.mrb[2].mxu0 }
  0xe0   :  { %v241_v31 = vmax.f32 %v195_v27, 0.0  ;;  %v325_v33 = vpop.f32.mrb[2].mxu1  ;;  %250 = vst [vmem:[%s482_s3 + $0x8] sm:$0xff] %v234_v28  ;;  %v170_v34 = vadd.f32 %v313_v32, %v269_v19  ;;  %v164_v36 = vpop.f32.mrb[3].mxu0 }
  0xe1   :  { %258 = vst [vmem:[%s482_s3 + $0x48] sm:$0xff] %v242_v29  ;;  %v210_v35 = vadd.f32 %v325_v33, %v269_v19  ;;  %v204_v37 = vpop.f32.mrb[3].mxu1  ;;  %249 = vst [vmem:[%s482_s3] sm:$0xff] %v233_v30  ;;  %v165_v38 = vadd.f32 %v269_v19, %v164_v36 }
  0xe2   :  { %257 = vst [vmem:[%s482_s3 + $0x40] sm:$0xff] %v241_v31  ;;  %v205_v39 = vadd.f32 %v269_v19, %v204_v37  ;;  %v236_v40 = vmax.f32 %v170_v34, 0.0 }
  0xe3   :  { %v244_v41 = vmax.f32 %v210_v35, 0.0  ;;  %v235_v42 = vmax.f32 %v165_v38, 0.0  ;;  %v316_v44 = vpop.f32.mrb[4].mxu0 }
  0xe4   :  { %v243_v43 = vmax.f32 %v205_v39, 0.0  ;;  %v328_v45 = vpop.f32.mrb[4].mxu1  ;;  %252 = vst [vmem:[%s482_s3 + $0x18] sm:$0xff] %v236_v40  ;;  %v180_v46 = vadd.f32 %v316_v44, %v269_v19  ;;  %v174_v48 = vpop.f32.mrb[5].mxu0 }
  0xe5   :  { %260 = vst [vmem:[%s482_s3 + $0x58] sm:$0xff] %v244_v41  ;;  %v220_v47 = vadd.f32 %v328_v45, %v269_v19  ;;  %v214_v49 = vpop.f32.mrb[5].mxu1  ;;  %251 = vst [vmem:[%s482_s3 + $0x10] sm:$0xff] %v235_v42  ;;  %v175_v50 = vadd.f32 %v269_v19, %v174_v48 }
  0xe6   :  { %259 = vst [vmem:[%s482_s3 + $0x50] sm:$0xff] %v243_v43  ;;  %v215_v51 = vadd.f32 %v269_v19, %v214_v49  ;;  %v238_v52 = vmax.f32 %v180_v46, 0.0 }
  0xe7   :  { %v246_v53 = vmax.f32 %v220_v47, 0.0  ;;  %v237_v54 = vmax.f32 %v175_v50, 0.0  ;;  %v319_v56 = vpop.f32.mrb[6].mxu0 }
  0xe8   :  { %v245_v55 = vmax.f32 %v215_v51, 0.0  ;;  %v331_v57 = vpop.f32.mrb[6].mxu1  ;;  %254 = vst [vmem:[%s482_s3 + $0x28] sm:$0xff] %v238_v52  ;;  %v190_v58 = vadd.f32 %v319_v56, %v269_v19  ;;  %v184_v60 = vpop.f32.mrb[7].mxu0 }
  0xe9   :  { %262 = vst [vmem:[%s482_s3 + $0x68] sm:$0xff] %v246_v53  ;;  %v230_v59 = vadd.f32 %v331_v57, %v269_v19  ;;  %v224_v61 = vpop.f32.mrb[7].mxu1  ;;  %253 = vst [vmem:[%s482_s3 + $0x20] sm:$0xff] %v237_v54  ;;  %v185_v62 = vadd.f32 %v269_v19, %v184_v60 }
  0xea   :  { %261 = vst [vmem:[%s482_s3 + $0x60] sm:$0xff] %v245_v55  ;;  %v225_v63 = vadd.f32 %v269_v19, %v224_v61  ;;  %v240_v0 = vmax.f32 %v190_v58, 0.0 }
  0xeb   :  { %v248_v1 = vmax.f32 %v230_v59, 0.0  ;;  %v239_v2 = vmax.f32 %v185_v62, 0.0 }
  0xec   :  { %v247_v3 = vmax.f32 %v225_v63, 0.0  ;;  %256 = vst [vmem:[%s482_s3 + $0x38] sm:$0xff] %v240_v0 }
  0xed   :  { %264 = vst [vmem:[%s482_s3 + $0x78] sm:$0xff] %v248_v1  ;;  %255 = vst [vmem:[%s482_s3 + $0x30] sm:$0xff] %v239_v2 }
  0xee   :  { %263 = vst [vmem:[%s482_s3 + $0x70] sm:$0xff] %v247_v3 }

// kernel: ssd_forward.37
= control target key start
LH: loop header
LB: loop body
LE: loop exit
PB: predicated region body
PF: predicated region fallthrough
CT: control target
= control target key end

     0   :  { %vm34_vm0 = vcmask 588800   ;;  %s290_s1 = inlined_call_operand.vmem [shape: f32[72,128], index: 1, kind: input, shape index: {}]   ;;  %s291_s0 = inlined_call_operand.vmem [shape: f32[32,72], index: 0, kind: input, shape index: {}]   ;;  %s292_s2 = inlined_call_operand.vmem [shape: f32[1,128], index: 2, kind: input, shape index: {}]   ;;  %s293_s3 = inlined_call_operand.vmem [shape: f32[32,128], index: 3, kind: output, shape index: {}]  }
   0x1   :  { %v18_v0 = vld [vmem:[%s290_s1] sm:$0xff]  ;;  %v19_v1 = vld [vmem:[%s290_s1 + $0x8] sm:$0xff]  ;;  %v20_v2 = vld [vmem:[%s290_s1 + $0x10] sm:$0xff] }
   0x2   :  { %v186_v3 = vpack.c.bf16 %v19_v1, %v18_v0  ;;  %v21_v4 = vld [vmem:[%s290_s1 + $0x18] sm:$0xff]  ;;  %v22_v6 = vld [vmem:[%s290_s1 + $0x20] sm:$0xff]  ;;  %v23_v7 = vld [vmem:[%s290_s1 + $0x28] sm:$0xff] }
   0x3   :  { %v190_v5 = vpack.c.bf16 %v21_v4, %v20_v2  ;;  %v14_v8 = vld [vmem:[%s291_s0] sm:$0xff]  ;;  %v16_v9 = vld [vmem:[%s291_s0 + $0x10] sm:$0xff]  ;;  %v194_v10 = vpack.c.bf16 %v23_v7, %v22_v6  ;;  %v25_v12 = vld [vmem:[%s290_s1 + $0x38] sm:$0xff] }
   0x4   :  { %187 = vmatprep.subr.bf16.mxu0 %v186_v3  ;;  %202 = vmatprep.subr.bf16.mxu1 %v186_v3  ;;  %v24_v11 = vld [vmem:[%s290_s1 + $0x30] sm:$0xff]  ;;  %v26_v14 = vld [vmem:[%s290_s1 + $0x40] sm:$0xff]  ;;  %v15_v15 = vld [vmem:[%s291_s0 + $0x8] sm:$0xff] }
   0x5   :  { %189 = vmatpush3.bf16.msra.mxu0 %v186_v3  ;;  %207 = vmatpush3.bf16.msra.mxu1 %v186_v3  ;;  %v198_v13 = vpack.c.bf16 %v25_v12, %v24_v11  ;;  %v17_v16 = vld [vmem:[%s291_s0 + $0x18] sm:$0xff]  ;;  %v144_v17 = vld [vmem:[%s292_s2] ss:$0 sm:$0xff] }
   0x6   :  { %191 = vmatprep.subr.bf16.mxu0 %v190_v5  ;;  %203 = vmatprep.subr.bf16.mxu1 %v190_v5 }
   0x7   :  { %180 = vmatprep.mubr.msk.f32.mxu0 %vm34_vm0, %v14_v8  ;;  %183 = vmatprep.mubr.msk.f32.mxu1 %vm34_vm0, %v16_v9 }
   0x9   :  { %193 = vmatpush3.bf16.msra.mxu0 %v190_v5  ;;  %208 = vmatpush3.bf16.msra.mxu1 %v190_v5 }
   0xa   :  { %195 = vmatprep.subr.bf16.mxu0 %v194_v10  ;;  %204 = vmatprep.subr.bf16.mxu1 %v194_v10 }
   0xd   :  { %197 = vmatpush3.bf16.msra.mxu0 %v194_v10  ;;  %209 = vmatpush3.bf16.msra.mxu1 %v194_v10 }
   0xe   :  { %199 = vmatprep.subr.bf16.mxu0 %v198_v13  ;;  %205 = vmatprep.subr.bf16.mxu1 %v198_v13 }
  0x11   :  { %201 = vmatpush3.bf16.msra.mxu0 %v198_v13  ;;  %210 = vmatpush3.bf16.msra.mxu1 %v198_v13 }
  0x12   :  { %178 = vmatprep.subr.mxu0 %v26_v14  ;;  %206 = vmatprep.subr.mxu1 %v26_v14 }
  0x15   :  { %179 = vmatpush3.msra.mxu0 %v26_v14  ;;  %211 = vmatpush3.msra.mxu1 %v26_v14 }
  0x16   :  { %181 = vmatmul.mubr.msk.f32.vlgmr.msra.gmra.mrb[0].mxu0 %vm34_vm0, %v15_v15  ;;  %184 = vmatmul.mubr.msk.f32.vlgmr.msra.gmra.mrb[0].mxu1 %vm34_vm0, %v17_v16 }
  0xe9   :  { %v182_v18 = vpop.f32.mrb[0].mxu0  ;;  %v185_v19 = vpop.f32.mrb[0].mxu1 }
  0xea   :  { %v119_v20 = vadd.f32 %v182_v18, %v144_v17  ;;  %v129_v21 = vadd.f32 %v185_v19, %v144_v17  ;;  %v113_v22 = vpop.f32.mrb[1].mxu0  ;;  %v123_v23 = vpop.f32.mrb[1].mxu1 }
  0xeb   :  { %v114_v24 = vadd.f32 %v144_v17, %v113_v22  ;;  %v124_v25 = vadd.f32 %v144_v17, %v123_v23 }
  0xec   :  { %v133_v26 = vmax.f32 %v119_v20, 0.0  ;;  %v135_v27 = vmax.f32 %v129_v21, 0.0 }
  0xed   :  { %v132_v28 = vmax.f32 %v114_v24, 0.0  ;;  %v134_v29 = vmax.f32 %v124_v25, 0.0 }
  0xee   :  { %137 = vst [vmem:[%s293_s3 + $0x8] sm:$0xff] %v133_v26  ;;  %139 = vst [vmem:[%s293_s3 + $0x18] sm:$0xff] %v135_v27 }
  0xef   :  { %136 = vst [vmem:[%s293_s3] sm:$0xff] %v132_v28  ;;  %138 = vst [vmem:[%s293_s3 + $0x10] sm:$0xff] %v134_v29 }

// kernel: ssd_forward.41
= control target key start
LH: loop header
LB: loop body
LE: loop exit
PB: predicated region body
PF: predicated region fallthrough
CT: control target
= control target key end

     0   :  { %v204_v0 = vmov 0.0|0.0   ;;  %vm47_vm0 = vcmask 130048   ;;  %s340_s1 = inlined_call_operand.vmem [shape: f32[144,128], index: 1, kind: input, shape index: {}]   ;;  %s341_s0 = inlined_call_operand.vmem [shape: f32[32,144], index: 0, kind: input, shape index: {}]   ;;  %s342_s2 = inlined_call_operand.vmem [shape: f32[1,128], index: 2, kind: input, shape index: {}]   ;;  %s343_s3 = inlined_call_operand.vmem [shape: f32[32,128], index: 3, kind: output, shape index: {}]  }
   0x1   :  { %158 = vmatprep.subr.bf16.mxu0 %v204_v0  ;;  %185 = vmatprep.subr.bf16.mxu1 %v204_v0  ;;  %v22_v1 = vld [vmem:[%s340_s1] sm:$0xff]  ;;  %v23_v2 = vld [vmem:[%s340_s1 + $0x8] sm:$0xff]  ;;  %v24_v3 = vld [vmem:[%s340_s1 + $0x10] sm:$0xff] }
   0x2   :  { %v159_v4 = vpack.c.bf16 %v23_v2, %v22_v1  ;;  %v25_v5 = vld [vmem:[%s340_s1 + $0x18] sm:$0xff]  ;;  %v26_v7 = vld [vmem:[%s340_s1 + $0x20] sm:$0xff]  ;;  %v27_v8 = vld [vmem:[%s340_s1 + $0x28] sm:$0xff] }
   0x3   :  { %v162_v6 = vpack.c.bf16 %v25_v5, %v24_v3  ;;  %v15_v9 = vld [vmem:[%s341_s0 + $0x8] sm:$0xff]  ;;  %v165_v11 = vpack.c.bf16 %v27_v8, %v26_v7  ;;  %v28_v12 = vld [vmem:[%s340_s1 + $0x30] sm:$0xff]  ;;  %v29_v13 = vld [vmem:[%s340_s1 + $0x38] sm:$0xff] }
   0x4   :  { %160 = vmatpush1.bf16.msra.mxu0 %v159_v4  ;;  %194 = vmatpush1.bf16.msra.mxu1 %v159_v4  ;;  %v19_v10 = vld [vmem:[%s341_s0 + $0x28] sm:$0xff]  ;;  %v168_v14 = vpack.c.bf16 %v29_v13, %v28_v12  ;;  %v30_v15 = vld [vmem:[%s340_s1 + $0x40] sm:$0xff]  ;;  %v32_v18 = vld [vmem:[%s340_s1 + $0x50] sm:$0xff] }
   0x5   :  { %161 = vmatprep.subr.bf16.mxu0 %v204_v0  ;;  %186 = vmatprep.subr.bf16.mxu1 %v204_v0  ;;  %v31_v16 = vld [vmem:[%s340_s1 + $0x48] sm:$0xff]  ;;  %v33_v19 = vld [vmem:[%s340_s1 + $0x58] sm:$0xff]  ;;  %v34_v21 = vld [vmem:[%s340_s1 + $0x60] sm:$0xff] }
   0x6   :  { %154 = vmatprep.mubr.msk.f32.mxu0 %vm47_vm0, %v15_v9  ;;  %156 = vmatprep.mubr.msk.f32.mxu1 %vm47_vm0, %v19_v10  ;;  %v171_v17 = vpack.c.bf16 %v31_v16, %v30_v15  ;;  %v174_v20 = vpack.c.bf16 %v33_v19, %v32_v18  ;;  %v35_v22 = vld [vmem:[%s340_s1 + $0x68] sm:$0xff]  ;;  %v36_v24 = vld [vmem:[%s340_s1 + $0x70] sm:$0xff]  ;;  %v37_v25 = vld [vmem:[%s340_s1 + $0x78] sm:$0xff] }
   0x7   :  { %v177_v23 = vpack.c.bf16 %v35_v22, %v34_v21  ;;  %v180_v26 = vpack.c.bf16 %v37_v25, %v36_v24  ;;  %v38_v27 = vld [vmem:[%s340_s1 + $0x80] sm:$0xff]  ;;  %v39_v28 = vld [vmem:[%s340_s1 + $0x88] sm:$0xff]  ;;  %v17_v32 = vld [vmem:[%s341_s0 + $0x18] sm:$0xff] }
   0x8   :  { %163 = vmatpush1.bf16.msra.mxu0 %v162_v6  ;;  %195 = vmatpush1.bf16.msra.mxu1 %v162_v6  ;;  %v183_v29 = vpack.c.bf16 %v39_v28, %v38_v27  ;;  %v14_v30 = vld [vmem:[%s341_s0] sm:$0xff]  ;;  %v21_v33 = vld [vmem:[%s341_s0 + $0x38] sm:$0xff]  ;;  %v16_v34 = vld [vmem:[%s341_s0 + $0x10] sm:$0xff] }
   0x9   :  { %164 = vmatprep.subr.bf16.mxu0 %v204_v0  ;;  %187 = vmatprep.subr.bf16.mxu1 %v204_v0  ;;  %v18_v31 = vld [vmem:[%s341_s0 + $0x20] sm:$0xff]  ;;  %v20_v35 = vld [vmem:[%s341_s0 + $0x30] sm:$0xff] }
   0xa   :  { %v153_v36 = vld [vmem:[%s342_s2] ss:$0 sm:$0xff] }
   0xc   :  { %166 = vmatpush1.bf16.msra.mxu0 %v165_v11  ;;  %196 = vmatpush1.bf16.msra.mxu1 %v165_v11 }
   0xd   :  { %167 = vmatprep.subr.bf16.mxu0 %v204_v0  ;;  %188 = vmatprep.subr.bf16.mxu1 %v204_v0 }
  0x10   :  { %169 = vmatpush1.bf16.msra.mxu0 %v168_v14  ;;  %197 = vmatpush1.bf16.msra.mxu1 %v168_v14 }
  0x11   :  { %170 = vmatprep.subr.bf16.mxu0 %v204_v0  ;;  %189 = vmatprep.subr.bf16.mxu1 %v204_v0 }
  0x14   :  { %172 = vmatpush1.bf16.msra.mxu0 %v171_v17  ;;  %198 = vmatpush1.bf16.msra.mxu1 %v171_v17 }
  0x15   :  { %173 = vmatprep.subr.bf16.mxu0 %v204_v0  ;;  %190 = vmatprep.subr.bf16.mxu1 %v204_v0 }
  0x18   :  { %175 = vmatpush1.bf16.msra.mxu0 %v174_v20  ;;  %199 = vmatpush1.bf16.msra.mxu1 %v174_v20 }
  0x19   :  { %176 = vmatprep.subr.bf16.mxu0 %v204_v0  ;;  %191 = vmatprep.subr.bf16.mxu1 %v204_v0 }
  0x1c   :  { %178 = vmatpush1.bf16.msra.mxu0 %v177_v23  ;;  %200 = vmatpush1.bf16.msra.mxu1 %v177_v23 }
  0x1d   :  { %179 = vmatprep.subr.bf16.mxu0 %v204_v0  ;;  %192 = vmatprep.subr.bf16.mxu1 %v204_v0 }
  0x20   :  { %181 = vmatpush1.bf16.msra.mxu0 %v180_v26  ;;  %201 = vmatpush1.bf16.msra.mxu1 %v180_v26 }
  0x21   :  { %182 = vmatprep.subr.bf16.mxu0 %v204_v0  ;;  %193 = vmatprep.subr.bf16.mxu1 %v204_v0 }
  0x24   :  { %184 = vmatpush1.bf16.msra.mxu0 %v183_v29  ;;  %202 = vmatpush1.bf16.msra.mxu1 %v183_v29 }
  0x27   :  { %125 = vmatmul.mubr.f32.vlgmr.msra.gmra.mrb[0].mxu0 %v14_v30  ;;  %135 = vmatmul.mubr.f32.vlgmr.msra.gmra.mrb[0].mxu1 %v18_v31 }
  0x28   :  { %155 = vmatprep.mubr.msk.f32.mxu0 %vm47_vm0, %v17_v32  ;;  %157 = vmatprep.mubr.msk.f32.mxu1 %vm47_vm0, %v21_v33 }
  0x2b   :  { %130 = vmatmul.mubr.f32.gmra.mrb[2].mxu0 %v16_v34  ;;  %140 = vmatmul.mubr.f32.gmra.mrb[2].mxu1 %v20_v35 }
  0xfa   :  { %v126_v37 = vpop.f32.mrb[0].mxu0  ;;  %v136_v38 = vpop.f32.mrb[0].mxu1 }
  0xfb   :  { %v127_v39 = vadd.f32 %v153_v36, %v126_v37  ;;  %v137_v40 = vadd.f32 %v153_v36, %v136_v38  ;;  %v128_v41 = vpop.f32.mrb[1].mxu0  ;;  %v138_v42 = vpop.f32.mrb[1].mxu1 }
  0xfd   :  { %145 = vst [vmem:[%s343_s3] sm:$0xff] %v127_v39  ;;  %147 = vst [vmem:[%s343_s3 + $0x10] sm:$0xff] %v137_v40 }
  0xfe   :  { %v131_v43 = vpop.f32.mrb[2].mxu0  ;;  %v141_v44 = vpop.f32.mrb[2].mxu1 }
  0xff   :  { %v132_v45 = vadd.f32 %v153_v36, %v131_v43  ;;  %v142_v46 = vadd.f32 %v153_v36, %v141_v44  ;;  %v133_v47 = vpop.f32.mrb[3].mxu0  ;;  %v143_v48 = vpop.f32.mrb[3].mxu1 }
 0x101   :  { %146 = vst [vmem:[%s343_s3 + $0x8] sm:$0xff] %v132_v45  ;;  %148 = vst [vmem:[%s343_s3 + $0x18] sm:$0xff] %v142_v46 }

// kernel: ssd_forward.40
= control target key start
LH: loop header
LB: loop body
LE: loop exit
PB: predicated region body
PF: predicated region fallthrough
CT: control target
= control target key end

     0   :  { %v348_v0 = vmov 0.0|0.0   ;;  %vm71_vm0 = vcmask 130048   ;;  %s604_s1 = inlined_call_operand.vmem [shape: f32[144,128], index: 1, kind: input, shape index: {}]   ;;  %s605_s0 = inlined_call_operand.vmem [shape: f32[128,144], index: 0, kind: input, shape index: {}]   ;;  %s606_s2 = inlined_call_operand.vmem [shape: f32[1,128], index: 2, kind: input, shape index: {}]   ;;  %s607_s3 = inlined_call_operand.vmem [shape: f32[128,128], index: 3, kind: output, shape index: {}]  }
   0x1   :  { %302 = vmatprep.subr.bf16.mxu0 %v348_v0  ;;  %329 = vmatprep.subr.bf16.mxu1 %v348_v0  ;;  %v46_v1 = vld [vmem:[%s604_s1] sm:$0xff]  ;;  %v47_v2 = vld [vmem:[%s604_s1 + $0x8] sm:$0xff]  ;;  %v48_v3 = vld [vmem:[%s604_s1 + $0x10] sm:$0xff] }
   0x2   :  { %v303_v4 = vpack.c.bf16 %v47_v2, %v46_v1  ;;  %v49_v5 = vld [vmem:[%s604_s1 + $0x18] sm:$0xff]  ;;  %v50_v7 = vld [vmem:[%s604_s1 + $0x20] sm:$0xff]  ;;  %v51_v8 = vld [vmem:[%s604_s1 + $0x28] sm:$0xff] }
   0x3   :  { %v306_v6 = vpack.c.bf16 %v49_v5, %v48_v3  ;;  %v15_v9 = vld [vmem:[%s605_s0 + $0x8] sm:$0xff]  ;;  %v309_v11 = vpack.c.bf16 %v51_v8, %v50_v7  ;;  %v52_v12 = vld [vmem:[%s604_s1 + $0x30] sm:$0xff]  ;;  %v53_v13 = vld [vmem:[%s604_s1 + $0x38] sm:$0xff] }
   0x4   :  { %304 = vmatpush1.bf16.msra.mxu0 %v303_v4  ;;  %338 = vmatpush1.bf16.msra.mxu1 %v303_v4  ;;  %v31_v10 = vld [vmem:[%s605_s0 + $0x88] sm:$0xff]  ;;  %v312_v14 = vpack.c.bf16 %v53_v13, %v52_v12  ;;  %v54_v15 = vld [vmem:[%s604_s1 + $0x40] sm:$0xff]  ;;  %v56_v18 = vld [vmem:[%s604_s1 + $0x50] sm:$0xff] }
   0x5   :  { %305 = vmatprep.subr.bf16.mxu0 %v348_v0  ;;  %330 = vmatprep.subr.bf16.mxu1 %v348_v0  ;;  %v55_v16 = vld [vmem:[%s604_s1 + $0x48] sm:$0xff]  ;;  %v57_v19 = vld [vmem:[%s604_s1 + $0x58] sm:$0xff]  ;;  %v58_v21 = vld [vmem:[%s604_s1 + $0x60] sm:$0xff] }
   0x6   :  { %286 = vmatprep.mubr.msk.f32.mxu0 %vm71_vm0, %v15_v9  ;;  %294 = vmatprep.mubr.msk.f32.mxu1 %vm71_vm0, %v31_v10  ;;  %v315_v17 = vpack.c.bf16 %v55_v16, %v54_v15  ;;  %v318_v20 = vpack.c.bf16 %v57_v19, %v56_v18  ;;  %v59_v22 = vld [vmem:[%s604_s1 + $0x68] sm:$0xff]  ;;  %v60_v24 = vld [vmem:[%s604_s1 + $0x70] sm:$0xff]  ;;  %v61_v25 = vld [vmem:[%s604_s1 + $0x78] sm:$0xff] }
   0x7   :  { %v321_v23 = vpack.c.bf16 %v59_v22, %v58_v21  ;;  %v324_v26 = vpack.c.bf16 %v61_v25, %v60_v24  ;;  %v62_v27 = vld [vmem:[%s604_s1 + $0x80] sm:$0xff]  ;;  %v63_v28 = vld [vmem:[%s604_s1 + $0x88] sm:$0xff]  ;;  %v17_v32 = vld [vmem:[%s605_s0 + $0x18] sm:$0xff] }
   0x8   :  { %307 = vmatpush1.bf16.msra.mxu0 %v306_v6  ;;  %339 = vmatpush1.bf16.msra.mxu1 %v306_v6  ;;  %v327_v29 = vpack.c.bf16 %v63_v28, %v62_v27  ;;  %v14_v30 = vld [vmem:[%s605_s0] sm:$0xff]  ;;  %v33_v33 = vld [vmem:[%s605_s0 + $0x98] sm:$0xff]  ;;  %v16_v34 = vld [vmem:[%s605_s0 + $0x10] sm:$0xff] }
   0x9   :  { %308 = vmatprep.subr.bf16.mxu0 %v348_v0  ;;  %331 = vmatprep.subr.bf16.mxu1 %v348_v0  ;;  %v30_v31 = vld [vmem:[%s605_s0 + $0x80] sm:$0xff]  ;;  %v32_v35 = vld [vmem:[%s605_s0 + $0x90] sm:$0xff]  ;;  %v19_v36 = vld [vmem:[%s605_s0 + $0x28] sm:$0xff] }
   0xa   :  { %v35_v37 = vld [vmem:[%s605_s0 + $0xa8] sm:$0xff]  ;;  %v18_v38 = vld [vmem:[%s605_s0 + $0x20] sm:$0xff]  ;;  %v21_v40 = vld [vmem:[%s605_s0 + $0x38] sm:$0xff] }
   0xb   :  { %v34_v39 = vld [vmem:[%s605_s0 + $0xa0] sm:$0xff]  ;;  %v37_v41 = vld [vmem:[%s605_s0 + $0xb8] sm:$0xff]  ;;  %v20_v42 = vld [vmem:[%s605_s0 + $0x30] sm:$0xff] }
   0xc   :  { %310 = vmatpush1.bf16.msra.mxu0 %v309_v11  ;;  %340 = vmatpush1.bf16.msra.mxu1 %v309_v11  ;;  %v36_v43 = vld [vmem:[%s605_s0 + $0xb0] sm:$0xff]  ;;  %v23_v44 = vld [vmem:[%s605_s0 + $0x48] sm:$0xff]  ;;  %v22_v46 = vld [vmem:[%s605_s0 + $0x40] sm:$0xff] }
   0xd   :  { %311 = vmatprep.subr.bf16.mxu0 %v348_v0  ;;  %332 = vmatprep.subr.bf16.mxu1 %v348_v0  ;;  %v39_v45 = vld [vmem:[%s605_s0 + $0xc8] sm:$0xff]  ;;  %v38_v47 = vld [vmem:[%s605_s0 + $0xc0] sm:$0xff]  ;;  %v25_v48 = vld [vmem:[%s605_s0 + $0x58] sm:$0xff] }
   0xe   :  { %v41_v49 = vld [vmem:[%s605_s0 + $0xd8] sm:$0xff]  ;;  %v24_v50 = vld [vmem:[%s605_s0 + $0x50] sm:$0xff]  ;;  %v27_v52 = vld [vmem:[%s605_s0 + $0x68] sm:$0xff] }
   0xf   :  { %v40_v51 = vld [vmem:[%s605_s0 + $0xd0] sm:$0xff]  ;;  %v43_v53 = vld [vmem:[%s605_s0 + $0xe8] sm:$0xff]  ;;  %v26_v54 = vld [vmem:[%s605_s0 + $0x60] sm:$0xff] }
  0x10   :  { %313 = vmatpush1.bf16.msra.mxu0 %v312_v14  ;;  %341 = vmatpush1.bf16.msra.mxu1 %v312_v14  ;;  %v42_v55 = vld [vmem:[%s605_s0 + $0xe0] sm:$0xff]  ;;  %v29_v56 = vld [vmem:[%s605_s0 + $0x78] sm:$0xff]  ;;  %v28_v58 = vld [vmem:[%s605_s0 + $0x70] sm:$0xff] }
  0x11   :  { %314 = vmatprep.subr.bf16.mxu0 %v348_v0  ;;  %333 = vmatprep.subr.bf16.mxu1 %v348_v0  ;;  %v45_v57 = vld [vmem:[%s605_s0 + $0xf8] sm:$0xff]  ;;  %v44_v59 = vld [vmem:[%s605_s0 + $0xf0] sm:$0xff]  ;;  %v285_v60 = vld [vmem:[%s606_s2] ss:$0 sm:$0xff] }
  0x14   :  { %316 = vmatpush1.bf16.msra.mxu0 %v315_v17  ;;  %342 = vmatpush1.bf16.msra.mxu1 %v315_v17 }
  0x15   :  { %317 = vmatprep.subr.bf16.mxu0 %v348_v0  ;;  %334 = vmatprep.subr.bf16.mxu1 %v348_v0 }
  0x18   :  { %319 = vmatpush1.bf16.msra.mxu0 %v318_v20  ;;  %343 = vmatpush1.bf16.msra.mxu1 %v318_v20 }
  0x19   :  { %320 = vmatprep.subr.bf16.mxu0 %v348_v0  ;;  %335 = vmatprep.subr.bf16.mxu1 %v348_v0 }
  0x1c   :  { %322 = vmatpush1.bf16.msra.mxu0 %v321_v23  ;;  %344 = vmatpush1.bf16.msra.mxu1 %v321_v23 }
  0x1d   :  { %323 = vmatprep.subr.bf16.mxu0 %v348_v0  ;;  %336 = vmatprep.subr.bf16.mxu1 %v348_v0 }
  0x20   :  { %325 = vmatpush1.bf16.msra.mxu0 %v324_v26  ;;  %345 = vmatpush1.bf16.msra.mxu1 %v324_v26 }
  0x21   :  { %326 = vmatprep.subr.bf16.mxu0 %v348_v0  ;;  %337 = vmatprep.subr.bf16.mxu1 %v348_v0 }
  0x24   :  { %328 = vmatpush1.bf16.msra.mxu0 %v327_v29  ;;  %346 = vmatpush1.bf16.msra.mxu1 %v327_v29 }
  0x27   :  { %185 = vmatmul.mubr.f32.vlgmr.msra.gmra.mrb[0].mxu0 %v14_v30  ;;  %225 = vmatmul.mubr.f32.vlgmr.msra.gmra.mrb[0].mxu1 %v30_v31 }
  0x28   :  { %287 = vmatprep.mubr.msk.f32.mxu0 %vm71_vm0, %v17_v32  ;;  %295 = vmatprep.mubr.msk.f32.mxu1 %vm71_vm0, %v33_v33 }
  0x2b   :  { %190 = vmatmul.mubr.f32.gmra.mrb[2].mxu0 %v16_v34  ;;  %230 = vmatmul.mubr.f32.gmra.mrb[2].mxu1 %v32_v35 }
  0x2c   :  { %288 = vmatprep.mubr.msk.f32.mxu0 %vm71_vm0, %v19_v36  ;;  %296 = vmatprep.mubr.msk.f32.mxu1 %vm71_vm0, %v35_v37 }
  0x2f   :  { %195 = vmatmul.mubr.f32.gmra.mrb[4].mxu0 %v18_v38  ;;  %235 = vmatmul.mubr.f32.gmra.mrb[4].mxu1 %v34_v39 }
  0x30   :  { %289 = vmatprep.mubr.msk.f32.mxu0 %vm71_vm0, %v21_v40  ;;  %297 = vmatprep.mubr.msk.f32.mxu1 %vm71_vm0, %v37_v41 }
  0x33   :  { %200 = vmatmul.mubr.f32.gmra.mrb[6].mxu0 %v20_v42  ;;  %240 = vmatmul.mubr.f32.gmra.mrb[6].mxu1 %v36_v43 }
  0x34   :  { %290 = vmatprep.mubr.msk.f32.mxu0 %vm71_vm0, %v23_v44  ;;  %298 = vmatprep.mubr.msk.f32.mxu1 %vm71_vm0, %v39_v45 }
  0x37   :  { %205 = vmatmul.mubr.f32.gmra.mrb[8].mxu0 %v22_v46  ;;  %245 = vmatmul.mubr.f32.gmra.mrb[8].mxu1 %v38_v47 }
  0x38   :  { %291 = vmatprep.mubr.msk.f32.mxu0 %vm71_vm0, %v25_v48  ;;  %299 = vmatprep.mubr.msk.f32.mxu1 %vm71_vm0, %v41_v49 }
  0x3b   :  { %210 = vmatmul.mubr.f32.gmra.mrb[10].mxu0 %v24_v50  ;;  %250 = vmatmul.mubr.f32.gmra.mrb[10].mxu1 %v40_v51 }
  0x3c   :  { %292 = vmatprep.mubr.msk.f32.mxu0 %vm71_vm0, %v27_v52  ;;  %300 = vmatprep.mubr.msk.f32.mxu1 %vm71_vm0, %v43_v53 }
  0x3f   :  { %215 = vmatmul.mubr.f32.gmra.mrb[12].mxu0 %v26_v54  ;;  %255 = vmatmul.mubr.f32.gmra.mrb[12].mxu1 %v42_v55 }
  0x40   :  { %293 = vmatprep.mubr.msk.f32.mxu0 %vm71_vm0, %v29_v56  ;;  %301 = vmatprep.mubr.msk.f32.mxu1 %vm71_vm0, %v45_v57 }
  0x43   :  { %220 = vmatmul.mubr.f32.gmra.mrb[14].mxu0 %v28_v58  ;;  %260 = vmatmul.mubr.f32.gmra.mrb[14].mxu1 %v44_v59 }
  0xfa   :  { %v186_v61 = vpop.f32.mrb[0].mxu0  ;;  %v226_v62 = vpop.f32.mrb[0].mxu1 }
  0xfb   :  { %v187_v63 = vadd.f32 %v285_v60, %v186_v61  ;;  %v227_v0 = vadd.f32 %v285_v60, %v226_v62  ;;  %v188_v1 = vpop.f32.mrb[1].mxu0  ;;  %v228_v2 = vpop.f32.mrb[1].mxu1 }
  0xfd   :  { %265 = vst [vmem:[%s607_s3] sm:$0xff] %v187_v63  ;;  %273 = vst [vmem:[%s607_s3 + $0x40] sm:$0xff] %v227_v0 }
  0xfe   :  { %v191_v3 = vpop.f32.mrb[2].mxu0  ;;  %v231_v4 = vpop.f32.mrb[2].mxu1 }
  0xff   :  { %v192_v5 = vadd.f32 %v285_v60, %v191_v3  ;;  %v232_v6 = vadd.f32 %v285_v60, %v231_v4  ;;  %v193_v7 = vpop.f32.mrb[3].mxu0  ;;  %v233_v8 = vpop.f32.mrb[3].mxu1 }
 0x101   :  { %266 = vst [vmem:[%s607_s3 + $0x8] sm:$0xff] %v192_v5  ;;  %274 = vst [vmem:[%s607_s3 + $0x48] sm:$0xff] %v232_v6 }
 0x102   :  { %v196_v9 = vpop.f32.mrb[4].mxu0  ;;  %v236_v10 = vpop.f32.mrb[4].mxu1 }
 0x103   :  { %v197_v11 = vadd.f32 %v285_v60, %v196_v9  ;;  %v237_v12 = vadd.f32 %v285_v60, %v236_v10  ;;  %v198_v13 = vpop.f32.mrb[5].mxu0  ;;  %v238_v14 = vpop.f32.mrb[5].mxu1 }
 0x105   :  { %267 = vst [vmem:[%s607_s3 + $0x10] sm:$0xff] %v197_v11  ;;  %275 = vst [vmem:[%s607_s3 + $0x50] sm:$0xff] %v237_v12 }
 0x106   :  { %v201_v15 = vpop.f32.mrb[6].mxu0  ;;  %v241_v16 = vpop.f32.mrb[6].mxu1 }
 0x107   :  { %v202_v17 = vadd.f32 %v285_v60, %v201_v15  ;;  %v242_v18 = vadd.f32 %v285_v60, %v241_v16  ;;  %v203_v19 = vpop.f32.mrb[7].mxu0  ;;  %v243_v20 = vpop.f32.mrb[7].mxu1 }
 0x109   :  { %268 = vst [vmem:[%s607_s3 + $0x18] sm:$0xff] %v202_v17  ;;  %276 = vst [vmem:[%s607_s3 + $0x58] sm:$0xff] %v242_v18 }
 0x10a   :  { %v206_v21 = vpop.f32.mrb[8].mxu0  ;;  %v246_v22 = vpop.f32.mrb[8].mxu1 }
 0x10b   :  { %v207_v23 = vadd.f32 %v285_v60, %v206_v21  ;;  %v247_v24 = vadd.f32 %v285_v60, %v246_v22  ;;  %v208_v25 = vpop.f32.mrb[9].mxu0  ;;  %v248_v26 = vpop.f32.mrb[9].mxu1 }
 0x10d   :  { %269 = vst [vmem:[%s607_s3 + $0x20] sm:$0xff] %v207_v23  ;;  %277 = vst [vmem:[%s607_s3 + $0x60] sm:$0xff] %v247_v24 }
 0x10e   :  { %v211_v27 = vpop.f32.mrb[10].mxu0  ;;  %v251_v28 = vpop.f32.mrb[10].mxu1 }
 0x10f   :  { %v212_v29 = vadd.f32 %v285_v60, %v211_v27  ;;  %v252_v30 = vadd.f32 %v285_v60, %v251_v28  ;;  %v213_v31 = vpop.f32.mrb[11].mxu0  ;;  %v253_v32 = vpop.f32.mrb[11].mxu1 }
 0x111   :  { %270 = vst [vmem:[%s607_s3 + $0x28] sm:$0xff] %v212_v29  ;;  %278 = vst [vmem:[%s607_s3 + $0x68] sm:$0xff] %v252_v30 }
 0x112   :  { %v216_v33 = vpop.f32.mrb[12].mxu0  ;;  %v256_v34 = vpop.f32.mrb[12].mxu1 }
 0x113   :  { %v217_v35 = vadd.f32 %v285_v60, %v216_v33  ;;  %v257_v36 = vadd.f32 %v285_v60, %v256_v34  ;;  %v218_v37 = vpop.f32.mrb[13].mxu0  ;;  %v258_v38 = vpop.f32.mrb[13].mxu1 }
 0x115   :  { %271 = vst [vmem:[%s607_s3 + $0x30] sm:$0xff] %v217_v35  ;;  %279 = vst [vmem:[%s607_s3 + $0x70] sm:$0xff] %v257_v36 }
 0x116   :  { %v221_v39 = vpop.f32.mrb[14].mxu0  ;;  %v261_v40 = vpop.f32.mrb[14].mxu1 }
 0x117   :  { %v222_v41 = vadd.f32 %v285_v60, %v221_v39  ;;  %v262_v42 = vadd.f32 %v285_v60, %v261_v40  ;;  %v223_v43 = vpop.f32.mrb[15].mxu0  ;;  %v263_v44 = vpop.f32.mrb[15].mxu1 }
 0x119   :  { %272 = vst [vmem:[%s607_s3 + $0x38] sm:$0xff] %v222_v41  ;;  %280 = vst [vmem:[%s607_s3 + $0x78] sm:$0xff] %v262_v42 }

</bundles_post_ra>
